<compile_context>
chip_gen: v7x
topology: tpu7x:2x2x1
jax: 0.10.0
libtpu: 0.0.40
codegen_flags: <defaults>
</compile_context>

<pallas_src>
import functools

import jax
import jax.numpy as jnp
from jax import lax
from jax.experimental import pallas as pl
from jax.experimental.pallas import tpu as pltpu

EPS = 1e-5
_VMEM_LIMIT = 32 * 1024 * 1024   # safe on v5e/v6e (128 MiB phys) and v7x (64 MiB)


def _round_up(n, m):
    return (n + m - 1) // m * m


def _pad_rows(x, n_pad):
    n = x.shape[0]
    return x if n_pad == n else jnp.pad(x, ((0, n_pad - n), (0, 0)))


def _compiler_params():
    return pltpu.CompilerParams(dimension_semantics=("parallel",),
                                vmem_limit_bytes=_VMEM_LIMIT)


# ---------------------------------------------------------------------------
# Kernels
# ---------------------------------------------------------------------------
def _layer_kernel(tm, n_valid, apply_affine, with_mask,
                  x_ref, scale_ref, shift_ref, w_ref, y_ref, stat_ref):
    """One row tile of [optional relu(x*scale + shift)] @ w, plus per-channel
    sum / sum-of-squares partials of the result (for the following BatchNorm)."""
    x = x_ref[...]
    if apply_affine:
        x = jnp.maximum(x * scale_ref[...] + shift_ref[...], 0.0)
        if with_mask:
            # Zero rows past the true row count so they do not pollute the stats.
            row = pl.program_id(0) * tm + lax.broadcasted_iota(jnp.int32, x.shape, 0)
            x = jnp.where(row < n_valid, x, 0.0)
    y = jnp.dot(x, w_ref[...], preferred_element_type=jnp.float32)
    y_ref[...] = y
    stat_ref[0, 0:1, :] = jnp.sum(y, axis=0, keepdims=True)
    stat_ref[0, 1:2, :] = jnp.sum(y * y, axis=0, keepdims=True)


def _dual_matmul_kernel(x_ref, scale_ref, shift_ref, wa_ref, wb_ref,
                        ya_ref, yb_ref):
    """conv_2 taps: a = relu(x*scale + shift); ya = a @ wa; yb = a @ wb."""
    a = jnp.maximum(x_ref[...] * scale_ref[...] + shift_ref[...], 0.0)
    ya_ref[...] = jnp.dot(a, wa_ref[...], preferred_element_type=jnp.float32)
    yb_ref[...] = jnp.dot(a, wb_ref[...], preferred_element_type=jnp.float32)


# ---------------------------------------------------------------------------
# Gridded pallas_call wrappers
# ---------------------------------------------------------------------------
def _run_layer(x_rows, w, scale, shift, *, apply_affine, tm_max=256):
    """y = [relu(x*scale+shift) if apply_affine else x] @ w, row-tiled.
    Returns (y[:n], per-channel sum, per-channel sum-of-squares) over n rows."""
    n, cin = x_rows.shape
    cout = w.shape[1]
    tm = min(tm_max, _round_up(n, 8))
    n_pad = _round_up(n, tm)
    nt = n_pad // tm
    with_mask = apply_affine and (n_pad != n)

    if scale is None:                      # first layer: no preceding BN/ReLU
        scale = jnp.ones((1, cin), jnp.float32)
        shift = jnp.zeros((1, cin), jnp.float32)

    kernel = functools.partial(_layer_kernel, tm, n, apply_affine, with_mask)
    y_pad, stats = pl.pallas_call(
        kernel,
        grid=(nt,),
        in_specs=[
            pl.BlockSpec((tm, cin), lambda i: (i, 0)),      # activations (tiled)
            pl.BlockSpec((1, cin), lambda i: (0, 0)),       # scale  (resident)
            pl.BlockSpec((1, cin), lambda i: (0, 0)),       # shift  (resident)
            pl.BlockSpec((cin, cout), lambda i: (0, 0)),    # weights (resident)
        ],
        out_specs=(
            pl.BlockSpec((tm, cout), lambda i: (i, 0)),     # lane-dense tiles
            pl.BlockSpec((1, 2, cout), lambda i: (i, 0, 0)),  # per-tile partials
        ),
        out_shape=(
            jax.ShapeDtypeStruct((n_pad, cout), jnp.float32),
            jax.ShapeDtypeStruct((nt, 2, cout), jnp.float32),
        ),
        compiler_params=_compiler_params(),
    )(_pad_rows(x_rows, n_pad), scale, shift, w)

    totals = jnp.sum(stats, axis=0)                          # (2, cout)
    return y_pad[:n], totals[0], totals[1]


def _run_conv2_taps(x_rows, scale, shift, wa, wb, *, tm_max=256):
    """Both conv_2 taps on the full aligned row set (shifted add done outside)."""
    n, cin = x_rows.shape
    cout = wa.shape[1]
    tm = min(tm_max, _round_up(n, 8))
    n_pad = _round_up(n, tm)
    nt = n_pad // tm
    ya_pad, yb_pad = pl.pallas_call(
        _dual_matmul_kernel,
        grid=(nt,),
        in_specs=[
            pl.BlockSpec((tm, cin), lambda i: (i, 0)),
            pl.BlockSpec((1, cin), lambda i: (0, 0)),
            pl.BlockSpec((1, cin), lambda i: (0, 0)),
            pl.BlockSpec((cin, cout), lambda i: (0, 0)),
            pl.BlockSpec((cin, cout), lambda i: (0, 0)),
        ],
        out_specs=(
            pl.BlockSpec((tm, cout), lambda i: (i, 0)),
            pl.BlockSpec((tm, cout), lambda i: (i, 0)),
        ),
        out_shape=(
            jax.ShapeDtypeStruct((n_pad, cout), jnp.float32),
            jax.ShapeDtypeStruct((n_pad, cout), jnp.float32),
        ),
        compiler_params=_compiler_params(),
    )(_pad_rows(x_rows, n_pad), scale, shift, wa, wb)
    return ya_pad[:n], yb_pad[:n]


def _fold_bn(col_sum, col_sumsq, count, gamma, beta):
    """Training-mode BN folded to per-channel (scale, shift)."""
    mean = col_sum / count
    var = jnp.maximum(col_sumsq / count - mean * mean, 0.0)   # biased variance
    scale = gamma * lax.rsqrt(var + EPS)
    shift = beta - mean * scale
    return scale, shift


# ---------------------------------------------------------------------------
# Forward pass
# ---------------------------------------------------------------------------
def metal_network_forward(x_ncl, params, *, tm_max=256):
    """x_ncl: (B, 7, L) float32 (PyTorch Conv1d NCL layout)."""
    B, C, L = x_ncl.shape
    assert C == 7
    (w0, _b0, g0, be0, w1, _b1, g1, be1,
     w2a, w2b, _b2, g2, be2, w3, _b3, g3, be3) = params

    # NCL -> channel-last rows, channels padded 7 -> 8 (zeros; no effect).
    # Tiny (8 floats/row) next to the 1024/512-wide intermediates, so done in XLA.
    x_rows = jnp.pad(jnp.transpose(x_ncl, (0, 2, 1)).reshape(B * L, 7),
                     ((0, 0), (0, 1)))
    w0p = jnp.pad(w0, ((0, 1), (0, 0)))                       # (8, 1024)
    n01 = B * L
    n23 = B * (L - 1)

    # conv_0 sweep (+ bn_0 stats); no bias (cancelled by BN mean subtraction)
    h0, s0, q0 = _run_layer(x_rows, w0p, None, None,
                            apply_affine=False, tm_max=tm_max)
    sc0, sh0 = _fold_bn(s0, q0, n01, g0, be0)

    # bn_0 + relu fused into conv_1 sweep (+ bn_1 stats)
    h1, s1, q1 = _run_layer(h0, w1, sc0, sh0, apply_affine=True, tm_max=tm_max)
    sc1, sh1 = _fold_bn(s1, q1, n01, g1, be1)

    # bn_1 + relu fused into both conv_2 taps over the full aligned B*L rows;
    # the t / t+1 shifted add happens on the narrow 128-wide outputs.
    ya, yb = _run_conv2_taps(h1, sc1, sh1, w2a, w2b, tm_max=tm_max)
    h2 = (ya.reshape(B, L, -1)[:, :L - 1]
          + yb.reshape(B, L, -1)[:, 1:]).reshape(n23, -1)
    m2 = jnp.mean(h2, axis=0, keepdims=True)
    v2 = jnp.maximum(jnp.mean(h2 * h2, axis=0, keepdims=True) - m2 * m2, 0.0)
    sc2 = g2 * lax.rsqrt(v2 + EPS)
    sh2 = be2 - m2 * sc2

    # bn_2 + relu fused into conv_3 sweep; outputs padded 64 -> 128 channels so
    # the kernel's stores stay lane-dense (pad sliced off below).
    w3p = jnp.pad(w3, ((0, 0), (0, 64)))                      # (128, 128)
    h3, s3, q3 = _run_layer(h2, w3p, sc2, sh2, apply_affine=True, tm_max=tm_max)
    sc3, sh3 = _fold_bn(s3, q3, n23,
                        jnp.pad(g3, ((0, 0), (0, 64))),
                        jnp.pad(be3, ((0, 0), (0, 64))))

    # final bn_3 + relu (cheap 128-wide elementwise), drop channel padding.
    out = jnp.maximum(h3 * sc3 + sh3, 0.0)[:, :64]

    # Match PyTorch: net has layout (B, 64, L-1); outputs = net.view(-1, 64).
    net = jnp.transpose(out.reshape(B, L - 1, 64), (0, 2, 1))
    return net.reshape(-1, 64)


# ---------------------------------------------------------------------------
# Params + pure-JAX reference
# ---------------------------------------------------------------------------
def init_params(key):
    """Deterministic params matching PyTorch defaults.
    Conv weights stored as (C_in, C_out) per kernel tap; BN gamma=1, beta=0."""
    ks = jax.random.split(key, 8)

    def conv_init(kw, kb, cin, cout, ksize):
        bound = 1.0 / jnp.sqrt(cin * ksize)
        w = jax.random.uniform(kw, (ksize, cin, cout), jnp.float32, -bound, bound)
        b = jax.random.uniform(kb, (1, cout), jnp.float32, -bound, bound)
        return w, b

    w0, b0 = conv_init(ks[0], ks[1], 7, 1024, 1)
    w1, b1 = conv_init(ks[2], ks[3], 1024, 512, 1)
    w2, b2 = conv_init(ks[4], ks[5], 512, 128, 2)
    w3, b3 = conv_init(ks[6], ks[7], 128, 64, 1)

    def bn_init(c):
        return jnp.ones((1, c), jnp.float32), jnp.zeros((1, c), jnp.float32)

    g0, be0 = bn_init(1024)
    g1, be1 = bn_init(512)
    g2, be2 = bn_init(128)
    g3, be3 = bn_init(64)

    return (w0[0], b0, g0, be0,
            w1[0], b1, g1, be1,
            w2[0], w2[1], b2, g2, be2,
            w3[0], b3, g3, be3)


def reference_forward(x_ncl, params):
    """Pure-JAX reference of the PyTorch forward (training-mode BN), *including*
    the conv biases that the kernel path provably drops."""
    (w0, b0, g0, be0, w1, b1, g1, be1,
     w2a, w2b, b2, g2, be2, w3, b3, g3, be3) = params
    x = jnp.transpose(x_ncl, (0, 2, 1))                       # (B, L, 7)

    def bn_relu(y, g, be):
        m = jnp.mean(y, axis=(0, 1), keepdims=True)
        v = jnp.mean((y - m) ** 2, axis=(0, 1), keepdims=True)
        return jnp.maximum((y - m) / jnp.sqrt(v + EPS) * g + be, 0.0)

    h0 = bn_relu(jnp.einsum('blc,cd->bld', x, w0) + b0, g0, be0)
    h1 = bn_relu(jnp.einsum('blc,cd->bld', h0, w1) + b1, g1, be1)
    h2 = bn_relu(jnp.einsum('blc,cd->bld', h1[:, :-1], w2a)
                 + jnp.einsum('blc,cd->bld', h1[:, 1:], w2b) + b2, g2, be2)
    h3 = bn_relu(jnp.einsum('blc,cd->bld', h2, w3) + b3, g3, be3)
    net = jnp.transpose(h3, (0, 2, 1))                        # (B, 64, L-1)
    return net.reshape(-1, 64)


if __name__ == "__main__":
    key = jax.random.PRNGKey(0)
    k_x, k_p = jax.random.split(key)

    B, L = 2, 16
    x = jax.random.normal(k_x, (B, 7, L), jnp.float32)        # PyTorch NCL input
    params = init_params(k_p)

    out = jax.block_until_ready(jax.jit(metal_network_forward)(x, params))
    ref = jax.block_until_ready(jax.jit(reference_forward)(x, params))

    assert out.shape == (B * (L - 1), 64), out.shape
    assert ref.shape == out.shape
    if not jnp.allclose(out, ref, rtol=2e-3, atol=2e-3):
        max_err = float(jnp.max(jnp.abs(out - ref)))
        raise AssertionError(
            f"Pallas kernel does not match reference (max abs err = {max_err})")
    print("KERNEL_OK")
</pallas_src>

<mosaic_0001>
module attributes {stable_mosaic.version = 11 : i64} {
  func.func @_layer_kernel(%arg0: i32, %arg1: memref<32x8xf32, #tpu.memory_space<vmem>>, %arg2: memref<1x8xf32, #tpu.memory_space<vmem>>, %arg3: memref<1x8xf32, #tpu.memory_space<vmem>>, %arg4: memref<8x1024xf32, #tpu.memory_space<vmem>>, %arg5: memref<32x1024xf32, #tpu.memory_space<vmem>>, %arg6: memref<1x2x1024xf32, #tpu.memory_space<vmem>>) attributes {dimension_semantics = [#tpu.dimension_semantics<parallel>], iteration_bounds = array<i64: 1>, scalar_prefetch = 0 : i64, scratch_operands = 0 : i64, tpu.core_type = #tpu.core_type<tc>, window_params = [{transform_indices = @transform_0, window_bounds = array<i64: 32, 8>}, {pipeline_mode = #tpu.pipeline_mode<synchronous>, transform_indices = @transform_1, window_bounds = array<i64: 1, 8>}, {pipeline_mode = #tpu.pipeline_mode<synchronous>, transform_indices = @transform_2, window_bounds = array<i64: 1, 8>}, {pipeline_mode = #tpu.pipeline_mode<synchronous>, transform_indices = @transform_3, window_bounds = array<i64: 8, 1024>}, {transform_indices = @transform_4, window_bounds = array<i64: 32, 1024>}, {transform_indices = @transform_5, window_bounds = array<i64: 1, 2, 1024>}]} {
    %c0 = arith.constant 0 : index
    %c0_0 = arith.constant 0 : index
    %0 = vector.load %arg1[%c0, %c0_0] : memref<32x8xf32, #tpu.memory_space<vmem>>, vector<32x8xf32>
    %c0_1 = arith.constant 0 : index
    %c0_2 = arith.constant 0 : index
    %1 = vector.load %arg4[%c0_1, %c0_2] : memref<8x1024xf32, #tpu.memory_space<vmem>>, vector<8x1024xf32>
    %cst = arith.constant dense<0.000000e+00> : vector<32x1024xf32>
    %2 = tpu.matmul %0, %1, %cst {dimension_numbers = #tpu.dot_dimension_numbers<[1], [0], [0], [1], [0, 0, 1, 1], [], []>} : vector<32x8xf32>, vector<8x1024xf32>, vector<32x1024xf32> -> vector<32x1024xf32>
    %c0_3 = arith.constant 0 : index
    %c0_4 = arith.constant 0 : index
    %3 = vector.load %arg5[%c0_3, %c0_4] : memref<32x1024xf32, #tpu.memory_space<vmem>>, vector<32x1024xf32>
    tpu.vector_store %arg5[%c0_3, %c0_4], %2 {strides = array<i32>} : memref<32x1024xf32, #tpu.memory_space<vmem>>, vector<32x1024xf32>,
    %cst_5 = arith.constant dense<0.000000e+00> : vector<1024xf32>
    %4 = vector.multi_reduction <add>, %2, %cst_5 [0] : vector<32x1024xf32> to vector<1024xf32>
    %5 = vector.shape_cast %4 : vector<1024xf32> to vector<1x1024xf32>
    %c0_6 = arith.constant 0 : index
    %c0_7 = arith.constant 0 : index
    %c0_8 = arith.constant 0 : index
    %6 = vector.load %arg6[%c0_6, %c0_7, %c0_8] : memref<1x2x1024xf32, #tpu.memory_space<vmem>>, vector<1x1x1024xf32>
    %7 = vector.shape_cast %6 : vector<1x1x1024xf32> to vector<1x1024xf32>
    %8 = vector.shape_cast %5 : vector<1x1024xf32> to vector<1x1x1024xf32>
    tpu.vector_store %arg6[%c0_6, %c0_7, %c0_8], %8 {strides = array<i32>} : memref<1x2x1024xf32, #tpu.memory_space<vmem>>, vector<1x1x1024xf32>,
    %9 = arith.mulf %2, %2 : vector<32x1024xf32>
    %cst_9 = arith.constant dense<0.000000e+00> : vector<1024xf32>
    %10 = vector.multi_reduction <add>, %9, %cst_9 [0] : vector<32x1024xf32> to vector<1024xf32>
    %11 = vector.shape_cast %10 : vector<1024xf32> to vector<1x1024xf32>
    %c0_10 = arith.constant 0 : index
    %c1 = arith.constant 1 : index
    %c0_11 = arith.constant 0 : index
    %12 = vector.load %arg6[%c0_10, %c1, %c0_11] : memref<1x2x1024xf32, #tpu.memory_space<vmem>>, vector<1x1x1024xf32>
    %13 = vector.shape_cast %12 : vector<1x1x1024xf32> to vector<1x1024xf32>
    %14 = vector.shape_cast %11 : vector<1x1024xf32> to vector<1x1x1024xf32>
    tpu.vector_store %arg6[%c0_10, %c1, %c0_11], %14 {strides = array<i32>} : memref<1x2x1024xf32, #tpu.memory_space<vmem>>, vector<1x1x1024xf32>,
    return
  }
  func.func @transform_0(%arg0: i32) -> (i32, i32) {
    %c0_i32 = arith.constant 0 : i32
    %c0_i32_0 = arith.constant 0 : i32
    return %arg0, %c0_i32 : i32, i32
  }
  func.func @transform_1(%arg0: i32) -> (i32, i32) {
    %c0_i32 = arith.constant 0 : i32
    %c0_i32_0 = arith.constant 0 : i32
    %c0_i32_1 = arith.constant 0 : i32
    return %c0_i32, %c0_i32_0 : i32, i32
  }
  func.func @transform_2(%arg0: i32) -> (i32, i32) {
    %c0_i32 = arith.constant 0 : i32
    %c0_i32_0 = arith.constant 0 : i32
    %c0_i32_1 = arith.constant 0 : i32
    return %c0_i32, %c0_i32_0 : i32, i32
  }
  func.func @transform_3(%arg0: i32) -> (i32, i32) {
    %c0_i32 = arith.constant 0 : i32
    %c0_i32_0 = arith.constant 0 : i32
    %c0_i32_1 = arith.constant 0 : i32
    return %c0_i32, %c0_i32_0 : i32, i32
  }
  func.func @transform_4(%arg0: i32) -> (i32, i32) {
    %c0_i32 = arith.constant 0 : i32
    %c0_i32_0 = arith.constant 0 : i32
    return %arg0, %c0_i32 : i32, i32
  }
  func.func @transform_5(%arg0: i32) -> (i32, i32, i32) {
    %c0_i32 = arith.constant 0 : i32
    %c0_i32_0 = arith.constant 0 : i32
    %c0_i32_1 = arith.constant 0 : i32
    return %arg0, %c0_i32, %c0_i32_0 : i32, i32, i32
  }
}

module attributes {stable_mosaic.version = 11 : i64} {
  func.func @_layer_kernel(%arg0: i32, %arg1: memref<32x1024xf32, #tpu.memory_space<vmem>>, %arg2: memref<1x1024xf32, #tpu.memory_space<vmem>>, %arg3: memref<1x1024xf32, #tpu.memory_space<vmem>>, %arg4: memref<1024x512xf32, #tpu.memory_space<vmem>>, %arg5: memref<32x512xf32, #tpu.memory_space<vmem>>, %arg6: memref<1x2x512xf32, #tpu.memory_space<vmem>>) attributes {dimension_semantics = [#tpu.dimension_semantics<parallel>], iteration_bounds = array<i64: 1>, scalar_prefetch = 0 : i64, scratch_operands = 0 : i64, tpu.core_type = #tpu.core_type<tc>, window_params = [{transform_indices = @transform_0, window_bounds = array<i64: 32, 1024>}, {pipeline_mode = #tpu.pipeline_mode<synchronous>, transform_indices = @transform_1, window_bounds = array<i64: 1, 1024>}, {pipeline_mode = #tpu.pipeline_mode<synchronous>, transform_indices = @transform_2, window_bounds = array<i64: 1, 1024>}, {pipeline_mode = #tpu.pipeline_mode<synchronous>, transform_indices = @transform_3, window_bounds = array<i64: 1024, 512>}, {transform_indices = @transform_4, window_bounds = array<i64: 32, 512>}, {transform_indices = @transform_5, window_bounds = array<i64: 1, 2, 512>}]} {
    %c0 = arith.constant 0 : index
    %c0_0 = arith.constant 0 : index
    %0 = vector.load %arg1[%c0, %c0_0] : memref<32x1024xf32, #tpu.memory_space<vmem>>, vector<32x1024xf32>
    %c0_1 = arith.constant 0 : index
    %c0_2 = arith.constant 0 : index
    %1 = vector.load %arg2[%c0_1, %c0_2] : memref<1x1024xf32, #tpu.memory_space<vmem>>, vector<1x1024xf32>
    %2 = vector.broadcast %1 : vector<1x1024xf32> to vector<32x1024xf32>
    %3 = arith.mulf %0, %2 : vector<32x1024xf32>
    %c0_3 = arith.constant 0 : index
    %c0_4 = arith.constant 0 : index
    %4 = vector.load %arg3[%c0_3, %c0_4] : memref<1x1024xf32, #tpu.memory_space<vmem>>, vector<1x1024xf32>
    %5 = vector.broadcast %4 : vector<1x1024xf32> to vector<32x1024xf32>
    %6 = arith.addf %3, %5 : vector<32x1024xf32>
    %cst = arith.constant 0.000000e+00 : f32
    %7 = vector.broadcast %cst : f32 to vector<32x1024xf32>
    %8 = arith.maximumf %6, %7 : vector<32x1024xf32>
    %c0_5 = arith.constant 0 : index
    %c0_6 = arith.constant 0 : index
    %9 = vector.load %arg4[%c0_5, %c0_6] : memref<1024x512xf32, #tpu.memory_space<vmem>>, vector<1024x512xf32>
    %cst_7 = arith.constant dense<0.000000e+00> : vector<32x512xf32>
    %10 = tpu.matmul %8, %9, %cst_7 {dimension_numbers = #tpu.dot_dimension_numbers<[1], [0], [0], [1], [0, 0, 1, 1], [], []>} : vector<32x1024xf32>, vector<1024x512xf32>, vector<32x512xf32> -> vector<32x512xf32>
    %c0_8 = arith.constant 0 : index
    %c0_9 = arith.constant 0 : index
    %11 = vector.load %arg5[%c0_8, %c0_9] : memref<32x512xf32, #tpu.memory_space<vmem>>, vector<32x512xf32>
    tpu.vector_store %arg5[%c0_8, %c0_9], %10 {strides = array<i32>} : memref<32x512xf32, #tpu.memory_space<vmem>>, vector<32x512xf32>,
    %cst_10 = arith.constant dense<0.000000e+00> : vector<512xf32>
    %12 = vector.multi_reduction <add>, %10, %cst_10 [0] : vector<32x512xf32> to vector<512xf32>
    %13 = vector.shape_cast %12 : vector<512xf32> to vector<1x512xf32>
    %c0_11 = arith.constant 0 : index
    %c0_12 = arith.constant 0 : index
    %c0_13 = arith.constant 0 : index
    %14 = vector.load %arg6[%c0_11, %c0_12, %c0_13] : memref<1x2x512xf32, #tpu.memory_space<vmem>>, vector<1x1x512xf32>
    %15 = vector.shape_cast %14 : vector<1x1x512xf32> to vector<1x512xf32>
    %16 = vector.shape_cast %13 : vector<1x512xf32> to vector<1x1x512xf32>
    tpu.vector_store %arg6[%c0_11, %c0_12, %c0_13], %16 {strides = array<i32>} : memref<1x2x512xf32, #tpu.memory_space<vmem>>, vector<1x1x512xf32>,
    %17 = arith.mulf %10, %10 : vector<32x512xf32>
    %cst_14 = arith.constant dense<0.000000e+00> : vector<512xf32>
    %18 = vector.multi_reduction <add>, %17, %cst_14 [0] : vector<32x512xf32> to vector<512xf32>
    %19 = vector.shape_cast %18 : vector<512xf32> to vector<1x512xf32>
    %c0_15 = arith.constant 0 : index
    %c1 = arith.constant 1 : index
    %c0_16 = arith.constant 0 : index
    %20 = vector.load %arg6[%c0_15, %c1, %c0_16] : memref<1x2x512xf32, #tpu.memory_space<vmem>>, vector<1x1x512xf32>
    %21 = vector.shape_cast %20 : vector<1x1x512xf32> to vector<1x512xf32>
    %22 = vector.shape_cast %19 : vector<1x512xf32> to vector<1x1x512xf32>
    tpu.vector_store %arg6[%c0_15, %c1, %c0_16], %22 {strides = array<i32>} : memref<1x2x512xf32, #tpu.memory_space<vmem>>, vector<1x1x512xf32>,
    return
  }
  func.func @transform_0(%arg0: i32) -> (i32, i32) {
    %c0_i32 = arith.constant 0 : i32
    %c0_i32_0 = arith.constant 0 : i32
    return %arg0, %c0_i32 : i32, i32
  }
  func.func @transform_1(%arg0: i32) -> (i32, i32) {
    %c0_i32 = arith.constant 0 : i32
    %c0_i32_0 = arith.constant 0 : i32
    %c0_i32_1 = arith.constant 0 : i32
    return %c0_i32, %c0_i32_0 : i32, i32
  }
  func.func @transform_2(%arg0: i32) -> (i32, i32) {
    %c0_i32 = arith.constant 0 : i32
    %c0_i32_0 = arith.constant 0 : i32
    %c0_i32_1 = arith.constant 0 : i32
    return %c0_i32, %c0_i32_0 : i32, i32
  }
  func.func @transform_3(%arg0: i32) -> (i32, i32) {
    %c0_i32 = arith.constant 0 : i32
    %c0_i32_0 = arith.constant 0 : i32
    %c0_i32_1 = arith.constant 0 : i32
    return %c0_i32, %c0_i32_0 : i32, i32
  }
  func.func @transform_4(%arg0: i32) -> (i32, i32) {
    %c0_i32 = arith.constant 0 : i32
    %c0_i32_0 = arith.constant 0 : i32
    return %arg0, %c0_i32 : i32, i32
  }
  func.func @transform_5(%arg0: i32) -> (i32, i32, i32) {
    %c0_i32 = arith.constant 0 : i32
    %c0_i32_0 = arith.constant 0 : i32
    %c0_i32_1 = arith.constant 0 : i32
    return %arg0, %c0_i32, %c0_i32_0 : i32, i32, i32
  }
}

module attributes {stable_mosaic.version = 11 : i64} {
  func.func @_dual_matmul_kernel(%arg0: i32, %arg1: memref<32x512xf32, #tpu.memory_space<vmem>>, %arg2: memref<1x512xf32, #tpu.memory_space<vmem>>, %arg3: memref<1x512xf32, #tpu.memory_space<vmem>>, %arg4: memref<512x128xf32, #tpu.memory_space<vmem>>, %arg5: memref<512x128xf32, #tpu.memory_space<vmem>>, %arg6: memref<32x128xf32, #tpu.memory_space<vmem>>, %arg7: memref<32x128xf32, #tpu.memory_space<vmem>>) attributes {dimension_semantics = [#tpu.dimension_semantics<parallel>], iteration_bounds = array<i64: 1>, scalar_prefetch = 0 : i64, scratch_operands = 0 : i64, tpu.core_type = #tpu.core_type<tc>, window_params = [{transform_indices = @transform_0, window_bounds = array<i64: 32, 512>}, {pipeline_mode = #tpu.pipeline_mode<synchronous>, transform_indices = @transform_1, window_bounds = array<i64: 1, 512>}, {pipeline_mode = #tpu.pipeline_mode<synchronous>, transform_indices = @transform_2, window_bounds = array<i64: 1, 512>}, {pipeline_mode = #tpu.pipeline_mode<synchronous>, transform_indices = @transform_3, window_bounds = array<i64: 512, 128>}, {pipeline_mode = #tpu.pipeline_mode<synchronous>, transform_indices = @transform_4, window_bounds = array<i64: 512, 128>}, {transform_indices = @transform_5, window_bounds = array<i64: 32, 128>}, {transform_indices = @transform_6, window_bounds = array<i64: 32, 128>}]} {
    %c0 = arith.constant 0 : index
    %c0_0 = arith.constant 0 : index
    %0 = vector.load %arg1[%c0, %c0_0] : memref<32x512xf32, #tpu.memory_space<vmem>>, vector<32x512xf32>
    %c0_1 = arith.constant 0 : index
    %c0_2 = arith.constant 0 : index
    %1 = vector.load %arg2[%c0_1, %c0_2] : memref<1x512xf32, #tpu.memory_space<vmem>>, vector<1x512xf32>
    %2 = vector.broadcast %1 : vector<1x512xf32> to vector<32x512xf32>
    %3 = arith.mulf %0, %2 : vector<32x512xf32>
    %c0_3 = arith.constant 0 : index
    %c0_4 = arith.constant 0 : index
    %4 = vector.load %arg3[%c0_3, %c0_4] : memref<1x512xf32, #tpu.memory_space<vmem>>, vector<1x512xf32>
    %5 = vector.broadcast %4 : vector<1x512xf32> to vector<32x512xf32>
    %6 = arith.addf %3, %5 : vector<32x512xf32>
    %cst = arith.constant 0.000000e+00 : f32
    %7 = vector.broadcast %cst : f32 to vector<32x512xf32>
    %8 = arith.maximumf %6, %7 : vector<32x512xf32>
    %c0_5 = arith.constant 0 : index
    %c0_6 = arith.constant 0 : index
    %9 = vector.load %arg4[%c0_5, %c0_6] : memref<512x128xf32, #tpu.memory_space<vmem>>, vector<512x128xf32>
    %cst_7 = arith.constant dense<0.000000e+00> : vector<32x128xf32>
    %10 = tpu.matmul %8, %9, %cst_7 {dimension_numbers = #tpu.dot_dimension_numbers<[1], [0], [0], [1], [0, 0, 1, 1], [], []>} : vector<32x512xf32>, vector<512x128xf32>, vector<32x128xf32> -> vector<32x128xf32>
    %c0_8 = arith.constant 0 : index
    %c0_9 = arith.constant 0 : index
    %11 = vector.load %arg6[%c0_8, %c0_9] : memref<32x128xf32, #tpu.memory_space<vmem>>, vector<32x128xf32>
    tpu.vector_store %arg6[%c0_8, %c0_9], %10 {strides = array<i32>} : memref<32x128xf32, #tpu.memory_space<vmem>>, vector<32x128xf32>,
    %c0_10 = arith.constant 0 : index
    %c0_11 = arith.constant 0 : index
    %12 = vector.load %arg5[%c0_10, %c0_11] : memref<512x128xf32, #tpu.memory_space<vmem>>, vector<512x128xf32>
    %cst_12 = arith.constant dense<0.000000e+00> : vector<32x128xf32>
    %13 = tpu.matmul %8, %12, %cst_12 {dimension_numbers = #tpu.dot_dimension_numbers<[1], [0], [0], [1], [0, 0, 1, 1], [], []>} : vector<32x512xf32>, vector<512x128xf32>, vector<32x128xf32> -> vector<32x128xf32>
    %c0_13 = arith.constant 0 : index
    %c0_14 = arith.constant 0 : index
    %14 = vector.load %arg7[%c0_13, %c0_14] : memref<32x128xf32, #tpu.memory_space<vmem>>, vector<32x128xf32>
    tpu.vector_store %arg7[%c0_13, %c0_14], %13 {strides = array<i32>} : memref<32x128xf32, #tpu.memory_space<vmem>>, vector<32x128xf32>,
    return
  }
  func.func @transform_0(%arg0: i32) -> (i32, i32) {
    %c0_i32 = arith.constant 0 : i32
    %c0_i32_0 = arith.constant 0 : i32
    return %arg0, %c0_i32 : i32, i32
  }
  func.func @transform_1(%arg0: i32) -> (i32, i32) {
    %c0_i32 = arith.constant 0 : i32
    %c0_i32_0 = arith.constant 0 : i32
    %c0_i32_1 = arith.constant 0 : i32
    return %c0_i32, %c0_i32_0 : i32, i32
  }
  func.func @transform_2(%arg0: i32) -> (i32, i32) {
    %c0_i32 = arith.constant 0 : i32
    %c0_i32_0 = arith.constant 0 : i32
    %c0_i32_1 = arith.constant 0 : i32
    return %c0_i32, %c0_i32_0 : i32, i32
  }
  func.func @transform_3(%arg0: i32) -> (i32, i32) {
    %c0_i32 = arith.constant 0 : i32
    %c0_i32_0 = arith.constant 0 : i32
    %c0_i32_1 = arith.constant 0 : i32
    return %c0_i32, %c0_i32_0 : i32, i32
  }
  func.func @transform_4(%arg0: i32) -> (i32, i32) {
    %c0_i32 = arith.constant 0 : i32
    %c0_i32_0 = arith.constant 0 : i32
    %c0_i32_1 = arith.constant 0 : i32
    return %c0_i32, %c0_i32_0 : i32, i32
  }
  func.func @transform_5(%arg0: i32) -> (i32, i32) {
    %c0_i32 = arith.constant 0 : i32
    %c0_i32_0 = arith.constant 0 : i32
    return %arg0, %c0_i32 : i32, i32
  }
  func.func @transform_6(%arg0: i32) -> (i32, i32) {
    %c0_i32 = arith.constant 0 : i32
    %c0_i32_0 = arith.constant 0 : i32
    return %arg0, %c0_i32 : i32, i32
  }
}

module attributes {stable_mosaic.version = 11 : i64} {
  func.func @_layer_kernel(%arg0: i32, %arg1: memref<32x128xf32, #tpu.memory_space<vmem>>, %arg2: memref<1x128xf32, #tpu.memory_space<vmem>>, %arg3: memref<1x128xf32, #tpu.memory_space<vmem>>, %arg4: memref<128x128xf32, #tpu.memory_space<vmem>>, %arg5: memref<32x128xf32, #tpu.memory_space<vmem>>, %arg6: memref<1x2x128xf32, #tpu.memory_space<vmem>>) attributes {dimension_semantics = [#tpu.dimension_semantics<parallel>], iteration_bounds = array<i64: 1>, scalar_prefetch = 0 : i64, scratch_operands = 0 : i64, tpu.core_type = #tpu.core_type<tc>, window_params = [{transform_indices = @transform_0, window_bounds = array<i64: 32, 128>}, {pipeline_mode = #tpu.pipeline_mode<synchronous>, transform_indices = @transform_1, window_bounds = array<i64: 1, 128>}, {pipeline_mode = #tpu.pipeline_mode<synchronous>, transform_indices = @transform_2, window_bounds = array<i64: 1, 128>}, {pipeline_mode = #tpu.pipeline_mode<synchronous>, transform_indices = @transform_3, window_bounds = array<i64: 128, 128>}, {transform_indices = @transform_4, window_bounds = array<i64: 32, 128>}, {transform_indices = @transform_5, window_bounds = array<i64: 1, 2, 128>}]} {
    %c0 = arith.constant 0 : index
    %c0_0 = arith.constant 0 : index
    %0 = vector.load %arg1[%c0, %c0_0] : memref<32x128xf32, #tpu.memory_space<vmem>>, vector<32x128xf32>
    %c0_1 = arith.constant 0 : index
    %c0_2 = arith.constant 0 : index
    %1 = vector.load %arg2[%c0_1, %c0_2] : memref<1x128xf32, #tpu.memory_space<vmem>>, vector<1x128xf32>
    %2 = vector.broadcast %1 : vector<1x128xf32> to vector<32x128xf32>
    %3 = arith.mulf %0, %2 : vector<32x128xf32>
    %c0_3 = arith.constant 0 : index
    %c0_4 = arith.constant 0 : index
    %4 = vector.load %arg3[%c0_3, %c0_4] : memref<1x128xf32, #tpu.memory_space<vmem>>, vector<1x128xf32>
    %5 = vector.broadcast %4 : vector<1x128xf32> to vector<32x128xf32>
    %6 = arith.addf %3, %5 : vector<32x128xf32>
    %cst = arith.constant 0.000000e+00 : f32
    %7 = vector.broadcast %cst : f32 to vector<32x128xf32>
    %8 = arith.maximumf %6, %7 : vector<32x128xf32>
    %c32_i32 = arith.constant 32 : i32
    %9 = arith.muli %arg0, %c32_i32 : i32
    %10 = tpu.iota {dimensions = array<i32: 0>} : vector<32x128xi32>
    %11 = vector.broadcast %9 : i32 to vector<32x128xi32>
    %12 = arith.addi %11, %10 : vector<32x128xi32>
    %c30_i32 = arith.constant 30 : i32
    %13 = vector.broadcast %c30_i32 : i32 to vector<32x128xi32>
    %14 = arith.cmpi slt, %12, %13 : vector<32x128xi32>
    %cst_5 = arith.constant 0.000000e+00 : f32
    %15 = vector.broadcast %cst_5 : f32 to vector<32x128xf32>
    %16 = arith.select %14, %8, %15 : vector<32x128xi1>, vector<32x128xf32>
    %c0_6 = arith.constant 0 : index
    %c0_7 = arith.constant 0 : index
    %17 = vector.load %arg4[%c0_6, %c0_7] : memref<128x128xf32, #tpu.memory_space<vmem>>, vector<128x128xf32>
    %cst_8 = arith.constant dense<0.000000e+00> : vector<32x128xf32>
    %18 = tpu.matmul %16, %17, %cst_8 {dimension_numbers = #tpu.dot_dimension_numbers<[1], [0], [0], [1], [0, 0, 1, 1], [], []>} : vector<32x128xf32>, vector<128x128xf32>, vector<32x128xf32> -> vector<32x128xf32>
    %c0_9 = arith.constant 0 : index
    %c0_10 = arith.constant 0 : index
    %19 = vector.load %arg5[%c0_9, %c0_10] : memref<32x128xf32, #tpu.memory_space<vmem>>, vector<32x128xf32>
    tpu.vector_store %arg5[%c0_9, %c0_10], %18 {strides = array<i32>} : memref<32x128xf32, #tpu.memory_space<vmem>>, vector<32x128xf32>,
    %cst_11 = arith.constant dense<0.000000e+00> : vector<128xf32>
    %20 = vector.multi_reduction <add>, %18, %cst_11 [0] : vector<32x128xf32> to vector<128xf32>
    %21 = vector.shape_cast %20 : vector<128xf32> to vector<1x128xf32>
    %c0_12 = arith.constant 0 : index
    %c0_13 = arith.constant 0 : index
    %c0_14 = arith.constant 0 : index
    %22 = vector.load %arg6[%c0_12, %c0_13, %c0_14] : memref<1x2x128xf32, #tpu.memory_space<vmem>>, vector<1x1x128xf32>
    %23 = vector.shape_cast %22 : vector<1x1x128xf32> to vector<1x128xf32>
    %24 = vector.shape_cast %21 : vector<1x128xf32> to vector<1x1x128xf32>
    tpu.vector_store %arg6[%c0_12, %c0_13, %c0_14], %24 {strides = array<i32>} : memref<1x2x128xf32, #tpu.memory_space<vmem>>, vector<1x1x128xf32>,
    %25 = arith.mulf %18, %18 : vector<32x128xf32>
    %cst_15 = arith.constant dense<0.000000e+00> : vector<128xf32>
    %26 = vector.multi_reduction <add>, %25, %cst_15 [0] : vector<32x128xf32> to vector<128xf32>
    %27 = vector.shape_cast %26 : vector<128xf32> to vector<1x128xf32>
    %c0_16 = arith.constant 0 : index
    %c1 = arith.constant 1 : index
    %c0_17 = arith.constant 0 : index
    %28 = vector.load %arg6[%c0_16, %c1, %c0_17] : memref<1x2x128xf32, #tpu.memory_space<vmem>>, vector<1x1x128xf32>
    %29 = vector.shape_cast %28 : vector<1x1x128xf32> to vector<1x128xf32>
    %30 = vector.shape_cast %27 : vector<1x128xf32> to vector<1x1x128xf32>
    tpu.vector_store %arg6[%c0_16, %c1, %c0_17], %30 {strides = array<i32>} : memref<1x2x128xf32, #tpu.memory_space<vmem>>, vector<1x1x128xf32>,
    return
  }
  func.func @transform_0(%arg0: i32) -> (i32, i32) {
    %c0_i32 = arith.constant 0 : i32
    %c0_i32_0 = arith.constant 0 : i32
    return %arg0, %c0_i32 : i32, i32
  }
  func.func @transform_1(%arg0: i32) -> (i32, i32) {
    %c0_i32 = arith.constant 0 : i32
    %c0_i32_0 = arith.constant 0 : i32
    %c0_i32_1 = arith.constant 0 : i32
    return %c0_i32, %c0_i32_0 : i32, i32
  }
  func.func @transform_2(%arg0: i32) -> (i32, i32) {
    %c0_i32 = arith.constant 0 : i32
    %c0_i32_0 = arith.constant 0 : i32
    %c0_i32_1 = arith.constant 0 : i32
    return %c0_i32, %c0_i32_0 : i32, i32
  }
  func.func @transform_3(%arg0: i32) -> (i32, i32) {
    %c0_i32 = arith.constant 0 : i32
    %c0_i32_0 = arith.constant 0 : i32
    %c0_i32_1 = arith.constant 0 : i32
    return %c0_i32, %c0_i32_0 : i32, i32
  }
  func.func @transform_4(%arg0: i32) -> (i32, i32) {
    %c0_i32 = arith.constant 0 : i32
    %c0_i32_0 = arith.constant 0 : i32
    return %arg0, %c0_i32 : i32, i32
  }
  func.func @transform_5(%arg0: i32) -> (i32, i32, i32) {
    %c0_i32 = arith.constant 0 : i32
    %c0_i32_0 = arith.constant 0 : i32
    %c0_i32_1 = arith.constant 0 : i32
    return %arg0, %c0_i32, %c0_i32_0 : i32, i32, i32
  }
}

</mosaic_0001>

<bundles_post_ra>
// kernel: metal_network_forward.4
= control target key start
LH: loop header
LB: loop body
LE: loop exit
PB: predicated region body
PF: predicated region fallthrough
CT: control target
= control target key end

     0   :  { %v754_v3 = vmov 0.0   ;;  %vm31_vm0 = vcmask 64512   ;;  %v755_v17 = vmov 1966171168   ;;  %v519_v19 = vlaneseq  ;;  %s1014_s1 = inlined_call_operand.vmem [shape: f32[1,8], index: 1, kind: input, shape index: {}]   ;;  %s1015_s2 = inlined_call_operand.vmem [shape: f32[1,8], index: 2, kind: input, shape index: {}]   ;;  %s1016_s3 = inlined_call_operand.vmem [shape: f32[8,1024], index: 3, kind: input, shape index: {}]   ;;  %s1017_s0 = inlined_call_operand.vmem [shape: f32[32,8], index: 0, kind: input, shape index: {}]   ;;  %s1018_s4 = inlined_call_operand.vmem [shape: f32[32,1024], index: 4, kind: output, shape index: {0}]   ;;  %s1019_s5 = inlined_call_operand.vmem [shape: f32[1,2,1024], index: 5, kind: output, shape index: {1}]  }
   0x1   :  { %v24_v0 = vld [vmem:[%s1016_s3 + $0x8] sm:$0xff]  ;;  %v26_v1 = vld [vmem:[%s1016_s3 + $0x18] sm:$0xff]  ;;  %v23_v2 = vld [vmem:[%s1016_s3] sm:$0xff]  ;;  %108 = vmatprep.mubr.f32.mxu0 %v754_v3  ;;  %197 = vmatprep.mubr.f32.mxu1 %v754_v3  ;;  %v517_v18 = vunpack.c.l.s4 %v755_v17 }
   0x2   :  { %44 = vmatprep.subr.mxu0 %v24_v0  ;;  %133 = vmatprep.subr.mxu1 %v26_v1  ;;  %v25_v4 = vld [vmem:[%s1016_s3 + $0x10] sm:$0xff]  ;;  %v19_v5 = vld [vmem:[%s1017_s0] sm:$0xff]  ;;  %v28_v6 = vld [vmem:[%s1016_s3 + $0x28] sm:$0xff]  ;;  %v520_v43 = vshrl.u32 %v519_v19, 7 }
   0x3   :  { %45 = vmatpush1.msra.mxu0 %v23_v2  ;;  %134 = vmatpush1.msra.mxu1 %v25_v4  ;;  %v30_v7 = vld [vmem:[%s1016_s3 + $0x38] sm:$0xff]  ;;  %v27_v8 = vld [vmem:[%s1016_s3 + $0x20] sm:$0xff]  ;;  %v29_v9 = vld [vmem:[%s1016_s3 + $0x30] sm:$0xff]  ;;  %v518_v42 = vunpack.c.0.s8 %v517_v18 }
   0x4   :  { %735 = vmatmul.mubr.msk.f32.vlgmr.msra.gmra.mrb[0].mxu0 %vm31_vm0, %v19_v5  ;;  %739 = vmatmul.mubr.msk.f32.vlgmr.msra.gmra.mrb[0].mxu1 %vm31_vm0, %v19_v5  ;;  %v20_v10 = vld [vmem:[%s1017_s0 + $0x8] sm:$0xff]  ;;  %v21_v11 = vld [vmem:[%s1017_s0 + $0x10] sm:$0xff]  ;;  %v22_v12 = vld [vmem:[%s1017_s0 + $0x18] sm:$0xff] }
   0x5   :  { %222 = vmatprep.subr.mxu0 %v28_v6  ;;  %311 = vmatprep.subr.mxu1 %v30_v7  ;;  %v874_v60 = vsub.s32 %v518_v42, %v520_v43 }
   0x6   :  { %223 = vmatpush1.msra.mxu0 %v27_v8  ;;  %312 = vmatpush1.msra.mxu1 %v29_v9 }
   0x7   :  { %114 = vmatprep.mubr.f32.mxu0 %v754_v3  ;;  %203 = vmatprep.mubr.f32.mxu1 %v754_v3 }
   0x8   :  { %736 = vmatmul.mubr.msk.f32.gmra.mrb[2].mxu0 %vm31_vm0, %v20_v10  ;;  %740 = vmatmul.mubr.msk.f32.gmra.mrb[2].mxu1 %vm31_vm0, %v20_v10 }
   0x9   :  { %120 = vmatprep.mubr.f32.mxu0 %v754_v3  ;;  %209 = vmatprep.mubr.f32.mxu1 %v754_v3 }
   0xc   :  { %737 = vmatmul.mubr.msk.f32.gmra.mrb[4].mxu0 %vm31_vm0, %v21_v11  ;;  %741 = vmatmul.mubr.msk.f32.gmra.mrb[4].mxu1 %vm31_vm0, %v21_v11 }
   0xd   :  { %126 = vmatprep.mubr.f32.mxu0 %v754_v3  ;;  %215 = vmatprep.mubr.f32.mxu1 %v754_v3 }
  0x10   :  { %738 = vmatmul.mubr.msk.f32.gmra.mrb[6].mxu0 %vm31_vm0, %v22_v12  ;;  %742 = vmatmul.mubr.msk.f32.gmra.mrb[6].mxu1 %vm31_vm0, %v22_v12 }
  0x11   :  { %286 = vmatprep.mubr.f32.mxu0 %v754_v3  ;;  %375 = vmatprep.mubr.f32.mxu1 %v754_v3 }
  0x14   :  { %743 = vmatmul.mubr.msk.f32.vlgmr.msra.gmra.mrb[8].mxu0 %vm31_vm0, %v19_v5  ;;  %747 = vmatmul.mubr.msk.f32.vlgmr.msra.gmra.mrb[8].mxu1 %vm31_vm0, %v19_v5 }
  0x15   :  { %292 = vmatprep.mubr.f32.mxu0 %v754_v3  ;;  %381 = vmatprep.mubr.f32.mxu1 %v754_v3 }
  0x18   :  { %744 = vmatmul.mubr.msk.f32.gmra.mrb[10].mxu0 %vm31_vm0, %v20_v10  ;;  %748 = vmatmul.mubr.msk.f32.gmra.mrb[10].mxu1 %vm31_vm0, %v20_v10 }
  0x19   :  { %298 = vmatprep.mubr.f32.mxu0 %v754_v3  ;;  %387 = vmatprep.mubr.f32.mxu1 %v754_v3 }
  0x1c   :  { %745 = vmatmul.mubr.msk.f32.gmra.mrb[12].mxu0 %vm31_vm0, %v21_v11  ;;  %749 = vmatmul.mubr.msk.f32.gmra.mrb[12].mxu1 %vm31_vm0, %v21_v11 }
  0x1d   :  { %304 = vmatprep.mubr.f32.mxu0 %v754_v3  ;;  %393 = vmatprep.mubr.f32.mxu1 %v754_v3 }
  0x20   :  { %746 = vmatmul.mubr.msk.f32.gmra.mrb[14].mxu0 %vm31_vm0, %v22_v12  ;;  %750 = vmatmul.mubr.msk.f32.gmra.mrb[14].mxu1 %vm31_vm0, %v22_v12 }
  0xd7   :  { %v110_v13 = vpop.f32.mrb[0].mxu0  ;;  %v199_v14 = vpop.f32.mrb[0].mxu1 }
  0xd8   :  { %400 = vst [vmem:[%s1018_s4] sm:$0xff] %v110_v13  ;;  %402 = vst [vmem:[%s1018_s4 + $0x10] sm:$0xff] %v199_v14  ;;  %v112_v15 = vpop.f32.mrb[1].mxu0  ;;  %v201_v16 = vpop.f32.mrb[1].mxu1  ;;  %v563_v20 = vmul.f32 %v110_v13, %v110_v13  ;;  %v565_v21 = vmul.f32 %v199_v14, %v199_v14 }
  0xd9   :  { %401 = vst [vmem:[%s1018_s4 + $0x8] sm:$0xff] %v112_v15  ;;  %403 = vst [vmem:[%s1018_s4 + $0x18] sm:$0xff] %v201_v16  ;;  %v564_v22 = vmul.f32 %v112_v15, %v112_v15  ;;  %v566_v23 = vmul.f32 %v201_v16, %v201_v16 }
  0xdb   :  { %v116_v24 = vpop.f32.mrb[2].mxu0  ;;  %v205_v25 = vpop.f32.mrb[2].mxu1 }
  0xdc   :  { %408 = vst [vmem:[%s1018_s4 + $0x40] sm:$0xff] %v116_v24  ;;  %v432_v26 = vadd.f32 %v116_v24, %v110_v13  ;;  %v571_v27 = vmul.f32 %v116_v24, %v116_v24  ;;  %410 = vst [vmem:[%s1018_s4 + $0x50] sm:$0xff] %v205_v25  ;;  %v450_v28 = vadd.f32 %v205_v25, %v199_v14  ;;  %v118_v30 = vpop.f32.mrb[3].mxu0  ;;  %v207_v31 = vpop.f32.mrb[3].mxu1 }
  0xdd   :  { %v573_v29 = vmul.f32 %v205_v25, %v205_v25  ;;  %409 = vst [vmem:[%s1018_s4 + $0x48] sm:$0xff] %v118_v30  ;;  %v441_v32 = vadd.f32 %v118_v30, %v112_v15  ;;  %v572_v33 = vmul.f32 %v118_v30, %v118_v30  ;;  %411 = vst [vmem:[%s1018_s4 + $0x58] sm:$0xff] %v207_v31 }
  0xde   :  { %v459_v34 = vadd.f32 %v207_v31, %v201_v16  ;;  %v574_v35 = vmul.f32 %v207_v31, %v207_v31  ;;  %v595_v36 = vadd.f32 %v571_v27, %v563_v20 }
  0xdf   :  { %v613_v37 = vadd.f32 %v573_v29, %v565_v21  ;;  %v604_v38 = vadd.f32 %v572_v33, %v564_v22  ;;  %v122_v40 = vpop.f32.mrb[4].mxu0  ;;  %v211_v41 = vpop.f32.mrb[4].mxu1 }
  0xe0   :  { %v622_v39 = vadd.f32 %v574_v35, %v566_v23  ;;  %416 = vst [vmem:[%s1018_s4 + $0x80] sm:$0xff] %v122_v40  ;;  %v433_v44 = vadd.f32 %v432_v26, %v122_v40  ;;  %v579_v45 = vmul.f32 %v122_v40, %v122_v40  ;;  %418 = vst [vmem:[%s1018_s4 + $0x90] sm:$0xff] %v211_v41  ;;  %v124_v48 = vpop.f32.mrb[5].mxu0  ;;  %v213_v49 = vpop.f32.mrb[5].mxu1 }
  0xe1   :  { %v451_v46 = vadd.f32 %v450_v28, %v211_v41  ;;  %v581_v47 = vmul.f32 %v211_v41, %v211_v41  ;;  %417 = vst [vmem:[%s1018_s4 + $0x88] sm:$0xff] %v124_v48  ;;  %v442_v50 = vadd.f32 %v441_v32, %v124_v48  ;;  %v580_v51 = vmul.f32 %v124_v48, %v124_v48 }
  0xe2   :  { %419 = vst [vmem:[%s1018_s4 + $0x98] sm:$0xff] %v213_v49  ;;  %v460_v52 = vadd.f32 %v459_v34, %v213_v49  ;;  %v582_v53 = vmul.f32 %v213_v49, %v213_v49  ;;  %v596_v54 = vadd.f32 %v595_v36, %v579_v45 }
  0xe3   :  { %v614_v55 = vadd.f32 %v613_v37, %v581_v47  ;;  %v605_v56 = vadd.f32 %v604_v38, %v580_v51  ;;  %v128_v58 = vpop.f32.mrb[6].mxu0  ;;  %v217_v59 = vpop.f32.mrb[6].mxu1 }
  0xe4   :  { %v623_v57 = vadd.f32 %v622_v39, %v582_v53  ;;  %424 = vst [vmem:[%s1018_s4 + $0xc0] sm:$0xff] %v128_v58  ;;  %v434_v61 = vadd.f32 %v433_v44, %v128_v58  ;;  %v587_v62 = vmul.f32 %v128_v58, %v128_v58  ;;  %426 = vst [vmem:[%s1018_s4 + $0xd0] sm:$0xff] %v217_v59  ;;  %v130_v1 = vpop.f32.mrb[7].mxu0  ;;  %v219_v2 = vpop.f32.mrb[7].mxu1 }
  0xe5   :  { %v452_v63 = vadd.f32 %v451_v46, %v217_v59  ;;  %v589_v0 = vmul.f32 %v217_v59, %v217_v59  ;;  %425 = vst [vmem:[%s1018_s4 + $0xc8] sm:$0xff] %v130_v1  ;;  %v443_v3 = vadd.f32 %v442_v50, %v130_v1  ;;  %v588_v4 = vmul.f32 %v130_v1, %v130_v1 }
  0xe6   :  { %427 = vst [vmem:[%s1018_s4 + $0xd8] sm:$0xff] %v219_v2  ;;  %v461_v5 = vadd.f32 %v460_v52, %v219_v2  ;;  %v590_v6 = vmul.f32 %v219_v2, %v219_v2  ;;  %v435_v7 = vrot.slane %v434_v61, 4  ;;  %v597_v8 = vadd.f32 %v596_v54, %v587_v62 }
  0xe7   :  { %v453_v9 = vrot.slane %v452_v63, 4  ;;  %v615_v10 = vadd.f32 %v614_v55, %v589_v0  ;;  %v444_v11 = vrot.slane %v443_v3, 4  ;;  %v606_v12 = vadd.f32 %v605_v56, %v588_v4  ;;  %v888_v15 = vpop.f32.mrb[8].mxu0  ;;  %v890_v16 = vpop.f32.mrb[8].mxu1 }
  0xe8   :  { %v462_v13 = vrot.slane %v461_v5, 4  ;;  %v624_v14 = vadd.f32 %v623_v57, %v590_v6  ;;  %v436_v17 = vadd.f32 %v435_v7, %v434_v61  ;;  %v598_v18 = vrot.slane %v597_v8, 4  ;;  %404 = vst [vmem:[%s1018_s4 + $0x20] sm:$0xff] %v888_v15  ;;  %406 = vst [vmem:[%s1018_s4 + $0x30] sm:$0xff] %v890_v16  ;;  %v900_v21 = vpop.f32.mrb[9].mxu0  ;;  %v902_v22 = vpop.f32.mrb[9].mxu1 }
  0xe9   :  { %v454_v19 = vadd.f32 %v453_v9, %v452_v63  ;;  %v616_v20 = vrot.slane %v615_v10, 4  ;;  %v445_v23 = vadd.f32 %v444_v11, %v443_v3  ;;  %v607_v24 = vrot.slane %v606_v12, 4  ;;  %405 = vst [vmem:[%s1018_s4 + $0x28] sm:$0xff] %v900_v21  ;;  %407 = vst [vmem:[%s1018_s4 + $0x38] sm:$0xff] %v902_v22 }
  0xea   :  { %v463_v25 = vadd.f32 %v462_v13, %v461_v5  ;;  %v625_v26 = vrot.slane %v624_v14, 4  ;;  %v437_v27 = vrot.slane %v436_v17, 2  ;;  %v599_v28 = vadd.f32 %v598_v18, %v597_v8 }
  0xeb   :  { %v455_v29 = vrot.slane %v454_v19, 2  ;;  %v617_v30 = vadd.f32 %v616_v20, %v615_v10  ;;  %v446_v31 = vrot.slane %v445_v23, 2  ;;  %v608_v32 = vadd.f32 %v607_v24, %v606_v12  ;;  %v294_v35 = vpop.f32.mrb[10].mxu0  ;;  %v912_v36 = vpop.f32.mrb[10].mxu1 }
  0xec   :  { %v464_v33 = vrot.slane %v463_v25, 2  ;;  %v626_v34 = vadd.f32 %v625_v26, %v624_v14  ;;  %v438_v37 = vadd.f32 %v437_v27, %v436_v17  ;;  %v600_v38 = vrot.slane %v599_v28, 2  ;;  %412 = vst [vmem:[%s1018_s4 + $0x60] sm:$0xff] %v294_v35  ;;  %414 = vst [vmem:[%s1018_s4 + $0x70] sm:$0xff] %v912_v36  ;;  %v921_v41 = vpop.f32.mrb[11].mxu0  ;;  %v923_v42 = vpop.f32.mrb[11].mxu1 }
  0xed   :  { %v456_v39 = vadd.f32 %v455_v29, %v454_v19  ;;  %v618_v40 = vrot.slane %v617_v30, 2  ;;  %v447_v43 = vadd.f32 %v446_v31, %v445_v23  ;;  %v609_v44 = vrot.slane %v608_v32, 2  ;;  %413 = vst [vmem:[%s1018_s4 + $0x68] sm:$0xff] %v921_v41  ;;  %415 = vst [vmem:[%s1018_s4 + $0x78] sm:$0xff] %v923_v42 }
  0xee   :  { %v465_v45 = vadd.f32 %v464_v33, %v463_v25  ;;  %v627_v46 = vrot.slane %v626_v34, 2  ;;  %v439_v47 = vrot.slane %v438_v37, 1  ;;  %v601_v48 = vadd.f32 %v600_v38, %v599_v28 }
  0xef   :  { %v457_v49 = vrot.slane %v456_v39, 1  ;;  %v619_v50 = vadd.f32 %v618_v40, %v617_v30  ;;  %v448_v51 = vrot.slane %v447_v43, 1  ;;  %v610_v52 = vadd.f32 %v609_v44, %v608_v32  ;;  %v300_v55 = vpop.f32.mrb[12].mxu0  ;;  %v389_v56 = vpop.f32.mrb[12].mxu1 }
  0xf0   :  { %v466_v53 = vrot.slane %v465_v45, 1  ;;  %v628_v54 = vadd.f32 %v627_v46, %v626_v34  ;;  %v440_v57 = vadd.f32 %v439_v47, %v438_v37  ;;  %v602_v58 = vrot.slane %v601_v48, 1  ;;  %420 = vst [vmem:[%s1018_s4 + $0xa0] sm:$0xff] %v300_v55  ;;  %422 = vst [vmem:[%s1018_s4 + $0xb0] sm:$0xff] %v389_v56  ;;  %v302_v62 = vpop.f32.mrb[13].mxu0  ;;  %v391_v63 = vpop.f32.mrb[13].mxu1 }
  0xf1   :  { %v458_v59 = vadd.f32 %v457_v49, %v456_v39  ;;  %v620_v61 = vrot.slane %v619_v50, 1  ;;  %v449_v0 = vadd.f32 %v448_v51, %v447_v43  ;;  %v611_v1 = vrot.slane %v610_v52, 1  ;;  %421 = vst [vmem:[%s1018_s4 + $0xa8] sm:$0xff] %v302_v62  ;;  %423 = vst [vmem:[%s1018_s4 + $0xb8] sm:$0xff] %v391_v63 }
  0xf2   :  { %v467_v2 = vadd.f32 %v466_v53, %v465_v45  ;;  %v629_v3 = vrot.slane %v628_v54, 1  ;;  %v603_v4 = vadd.f32 %v602_v58, %v601_v48  ;;  %v567_v6 = vmul.f32 %v888_v15, %v888_v15 }
  0xf3   :  { %v621_v5 = vadd.f32 %v620_v61, %v619_v50  ;;  %v569_v7 = vmul.f32 %v890_v16, %v890_v16  ;;  %v512_v8 = vcombine.low %v440_v57, %v449_v0  ;;  %v612_v9 = vadd.f32 %v611_v1, %v610_v52  ;;  %v306_v12 = vpop.f32.mrb[14].mxu0  ;;  %v395_v13 = vpop.f32.mrb[14].mxu1 }
  0xf4   :  { %v513_v10 = vcombine.low %v458_v59, %v467_v2  ;;  %v630_v11 = vadd.f32 %v629_v3, %v628_v54  ;;  %v568_v14 = vmul.f32 %v900_v21, %v900_v21  ;;  %v570_v17 = vmul.f32 %v902_v22, %v902_v22  ;;  %428 = vst [vmem:[%s1018_s4 + $0xe0] sm:$0xff] %v306_v12  ;;  %v308_v20 = vpop.f32.mrb[15].mxu0  ;;  %v397_v23 = vpop.f32.mrb[15].mxu1 }
  0xf5   :  { %v468_v18 = vadd.f32 %v294_v35, %v888_v15  ;;  %v575_v19 = vmul.f32 %v294_v35, %v294_v35  ;;  %430 = vst [vmem:[%s1018_s4 + $0xf0] sm:$0xff] %v395_v13  ;;  %v961_v24 = vrot.slane %v512_v8, %v874_v60  ;;  %v675_v25 = vcombine.low %v603_v4, %v612_v9 }
  0xf6   :  { %v964_v26 = vrot.slane %v513_v10, %v874_v60  ;;  %v676_v27 = vcombine.low %v621_v5, %v630_v11  ;;  %429 = vst [vmem:[%s1018_s4 + $0xe8] sm:$0xff] %v308_v20  ;;  %431 = vst [vmem:[%s1018_s4 + $0xf8] sm:$0xff] %v397_v23  ;;  %v486_v28 = vadd.f32 %v912_v36, %v890_v16 }
  0xf7   :  { %v631_v15 = vadd.f32 %v575_v19, %v567_v6  ;;  %v577_v29 = vmul.f32 %v912_v36, %v912_v36  ;;  %v477_v30 = vadd.f32 %v921_v41, %v900_v21  ;;  %v979_v31 = vrot.slane %v675_v25, %v874_v60 }
  0xf8   :  { %v544_v32 = vcombine.low %v961_v24, %v964_v26  ;;  %v984_v33 = vrot.slane %v676_v27, %v874_v60  ;;  %v576_v34 = vmul.f32 %v921_v41, %v921_v41  ;;  %v495_v16 = vadd.f32 %v923_v42, %v902_v22 }
  0xf9   :  { %v649_v35 = vadd.f32 %v577_v29, %v569_v7  ;;  %v578_v36 = vmul.f32 %v923_v42, %v923_v42  ;;  %v469_v21 = vadd.f32 %v468_v18, %v300_v55  ;;  %v583_v39 = vmul.f32 %v300_v55, %v300_v55 }
  0xfa   :  { %v707_v37 = vcombine.low %v979_v31, %v984_v33  ;;  %v640_v38 = vadd.f32 %v576_v34, %v568_v14  ;;  %v487_v43 = vadd.f32 %v486_v28, %v389_v56  ;;  %v585_v44 = vmul.f32 %v389_v56, %v389_v56 }
  0xfb   :  { %v658_v40 = vadd.f32 %v578_v36, %v570_v17  ;;  %v478_v45 = vadd.f32 %v477_v30, %v302_v62  ;;  %v632_v46 = vadd.f32 %v631_v15, %v583_v39  ;;  %v584_v47 = vmul.f32 %v302_v62, %v302_v62 }
  0xfc   :  { %v496_v41 = vadd.f32 %v495_v16, %v391_v63  ;;  %v650_v48 = vadd.f32 %v649_v35, %v585_v44  ;;  %v586_v49 = vmul.f32 %v391_v63, %v391_v63  ;;  %v470_v50 = vadd.f32 %v469_v21, %v306_v12 }
  0xfd   :  { %v591_v22 = vmul.f32 %v306_v12, %v306_v12  ;;  %v641_v51 = vadd.f32 %v640_v38, %v584_v47  ;;  %v488_v52 = vadd.f32 %v487_v43, %v395_v13  ;;  %v593_v42 = vmul.f32 %v395_v13, %v395_v13 }
  0xfe   :  { %v479_v53 = vadd.f32 %v478_v45, %v308_v20  ;;  %v659_v54 = vadd.f32 %v658_v40, %v586_v49  ;;  %v471_v57 = vrot.slane %v470_v50, 4  ;;  %v592_v59 = vmul.f32 %v308_v20, %v308_v20 }
  0xff   :  { %v633_v58 = vadd.f32 %v632_v46, %v591_v22  ;;  %v489_v55 = vrot.slane %v488_v52, 4  ;;  %v651_v61 = vadd.f32 %v650_v48, %v593_v42  ;;  %v497_v56 = vadd.f32 %v496_v41, %v397_v23 }
 0x100   :  { %v480_v0 = vrot.slane %v479_v53, 4  ;;  %v472_v1 = vadd.f32 %v471_v57, %v470_v50  ;;  %v642_v62 = vadd.f32 %v641_v51, %v592_v59  ;;  %v594_v3 = vmul.f32 %v397_v23, %v397_v23 }
 0x101   :  { %v634_v2 = vrot.slane %v633_v58, 4  ;;  %v490_v4 = vadd.f32 %v489_v55, %v488_v52  ;;  %v652_v63 = vrot.slane %v651_v61, 4  ;;  %v498_v6 = vrot.slane %v497_v56, 4 }
 0x102   :  { %v481_v5 = vadd.f32 %v480_v0, %v479_v53  ;;  %v473_v7 = vrot.slane %v472_v1, 2  ;;  %v643_v9 = vrot.slane %v642_v62, 4  ;;  %v660_v10 = vadd.f32 %v659_v54, %v594_v3 }
 0x103   :  { %v635_v8 = vadd.f32 %v634_v2, %v633_v58  ;;  %v491_v11 = vrot.slane %v490_v4, 2  ;;  %v653_v12 = vadd.f32 %v652_v63, %v651_v61  ;;  %v499_v14 = vadd.f32 %v498_v6, %v497_v56 }
 0x104   :  { %v482_v13 = vrot.slane %v481_v5, 2  ;;  %v474_v17 = vadd.f32 %v473_v7, %v472_v1  ;;  %v644_v19 = vadd.f32 %v643_v9, %v642_v62  ;;  %v661_v20 = vrot.slane %v660_v10, 4 }
 0x105   :  { %v636_v18 = vrot.slane %v635_v8, 2  ;;  %v492_v25 = vadd.f32 %v491_v11, %v490_v4  ;;  %v654_v27 = vrot.slane %v653_v12, 2  ;;  %v500_v23 = vrot.slane %v499_v14, 2 }
 0x106   :  { %v483_v15 = vadd.f32 %v482_v13, %v481_v5  ;;  %v475_v28 = vrot.slane %v474_v17, 1  ;;  %v645_v30 = vrot.slane %v644_v19, 2  ;;  %v662_v34 = vadd.f32 %v661_v20, %v660_v10 }
 0x107   :  { %v637_v29 = vadd.f32 %v636_v18, %v635_v8  ;;  %v493_v35 = vrot.slane %v492_v25, 1  ;;  %v655_v16 = vadd.f32 %v654_v27, %v653_v12  ;;  %v501_v21 = vadd.f32 %v500_v23, %v499_v14 }
 0x108   :  { %v484_v36 = vrot.slane %v483_v15, 1  ;;  %v476_v38 = vadd.f32 %v475_v28, %v474_v17  ;;  %v646_v40 = vadd.f32 %v645_v30, %v644_v19  ;;  %v663_v43 = vrot.slane %v662_v34, 2 }
 0x109   :  { %v638_v39 = vrot.slane %v637_v29, 1  ;;  %v494_v44 = vadd.f32 %v493_v35, %v492_v25  ;;  %v656_v45 = vrot.slane %v655_v16, 1  ;;  %v502_v47 = vrot.slane %v501_v21, 1 }
 0x10a   :  { %v485_v46 = vadd.f32 %v484_v36, %v483_v15  ;;  %v647_v48 = vrot.slane %v646_v40, 1  ;;  %v664_v49 = vadd.f32 %v663_v43, %v662_v34  ;;  %v552_v1 = vrot.slane %v544_v32, %v874_v60 }
 0x10b   :  { %v639_v41 = vadd.f32 %v638_v39, %v637_v29  ;;  %v503_v22 = vadd.f32 %v502_v47, %v501_v21  ;;  %v657_v51 = vadd.f32 %v656_v45, %v655_v16  ;;  %v715_v4 = vrot.slane %v707_v37, %v874_v60 }
 0x10c   :  { %v514_v50 = vcombine.low %v476_v38, %v485_v46  ;;  %v648_v52 = vadd.f32 %v647_v48, %v646_v40  ;;  %v665_v42 = vrot.slane %v664_v49, 1 }
 0x10d   :  { %v515_v54 = vcombine.low %v494_v44, %v503_v22 }
 0x10e   :  { %v536_v53 = vrot.slane %v514_v50, %v874_v60  ;;  %v677_v57 = vcombine.low %v639_v41, %v648_v52  ;;  %v666_v58 = vadd.f32 %v665_v42, %v664_v49 }
 0x10f   :  { %v543_v59 = vrot.slane %v515_v54, %v874_v60 }
 0x110   :  { %v699_v55 = vrot.slane %v677_v57, %v874_v60  ;;  %v678_v61 = vcombine.low %v657_v51, %v666_v58 }
 0x111   :  { %v545_v0 = vcombine.low %v536_v53, %v543_v59 }
 0x112   :  { %v706_v56 = vrot.slane %v678_v61, %v874_v60 }
 0x113   :  { %v559_v2 = vrot.slane %v545_v0, %v874_v60 }
 0x114   :  { %v708_v62 = vcombine.low %v699_v55, %v706_v56 }
 0x115   :  { %v560_v3 = vcombine.low %v552_v1, %v559_v2 }
 0x116   :  { %v722_v63 = vrot.slane %v708_v62, %v874_v60 }
 0x117   :  { %562 = vst [vmem:[%s1019_s5] ss:$2 sm:$0xff] %v560_v3 }
 0x118   :  { %v723_v5 = vcombine.low %v715_v4, %v722_v63 }
 0x11a   :  { %751 = vst [vmem:[%s1019_s5 + $0x1] ss:$2 sm:$0xff] %v723_v5 }

// kernel: metal_network_forward.6
= control target key start
LH: loop header
LB: loop body
LE: loop exit
PB: predicated region body
PF: predicated region fallthrough
CT: control target
= control target key end

     0   :  { %v40_v47 = vlaneseq  ;;  %s1589_s3 = inlined_call_operand.vmem [shape: f32[512,128], index: 3, kind: input, shape index: {}]   ;;  %s1590_s0 = inlined_call_operand.vmem [shape: f32[32,512], index: 0, kind: input, shape index: {}]   ;;  %s1591_s1 = inlined_call_operand.vmem [shape: f32[1,512], index: 1, kind: input, shape index: {}]   ;;  %s1592_s2 = inlined_call_operand.vmem [shape: f32[1,512], index: 2, kind: input, shape index: {}]   ;;  %s1593_s4 = inlined_call_operand.vmem [shape: f32[512,128], index: 4, kind: input, shape index: {}]   ;;  %s1594_s5 = inlined_call_operand.vmem [shape: f32[32,128], index: 5, kind: output, shape index: {0}]   ;;  %s1595_s6 = inlined_call_operand.vmem [shape: f32[32,128], index: 6, kind: output, shape index: {1}]  }
   0x1   :  { %v146_v0 = vld [vmem:[%s1589_s3 + $0x80] sm:$0xff]  ;;  %v147_v1 = vld [vmem:[%s1589_s3 + $0x88] sm:$0xff]  ;;  %v148_v11 = vld [vmem:[%s1589_s3 + $0x90] sm:$0xff] }
   0x2   :  { %v178_v2 = vld [vmem:[%s1589_s3 + $0x180] sm:$0xff]  ;;  %v790_v3 = vpack.c.bf16 %v147_v1, %v146_v0  ;;  %v179_v4 = vld [vmem:[%s1589_s3 + $0x188] sm:$0xff]  ;;  %v149_v13 = vld [vmem:[%s1589_s3 + $0x98] sm:$0xff]  ;;  %v41_v61 = vshrl.u32 %v40_v47, 7 }
   0x3   :  { %v130_v5 = vld [vmem:[%s1589_s3] sm:$0xff]  ;;  %v131_v6 = vld [vmem:[%s1589_s3 + $0x8] sm:$0xff]  ;;  %v822_v7 = vpack.c.bf16 %v179_v4, %v178_v2  ;;  %v180_v14 = vld [vmem:[%s1589_s3 + $0x190] sm:$0xff]  ;;  %v794_v16 = vpack.c.bf16 %v149_v13, %v148_v11 }
   0x4   :  { %v792_v8 = vpack.c.bf16 %v131_v6, %v130_v5  ;;  %v162_v9 = vld [vmem:[%s1589_s3 + $0x100] sm:$0xff]  ;;  %v163_v10 = vld [vmem:[%s1589_s3 + $0x108] sm:$0xff]  ;;  %791 = vmatprep.subr.bf16.mxu0 %v790_v3  ;;  %v181_v15 = vld [vmem:[%s1589_s3 + $0x198] sm:$0xff]  ;;  %v54_v13 = vsub.s32 3, %v41_v61 }
   0x5   :  { %v824_v12 = vpack.c.bf16 %v163_v10, %v162_v9  ;;  %823 = vmatprep.subr.bf16.mxu1 %v822_v7  ;;  %v826_v17 = vpack.c.bf16 %v181_v15, %v180_v14  ;;  %v132_v18 = vld [vmem:[%s1589_s3 + $0x10] sm:$0xff]  ;;  %v133_v19 = vld [vmem:[%s1589_s3 + $0x18] sm:$0xff]  ;;  %v150_v23 = vld [vmem:[%s1589_s3 + $0xa0] sm:$0xff]  ;;  %v42_v14 = vsub.s32 0, %v41_v61 }
   0x6   :  { %793 = vmatpush3.bf16.msra.mxu0 %v792_v8  ;;  %v164_v20 = vld [vmem:[%s1589_s3 + $0x110] sm:$0xff]  ;;  %v796_v21 = vpack.c.bf16 %v133_v19, %v132_v18  ;;  %v165_v22 = vld [vmem:[%s1589_s3 + $0x118] sm:$0xff]  ;;  %v151_v24 = vld [vmem:[%s1589_s3 + $0xa8] sm:$0xff] }
   0x7   :  { %825 = vmatpush3.bf16.msra.mxu1 %v824_v12  ;;  %795 = vmatprep.subr.bf16.mxu0 %v794_v16  ;;  %v828_v25 = vpack.c.bf16 %v165_v22, %v164_v20  ;;  %v798_v26 = vpack.c.bf16 %v151_v24, %v150_v23  ;;  %v182_v27 = vld [vmem:[%s1589_s3 + $0x1a0] sm:$0xff]  ;;  %v183_v28 = vld [vmem:[%s1589_s3 + $0x1a8] sm:$0xff]  ;;  %v152_v35 = vld [vmem:[%s1589_s3 + $0xb0] sm:$0xff]  ;;  %v46_v12 = vsub.s32 1, %v41_v61 }
   0x8   :  { %827 = vmatprep.subr.bf16.mxu1 %v826_v17  ;;  %v134_v29 = vld [vmem:[%s1589_s3 + $0x20] sm:$0xff]  ;;  %v830_v30 = vpack.c.bf16 %v183_v28, %v182_v27  ;;  %v135_v31 = vld [vmem:[%s1589_s3 + $0x28] sm:$0xff]  ;;  %v153_v36 = vld [vmem:[%s1589_s3 + $0xb8] sm:$0xff]  ;;  %v50_v17 = vsub.s32 2, %v41_v61 }
   0x9   :  { %v166_v32 = vld [vmem:[%s1589_s3 + $0x120] sm:$0xff]  ;;  %v167_v33 = vld [vmem:[%s1589_s3 + $0x128] sm:$0xff]  ;;  %v800_v34 = vpack.c.bf16 %v135_v31, %v134_v29  ;;  %v184_v37 = vld [vmem:[%s1589_s3 + $0x1b0] sm:$0xff]  ;;  %v802_v39 = vpack.c.bf16 %v153_v36, %v152_v35 }
   0xa   :  { %797 = vmatpush3.bf16.msra.mxu0 %v796_v21  ;;  %v832_v38 = vpack.c.bf16 %v167_v33, %v166_v32  ;;  %v185_v40 = vld [vmem:[%s1589_s3 + $0x1b8] sm:$0xff]  ;;  %v136_v41 = vld [vmem:[%s1589_s3 + $0x30] sm:$0xff]  ;;  %v154_v46 = vld [vmem:[%s1589_s3 + $0xc0] sm:$0xff] }
   0xb   :  { %829 = vmatpush3.bf16.msra.mxu1 %v828_v25  ;;  %799 = vmatprep.subr.bf16.mxu0 %v798_v26  ;;  %v137_v42 = vld [vmem:[%s1589_s3 + $0x38] sm:$0xff]  ;;  %v834_v43 = vpack.c.bf16 %v185_v40, %v184_v37  ;;  %v168_v44 = vld [vmem:[%s1589_s3 + $0x130] sm:$0xff]  ;;  %v155_v48 = vld [vmem:[%s1589_s3 + $0xc8] sm:$0xff] }
   0xc   :  { %831 = vmatprep.subr.bf16.mxu1 %v830_v30  ;;  %v169_v45 = vld [vmem:[%s1589_s3 + $0x138] sm:$0xff]  ;;  %v186_v49 = vld [vmem:[%s1589_s3 + $0x1c0] sm:$0xff]  ;;  %v187_v50 = vld [vmem:[%s1589_s3 + $0x1c8] sm:$0xff]  ;;  %v804_v51 = vpack.c.bf16 %v137_v42, %v136_v41  ;;  %v806_v53 = vpack.c.bf16 %v155_v48, %v154_v46 }
   0xd   :  { %v836_v52 = vpack.c.bf16 %v169_v45, %v168_v44  ;;  %v138_v54 = vld [vmem:[%s1589_s3 + $0x40] sm:$0xff]  ;;  %v139_v55 = vld [vmem:[%s1589_s3 + $0x48] sm:$0xff]  ;;  %v838_v57 = vpack.c.bf16 %v187_v50, %v186_v49  ;;  %v156_v59 = vld [vmem:[%s1589_s3 + $0xd0] sm:$0xff] }
   0xe   :  { %801 = vmatpush3.bf16.msra.mxu0 %v800_v34  ;;  %v170_v56 = vld [vmem:[%s1589_s3 + $0x140] sm:$0xff]  ;;  %v171_v58 = vld [vmem:[%s1589_s3 + $0x148] sm:$0xff]  ;;  %v157_v60 = vld [vmem:[%s1589_s3 + $0xd8] sm:$0xff]  ;;  %v808_v0 = vpack.c.bf16 %v139_v55, %v138_v54 }
   0xf   :  { %833 = vmatpush3.bf16.msra.mxu1 %v832_v38  ;;  %803 = vmatprep.subr.bf16.mxu0 %v802_v39  ;;  %v188_v62 = vld [vmem:[%s1589_s3 + $0x1d0] sm:$0xff]  ;;  %v189_v63 = vld [vmem:[%s1589_s3 + $0x1d8] sm:$0xff]  ;;  %v840_v3 = vpack.c.bf16 %v171_v58, %v170_v56  ;;  %v810_v4 = vpack.c.bf16 %v157_v60, %v156_v59  ;;  %v158_v7 = vld [vmem:[%s1589_s3 + $0xe0] sm:$0xff] }
  0x10   :  { %835 = vmatprep.subr.bf16.mxu1 %v834_v43  ;;  %v140_v1 = vld [vmem:[%s1589_s3 + $0x50] sm:$0xff]  ;;  %v141_v2 = vld [vmem:[%s1589_s3 + $0x58] sm:$0xff]  ;;  %v842_v8 = vpack.c.bf16 %v189_v63, %v188_v62  ;;  %v159_v9 = vld [vmem:[%s1589_s3 + $0xe8] sm:$0xff] }
  0x11   :  { %v172_v5 = vld [vmem:[%s1589_s3 + $0x150] sm:$0xff]  ;;  %v173_v6 = vld [vmem:[%s1589_s3 + $0x158] sm:$0xff]  ;;  %v190_v10 = vld [vmem:[%s1589_s3 + $0x1e0] sm:$0xff]  ;;  %v812_v18 = vpack.c.bf16 %v141_v2, %v140_v1  ;;  %v814_v23 = vpack.c.bf16 %v159_v9, %v158_v7 }
  0x12   :  { %805 = vmatpush3.bf16.msra.mxu0 %v804_v51  ;;  %v191_v11 = vld [vmem:[%s1589_s3 + $0x1e8] sm:$0xff]  ;;  %v142_v15 = vld [vmem:[%s1589_s3 + $0x60] sm:$0xff]  ;;  %v160_v21 = vld [vmem:[%s1589_s3 + $0xf0] sm:$0xff]  ;;  %v844_v22 = vpack.c.bf16 %v173_v6, %v172_v5 }
  0x13   :  { %837 = vmatpush3.bf16.msra.mxu1 %v836_v52  ;;  %807 = vmatprep.subr.bf16.mxu0 %v806_v53  ;;  %v143_v16 = vld [vmem:[%s1589_s3 + $0x68] sm:$0xff]  ;;  %v174_v19 = vld [vmem:[%s1589_s3 + $0x160] sm:$0xff]  ;;  %v846_v24 = vpack.c.bf16 %v191_v11, %v190_v10  ;;  %v161_v25 = vld [vmem:[%s1589_s3 + $0xf8] sm:$0xff] }
  0x14   :  { %839 = vmatprep.subr.bf16.mxu1 %v838_v57  ;;  %v175_v20 = vld [vmem:[%s1589_s3 + $0x168] sm:$0xff]  ;;  %v38_v27 = vld [vmem:[%s1591_s1] sm:$0xf]  ;;  %v816_v28 = vpack.c.bf16 %v143_v16, %v142_v15  ;;  %v25_v31 = vld [vmem:[%s1590_s0 + $0x18] sm:$0xff]  ;;  %v818_v47 = vpack.c.bf16 %v161_v25, %v160_v21 }
  0x15   :  { %v23_v26 = vld [vmem:[%s1590_s0 + $0x8] sm:$0xff]  ;;  %v1133_v29 = vrot.slane %v38_v27, %v46_v12  ;;  %v76_v30 = vld [vmem:[%s1592_s2] sm:$0xf]  ;;  %v1141_v32 = vrot.slane %v38_v27, %v54_v13  ;;  %v1146_v34 = vrot.slane %v38_v27, %v42_v14  ;;  %v192_v35 = vld [vmem:[%s1589_s3 + $0x1f0] sm:$0xff]  ;;  %v1163_v41 = vrot.slane %v38_v27, %v50_v17 }
  0x16   :  { %809 = vmatpush3.bf16.msra.mxu0 %v808_v0  ;;  %v22_v33 = vld [vmem:[%s1590_s0] sm:$0xff]  ;;  %v193_v36 = vld [vmem:[%s1589_s3 + $0x1f8] sm:$0xff]  ;;  %v1154_v37 = vrot.slane %v76_v30, %v46_v12  ;;  %v1156_v38 = vrot.slane %v76_v30, %v54_v13  ;;  %v1158_v39 = vrot.slane %v76_v30, %v42_v14  ;;  %v24_v40 = vld [vmem:[%s1590_s0 + $0x10] sm:$0xff]  ;;  %v1168_v45 = vrot.slane %v76_v30, %v50_v17 }
  0x17   :  { %841 = vmatpush3.bf16.msra.mxu1 %v840_v3  ;;  %811 = vmatprep.subr.bf16.mxu0 %v810_v4  ;;  %v61_v42 = vmul.f32 %v1133_v29, %v23_v26  ;;  %v63_v43 = vmul.f32 %v1141_v32, %v25_v31  ;;  %v60_v44 = vmul.f32 %v1146_v34, %v22_v33  ;;  %v144_v48 = vld [vmem:[%s1589_s3 + $0x70] sm:$0xff]  ;;  %v145_v49 = vld [vmem:[%s1589_s3 + $0x78] sm:$0xff]  ;;  %v384_v56 = vld [vmem:[%s1593_s4 + $0x80] sm:$0xff] }
  0x18   :  { %843 = vmatprep.subr.bf16.mxu1 %v842_v8  ;;  %v848_v46 = vpack.c.bf16 %v175_v20, %v174_v19  ;;  %v176_v50 = vld [vmem:[%s1589_s3 + $0x170] sm:$0xff]  ;;  %v62_v51 = vmul.f32 %v1163_v41, %v24_v40  ;;  %v850_v52 = vpack.c.bf16 %v193_v36, %v192_v35  ;;  %v177_v53 = vld [vmem:[%s1589_s3 + $0x178] sm:$0xff]  ;;  %v385_v57 = vld [vmem:[%s1593_s4 + $0x88] sm:$0xff]  ;;  %v820_v61 = vpack.c.bf16 %v145_v49, %v144_v48 }
  0x19   :  { %v1184_v54 = vadd.f32 %v1154_v37, %v61_v42  ;;  %v1187_v55 = vadd.f32 %v1156_v38, %v63_v43  ;;  %v1196_v58 = vadd.f32 %v1158_v39, %v60_v44  ;;  %v416_v59 = vld [vmem:[%s1593_s4 + $0x180] sm:$0xff]  ;;  %v417_v60 = vld [vmem:[%s1593_s4 + $0x188] sm:$0xff]  ;;  %v852_v1 = vpack.c.bf16 %v177_v53, %v176_v50  ;;  %v386_v8 = vld [vmem:[%s1593_s4 + $0x90] sm:$0xff] }
  0x1a   :  { %813 = vmatpush3.bf16.msra.mxu0 %v812_v18  ;;  %v1207_v0 = vadd.f32 %v1168_v45, %v62_v51  ;;  %v854_v2 = vpack.c.bf16 %v385_v57, %v384_v56  ;;  %v368_v3 = vld [vmem:[%s1593_s4] sm:$0xff]  ;;  %v369_v4 = vld [vmem:[%s1593_s4 + $0x8] sm:$0xff]  ;;  %v886_v6 = vpack.c.bf16 %v417_v60, %v416_v59  ;;  %v387_v9 = vld [vmem:[%s1593_s4 + $0x98] sm:$0xff] }
  0x1b   :  { %845 = vmatpush3.bf16.msra.mxu1 %v844_v22  ;;  %815 = vmatprep.subr.bf16.mxu0 %v814_v23  ;;  %v115_v62 = vmax.f32 %v1184_v54, 0.0  ;;  %v117_v63 = vmax.f32 %v1187_v55, 0.0  ;;  %v400_v5 = vld [vmem:[%s1593_s4 + $0x100] sm:$0xff]  ;;  %v401_v7 = vld [vmem:[%s1593_s4 + $0x108] sm:$0xff]  ;;  %v114_v10 = vmax.f32 %v1196_v58, 0.0  ;;  %v418_v11 = vld [vmem:[%s1593_s4 + $0x190] sm:$0xff]  ;;  %v856_v14 = vpack.c.bf16 %v369_v4, %v368_v3 }
  0x1c   :  { %847 = vmatprep.subr.bf16.mxu1 %v846_v24  ;;  %v419_v12 = vld [vmem:[%s1593_s4 + $0x198] sm:$0xff]  ;;  %v116_v13 = vmax.f32 %v1207_v0, 0.0  ;;  %v370_v15 = vld [vmem:[%s1593_s4 + $0x10] sm:$0xff]  ;;  %v888_v18 = vpack.c.bf16 %v401_v7, %v400_v5  ;;  %v858_v19 = vpack.c.bf16 %v387_v9, %v386_v8  ;;  %v388_v21 = vld [vmem:[%s1593_s4 + $0xa0] sm:$0xff] }
  0x1d   :  { %258 = vmatprep.mubr.f32.mxu0 %v115_v62  ;;  %343 = vmatprep.mubr.f32.mxu1 %v117_v63  ;;  %v371_v16 = vld [vmem:[%s1593_s4 + $0x18] sm:$0xff]  ;;  %v402_v17 = vld [vmem:[%s1593_s4 + $0x110] sm:$0xff]  ;;  %v389_v22 = vld [vmem:[%s1593_s4 + $0xa8] sm:$0xff]  ;;  %v890_v23 = vpack.c.bf16 %v419_v12, %v418_v11 }
  0x1e   :  { %817 = vmatpush3.bf16.msra.mxu0 %v816_v28  ;;  %v403_v20 = vld [vmem:[%s1593_s4 + $0x118] sm:$0xff]  ;;  %v420_v24 = vld [vmem:[%s1593_s4 + $0x1a0] sm:$0xff]  ;;  %v421_v25 = vld [vmem:[%s1593_s4 + $0x1a8] sm:$0xff]  ;;  %v860_v31 = vpack.c.bf16 %v371_v16, %v370_v15  ;;  %v862_v42 = vpack.c.bf16 %v389_v22, %v388_v21 }
  0x1f   :  { %849 = vmatpush3.bf16.msra.mxu1 %v848_v46  ;;  %819 = vmatprep.subr.bf16.mxu0 %v818_v47  ;;  %v372_v26 = vld [vmem:[%s1593_s4 + $0x20] sm:$0xff]  ;;  %v373_v27 = vld [vmem:[%s1593_s4 + $0x28] sm:$0xff]  ;;  %v1286_v33 = vld [vmem:[%s1593_s4 + $0xb0] sm:$0xff]  ;;  %v892_v40 = vpack.c.bf16 %v403_v20, %v402_v17  ;;  %v894_v48 = vpack.c.bf16 %v421_v25, %v420_v24 }
  0x20   :  { %851 = vmatprep.subr.bf16.mxu1 %v850_v52  ;;  %v1274_v28 = vld [vmem:[%s1593_s4 + $0x120] sm:$0xff]  ;;  %v1279_v30 = vld [vmem:[%s1593_s4 + $0x128] sm:$0xff]  ;;  %v391_v35 = vld [vmem:[%s1593_s4 + $0xb8] sm:$0xff]  ;;  %v864_v57 = vpack.c.bf16 %v373_v27, %v372_v26 }
  0x21   :  { %v27_v36 = vld [vmem:[%s1590_s0 + $0x28] sm:$0xff]  ;;  %v29_v44 = vld [vmem:[%s1590_s0 + $0x38] sm:$0xff]  ;;  %v26_v46 = vld [vmem:[%s1590_s0 + $0x20] sm:$0xff]  ;;  %v866_v9 = vpack.c.bf16 %v391_v35, %v1286_v33 }
  0x22   :  { %821 = vmatpush3.bf16.msra.mxu0 %v820_v61  ;;  %v65_v43 = vmul.f32 %v1133_v29, %v27_v36  ;;  %v28_v47 = vld [vmem:[%s1590_s0 + $0x30] sm:$0xff]  ;;  %v423_v50 = vld [vmem:[%s1593_s4 + $0x1b8] sm:$0xff]  ;;  %v67_v52 = vmul.f32 %v1141_v32, %v29_v44  ;;  %v64_v53 = vmul.f32 %v1146_v34, %v26_v46  ;;  %v1341_v3 = vld [vmem:[%s1593_s4 + $0xc0] sm:$0xff] }
  0x23   :  { %853 = vmatpush3.bf16.msra.mxu1 %v852_v1  ;;  %855 = vmatprep.subr.bf16.mxu0 %v854_v2  ;;  %v422_v49 = vld [vmem:[%s1593_s4 + $0x1b0] sm:$0xff]  ;;  %v66_v56 = vmul.f32 %v1163_v41, %v28_v47  ;;  %v1321_v59 = vld [vmem:[%s1593_s4 + $0x38] sm:$0xff]  ;;  %v896_v2 = vpack.c.bf16 %v1279_v30, %v1274_v28  ;;  %v1346_v4 = vld [vmem:[%s1593_s4 + $0xc8] sm:$0xff] }
  0x24   :  { %887 = vmatprep.subr.bf16.mxu1 %v886_v6  ;;  %v1313_v51 = vld [vmem:[%s1593_s4 + $0x30] sm:$0xff]  ;;  %v1331_v61 = vld [vmem:[%s1593_s4 + $0x138] sm:$0xff]  ;;  %v1334_v1 = vadd.f32 %v1154_v37, %v65_v43  ;;  %v1349_v5 = vadd.f32 %v1156_v38, %v67_v52  ;;  %v1352_v6 = vadd.f32 %v1158_v39, %v64_v53  ;;  %v31_v8 = vld [vmem:[%s1590_s0 + $0x48] sm:$0xff]  ;;  %v898_v11 = vpack.c.bf16 %v423_v50, %v422_v49 }
  0x25   :  { %259 = vmatmul.mubr.f32.vlgmr.msra.gmra.mrb[0].mxu0 %v114_v10  ;;  %v1326_v60 = vld [vmem:[%s1593_s4 + $0x130] sm:$0xff]  ;;  %v1355_v7 = vadd.f32 %v1168_v45, %v66_v56  ;;  %v33_v15 = vld [vmem:[%s1590_s0 + $0x58] sm:$0xff]  ;;  %v30_v16 = vld [vmem:[%s1590_s0 + $0x40] sm:$0xff] }
  0x26   :  { %344 = vmatmul.mubr.f32.vlgmr.msra.gmra.mrb[0].mxu1 %v116_v13  ;;  %857 = vmatpush3.bf16.msra.mxu0 %v856_v14  ;;  %v119_v12 = vmax.f32 %v1334_v1, 0.0  ;;  %v69_v14 = vmul.f32 %v1133_v29, %v31_v8  ;;  %v32_v17 = vld [vmem:[%s1590_s0 + $0x50] sm:$0xff]  ;;  %v425_v20 = vld [vmem:[%s1593_s4 + $0x1c8] sm:$0xff]  ;;  %v121_v21 = vmax.f32 %v1349_v5, 0.0  ;;  %v118_v22 = vmax.f32 %v1352_v6, 0.0  ;;  %v1386_v24 = vld [vmem:[%s1593_s4 + $0x40] sm:$0xff] }
  0x27   :  { %889 = vmatpush3.bf16.msra.mxu1 %v888_v18  ;;  %859 = vmatprep.subr.bf16.mxu0 %v858_v19  ;;  %v868_v18 = vpack.c.bf16 %v1321_v59, %v1313_v51  ;;  %v424_v19 = vld [vmem:[%s1593_s4 + $0x1c0] sm:$0xff]  ;;  %v120_v25 = vmax.f32 %v1355_v7, 0.0  ;;  %v68_v27 = vmul.f32 %v1146_v34, %v30_v16  ;;  %v70_v28 = vmul.f32 %v1163_v41, %v32_v17  ;;  %v377_v33 = vld [vmem:[%s1593_s4 + $0x48] sm:$0xff]  ;;  %v37_v47 = vld [vmem:[%s1590_s0 + $0x78] sm:$0xff] }
  0x28   :  { %891 = vmatprep.subr.bf16.mxu1 %v890_v23  ;;  %v71_v23 = vmul.f32 %v1141_v32, %v33_v15  ;;  %263 = vmatprep.mubr.f32.mxu0 %v119_v12  ;;  %v1392_v26 = vadd.f32 %v1154_v37, %v69_v14  ;;  %v900_v30 = vpack.c.bf16 %v1331_v61, %v1326_v60  ;;  %v408_v35 = vld [vmem:[%s1593_s4 + $0x140] sm:$0xff]  ;;  %v36_v49 = vld [vmem:[%s1590_s0 + $0x70] sm:$0xff]  ;;  %v409_v50 = vld [vmem:[%s1593_s4 + $0x148] sm:$0xff] }
  0x29   :  { %348 = vmatprep.mubr.f32.mxu1 %v121_v21  ;;  %v1416_v44 = vadd.f32 %v1158_v39, %v68_v27  ;;  %v1419_v46 = vadd.f32 %v1168_v45, %v70_v28  ;;  %264 = vmatmul.mubr.f32.gmra.mrb[2].mxu0 %v118_v22  ;;  %v394_v51 = vld [vmem:[%s1593_s4 + $0xd0] sm:$0xff]  ;;  %v395_v52 = vld [vmem:[%s1593_s4 + $0xd8] sm:$0xff]  ;;  %v872_v60 = vpack.c.bf16 %v377_v33, %v1386_v24  ;;  %v396_v16 = vld [vmem:[%s1593_s4 + $0xe0] sm:$0xff] }
  0x2a   :  { %861 = vmatpush3.bf16.msra.mxu0 %v860_v31  ;;  %v870_v31 = vpack.c.bf16 %v1346_v4, %v1341_v3  ;;  %v1409_v36 = vadd.f32 %v1156_v38, %v71_v23  ;;  %v123_v43 = vmax.f32 %v1392_v26, 0.0  ;;  %349 = vmatmul.mubr.f32.gmra.mrb[2].mxu1 %v120_v25  ;;  %v426_v61 = vld [vmem:[%s1593_s4 + $0x1d0] sm:$0xff]  ;;  %v379_v14 = vld [vmem:[%s1593_s4 + $0x58] sm:$0xff]  ;;  %v397_v17 = vld [vmem:[%s1593_s4 + $0xe8] sm:$0xff] }
  0x2b   :  { %893 = vmatpush3.bf16.msra.mxu1 %v892_v40  ;;  %863 = vmatprep.subr.bf16.mxu0 %v862_v42  ;;  %v35_v40 = vld [vmem:[%s1590_s0 + $0x68] sm:$0xff]  ;;  %v902_v42 = vpack.c.bf16 %v425_v20, %v424_v19  ;;  %v411_v15 = vld [vmem:[%s1593_s4 + $0x158] sm:$0xff]  ;;  %v428_v19 = vld [vmem:[%s1593_s4 + $0x1e0] sm:$0xff] }
  0x2c   :  { %895 = vmatprep.subr.bf16.mxu1 %v894_v48  ;;  %v34_v48 = vld [vmem:[%s1590_s0 + $0x60] sm:$0xff]  ;;  %v125_v53 = vmax.f32 %v1409_v36, 0.0  ;;  %v73_v56 = vmul.f32 %v1133_v29, %v35_v40  ;;  %268 = vmatprep.mubr.f32.mxu0 %v123_v43  ;;  %v122_v29 = vmax.f32 %v1416_v44, 0.0  ;;  %v429_v20 = vld [vmem:[%s1593_s4 + $0x1e8] sm:$0xff]  ;;  %v415_v54 = vld [vmem:[%s1593_s4 + $0x178] sm:$0xff] }
  0x2d   :  { %v72_v59 = vmul.f32 %v1146_v34, %v34_v48  ;;  %v74_v34 = vmul.f32 %v1163_v41, %v36_v49  ;;  %v378_v41 = vld [vmem:[%s1593_s4 + $0x50] sm:$0xff]  ;;  %v381_v33 = vld [vmem:[%s1593_s4 + $0x68] sm:$0xff]  ;;  %v910_v40 = vpack.c.bf16 %v429_v20, %v428_v19  ;;  %v399_v48 = vld [vmem:[%s1593_s4 + $0xf8] sm:$0xff] }
  0x2e   :  { %865 = vmatpush3.bf16.msra.mxu0 %v864_v57  ;;  %v75_v57 = vmul.f32 %v1141_v32, %v37_v47  ;;  %v124_v32 = vmax.f32 %v1419_v46, 0.0  ;;  %353 = vmatprep.mubr.f32.mxu1 %v125_v53  ;;  %v1462_v3 = vadd.f32 %v1154_v37, %v73_v56  ;;  %v410_v37 = vld [vmem:[%s1593_s4 + $0x150] sm:$0xff]  ;;  %v876_v27 = vpack.c.bf16 %v379_v14, %v378_v41 }
  0x2f   :  { %897 = vmatpush3.bf16.msra.mxu1 %v896_v2  ;;  %867 = vmatprep.subr.bf16.mxu0 %v866_v9  ;;  %v427_v2 = vld [vmem:[%s1593_s4 + $0x1d8] sm:$0xff]  ;;  %v1468_v8 = vadd.f32 %v1158_v39, %v72_v59  ;;  %v904_v9 = vpack.c.bf16 %v409_v50, %v408_v35  ;;  %v908_v28 = vpack.c.bf16 %v411_v15, %v410_v37  ;;  %v412_v35 = vld [vmem:[%s1593_s4 + $0x160] sm:$0xff]  ;;  %v398_v47 = vld [vmem:[%s1593_s4 + $0xf0] sm:$0xff] }
  0x30   :  { %899 = vmatprep.subr.bf16.mxu1 %v898_v11  ;;  %v1465_v4 = vadd.f32 %v1156_v38, %v75_v57  ;;  %v874_v11 = vpack.c.bf16 %v395_v52, %v394_v51  ;;  %v1480_v38 = vadd.f32 %v1168_v45, %v74_v34  ;;  %v906_v39 = vpack.c.bf16 %v427_v2, %v426_v61  ;;  %v430_v49 = vld [vmem:[%s1593_s4 + $0x1f0] sm:$0xff]  ;;  %v431_v50 = vld [vmem:[%s1593_s4 + $0x1f8] sm:$0xff] }
  0x31   :  { %269 = vmatmul.mubr.f32.gmra.mrb[4].mxu0 %v122_v29  ;;  %v127_v45 = vmax.f32 %v1462_v3, 0.0  ;;  %354 = vmatmul.mubr.f32.gmra.mrb[4].mxu1 %v124_v32  ;;  %v126_v23 = vmax.f32 %v1468_v8, 0.0  ;;  %v882_v56 = vpack.c.bf16 %v399_v48, %v398_v47  ;;  %v382_v57 = vld [vmem:[%s1593_s4 + $0x70] sm:$0xff]  ;;  %v383_v59 = vld [vmem:[%s1593_s4 + $0x78] sm:$0xff] }
  0x32   :  { %869 = vmatpush3.bf16.msra.mxu0 %v868_v18  ;;  %v129_v18 = vmax.f32 %v1465_v4, 0.0  ;;  %v128_v24 = vmax.f32 %v1480_v38, 0.0  ;;  %v414_v61 = vld [vmem:[%s1593_s4 + $0x170] sm:$0xff] }
  0x33   :  { %901 = vmatpush3.bf16.msra.mxu1 %v900_v30  ;;  %871 = vmatprep.subr.bf16.mxu0 %v870_v31  ;;  %v878_v30 = vpack.c.bf16 %v397_v17, %v396_v16  ;;  %v380_v31 = vld [vmem:[%s1593_s4 + $0x60] sm:$0xff]  ;;  %v916_v2 = vpack.c.bf16 %v415_v54, %v414_v61 }
  0x34   :  { %903 = vmatprep.subr.bf16.mxu1 %v902_v42  ;;  %273 = vmatprep.mubr.f32.mxu0 %v127_v45  ;;  %v413_v42 = vld [vmem:[%s1593_s4 + $0x168] sm:$0xff]  ;;  %v880_v51 = vpack.c.bf16 %v381_v33, %v380_v31 }
  0x35   :  { %358 = vmatprep.mubr.f32.mxu1 %v129_v18  ;;  %274 = vmatmul.mubr.f32.gmra.mrb[6].mxu0 %v126_v23  ;;  %v912_v52 = vpack.c.bf16 %v413_v42, %v412_v35 }
  0x36   :  { %873 = vmatpush3.bf16.msra.mxu0 %v872_v60  ;;  %359 = vmatmul.mubr.f32.gmra.mrb[6].mxu1 %v128_v24  ;;  %v914_v60 = vpack.c.bf16 %v431_v50, %v430_v49 }
  0x37   :  { %905 = vmatpush3.bf16.msra.mxu1 %v904_v9  ;;  %875 = vmatprep.subr.bf16.mxu0 %v874_v11 }
  0x38   :  { %907 = vmatprep.subr.bf16.mxu1 %v906_v39  ;;  %496 = vmatprep.mubr.f32.mxu0 %v115_v62  ;;  %v884_v62 = vpack.c.bf16 %v383_v59, %v382_v57 }
  0x39   :  { %581 = vmatprep.mubr.f32.mxu1 %v117_v63 }
  0x3a   :  { %877 = vmatpush3.bf16.msra.mxu0 %v876_v27 }
  0x3b   :  { %909 = vmatpush3.bf16.msra.mxu1 %v908_v28  ;;  %879 = vmatprep.subr.bf16.mxu0 %v878_v30 }
  0x3c   :  { %911 = vmatprep.subr.bf16.mxu1 %v910_v40 }
  0x3e   :  { %881 = vmatpush3.bf16.msra.mxu0 %v880_v51 }
  0x3f   :  { %913 = vmatpush3.bf16.msra.mxu1 %v912_v52  ;;  %883 = vmatprep.subr.bf16.mxu0 %v882_v56 }
  0x40   :  { %915 = vmatprep.subr.bf16.mxu1 %v914_v60 }
  0x42   :  { %885 = vmatpush3.bf16.msra.mxu0 %v884_v62 }
  0x43   :  { %917 = vmatpush3.bf16.msra.mxu1 %v916_v2 }
  0x45   :  { %497 = vmatmul.mubr.f32.vlgmr.msra.gmra.mrb[8].mxu0 %v114_v10 }
  0x46   :  { %582 = vmatmul.mubr.f32.vlgmr.msra.gmra.mrb[8].mxu1 %v116_v13  ;;  %501 = vmatprep.mubr.f32.mxu0 %v119_v12 }
  0x47   :  { %586 = vmatprep.mubr.f32.mxu1 %v121_v21 }
  0x49   :  { %502 = vmatmul.mubr.f32.gmra.mrb[10].mxu0 %v118_v22 }
  0x4a   :  { %587 = vmatmul.mubr.f32.gmra.mrb[10].mxu1 %v120_v25  ;;  %506 = vmatprep.mubr.f32.mxu0 %v123_v43 }
  0x4b   :  { %591 = vmatprep.mubr.f32.mxu1 %v125_v53 }
  0x4d   :  { %507 = vmatmul.mubr.f32.gmra.mrb[12].mxu0 %v122_v29 }
  0x4e   :  { %592 = vmatmul.mubr.f32.gmra.mrb[12].mxu1 %v124_v32  ;;  %511 = vmatprep.mubr.f32.mxu0 %v127_v45 }
  0x4f   :  { %596 = vmatprep.mubr.f32.mxu1 %v129_v18 }
  0x51   :  { %512 = vmatmul.mubr.f32.gmra.mrb[14].mxu0 %v126_v23 }
  0x52   :  { %597 = vmatmul.mubr.f32.gmra.mrb[14].mxu1 %v128_v24 }
  0xf8   :  { %v646_v55 = vpop.f32.mrb[0].mxu0 }
  0xf9   :  { %v690_v58 = vpop.f32.mrb[0].mxu1  ;;  %v647_v63 = vpop.f32.mrb[1].mxu0 }
  0xfa   :  { %v648_v0 = vadd.f32 %v647_v63, %v646_v55  ;;  %v691_v10 = vpop.f32.mrb[1].mxu1 }
  0xfb   :  { %v692_v13 = vadd.f32 %v691_v10, %v690_v58 }
  0xfc   :  { %v649_v5 = vpop.f32.mrb[2].mxu0 }
  0xfd   :  { %v346_v1 = vadd.f32 %v692_v13, %v648_v0  ;;  %v693_v6 = vpop.f32.mrb[2].mxu1  ;;  %v650_v7 = vpop.f32.mrb[3].mxu0 }
  0xfe   :  { %v651_v12 = vadd.f32 %v650_v7, %v649_v5  ;;  %v694_v21 = vpop.f32.mrb[3].mxu1 }
  0xff   :  { %364 = vst [vmem:[%s1594_s5] sm:$0xff] %v346_v1  ;;  %v695_v22 = vadd.f32 %v694_v21, %v693_v6 }
 0x101   :  { %v351_v26 = vadd.f32 %v695_v22, %v651_v12 }
 0x103   :  { %365 = vst [vmem:[%s1594_s5 + $0x8] sm:$0xff] %v351_v26 }
 0x104   :  { %v652_v25 = vpop.f32.mrb[4].mxu0  ;;  %v696_v36 = vpop.f32.mrb[4].mxu1 }
 0x105   :  { %v653_v43 = vpop.f32.mrb[5].mxu0  ;;  %v697_v46 = vpop.f32.mrb[5].mxu1 }
 0x106   :  { %v654_v44 = vadd.f32 %v653_v43, %v652_v25  ;;  %v698_v53 = vadd.f32 %v697_v46, %v696_v36 }
 0x108   :  { %v356_v29 = vadd.f32 %v698_v53, %v654_v44  ;;  %v655_v32 = vpop.f32.mrb[6].mxu0 }
 0x109   :  { %v699_v34 = vpop.f32.mrb[6].mxu1  ;;  %v656_v3 = vpop.f32.mrb[7].mxu0 }
 0x10a   :  { %v700_v4 = vpop.f32.mrb[7].mxu1  ;;  %366 = vst [vmem:[%s1594_s5 + $0x10] sm:$0xff] %v356_v29  ;;  %v657_v8 = vadd.f32 %v656_v3, %v655_v32 }
 0x10b   :  { %v701_v9 = vadd.f32 %v700_v4, %v699_v34 }
 0x10d   :  { %v361_v11 = vadd.f32 %v701_v9, %v657_v8 }
 0x10f   :  { %367 = vst [vmem:[%s1594_s5 + $0x18] sm:$0xff] %v361_v11 }
 0x118   :  { %v734_v41 = vpop.f32.mrb[8].mxu0 }
 0x119   :  { %v778_v14 = vpop.f32.mrb[8].mxu1  ;;  %v735_v37 = vpop.f32.mrb[9].mxu0 }
 0x11a   :  { %v736_v38 = vadd.f32 %v735_v37, %v734_v41  ;;  %v779_v39 = vpop.f32.mrb[9].mxu1 }
 0x11b   :  { %v780_v15 = vadd.f32 %v779_v39, %v778_v14 }
 0x11c   :  { %v737_v16 = vpop.f32.mrb[10].mxu0 }
 0x11d   :  { %v584_v17 = vadd.f32 %v780_v15, %v736_v38  ;;  %v781_v45 = vpop.f32.mrb[10].mxu1  ;;  %v738_v18 = vpop.f32.mrb[11].mxu0 }
 0x11e   :  { %v739_v19 = vadd.f32 %v738_v18, %v737_v16  ;;  %v782_v20 = vpop.f32.mrb[11].mxu1 }
 0x11f   :  { %602 = vst [vmem:[%s1595_s6] sm:$0xff] %v584_v17  ;;  %v783_v23 = vadd.f32 %v782_v20, %v781_v45 }
 0x120   :  { %v740_v24 = vpop.f32.mrb[12].mxu0 }
 0x121   :  { %v589_v27 = vadd.f32 %v783_v23, %v739_v19  ;;  %v784_v28 = vpop.f32.mrb[12].mxu1  ;;  %v741_v30 = vpop.f32.mrb[13].mxu0 }
 0x122   :  { %v742_v31 = vadd.f32 %v741_v30, %v740_v24  ;;  %v785_v33 = vpop.f32.mrb[13].mxu1 }
 0x123   :  { %603 = vst [vmem:[%s1595_s6 + $0x8] sm:$0xff] %v589_v27  ;;  %v786_v35 = vadd.f32 %v785_v33, %v784_v28 }
 0x124   :  { %v743_v40 = vpop.f32.mrb[14].mxu0 }
 0x125   :  { %v594_v42 = vadd.f32 %v786_v35, %v742_v31  ;;  %v787_v47 = vpop.f32.mrb[14].mxu1  ;;  %v744_v48 = vpop.f32.mrb[15].mxu0 }
 0x126   :  { %v745_v49 = vadd.f32 %v744_v48, %v743_v40  ;;  %v788_v50 = vpop.f32.mrb[15].mxu1 }
 0x127   :  { %604 = vst [vmem:[%s1595_s6 + $0x10] sm:$0xff] %v594_v42  ;;  %v789_v51 = vadd.f32 %v788_v50, %v787_v47 }
 0x129   :  { %v599_v52 = vadd.f32 %v789_v51, %v745_v49 }
 0x12b   :  { %605 = vst [vmem:[%s1595_s6 + $0x18] sm:$0xff] %v599_v52 }

// kernel: metal_network_forward.7
= control target key start
LH: loop header
LB: loop body
LE: loop exit
PB: predicated region body
PF: predicated region fallthrough
CT: control target
= control target key end

     0   :  { %v50_v32 = vlaneseq  ;;  %s428_s3 = inlined_call_operand.vmem [shape: f32[128,128], index: 3, kind: input, shape index: {}]   ;;  %s429_s0 = inlined_call_operand.vmem [shape: f32[32,128], index: 0, kind: input, shape index: {}]   ;;  %s430_s1 = inlined_call_operand.vmem [shape: f32[1,128], index: 1, kind: input, shape index: {}]   ;;  %s431_s2 = inlined_call_operand.vmem [shape: f32[1,128], index: 2, kind: input, shape index: {}]   ;;  %s432_s4 = inlined_call_operand.vmem [shape: f32[32,128], index: 4, kind: output, shape index: {0}]   ;;  %s433_s5 = inlined_call_operand.vmem [shape: f32[1,2,128], index: 5, kind: output, shape index: {1}]  }
   0x1   :  { %v68_v0 = vld [vmem:[%s428_s3] sm:$0xff]  ;;  %v69_v1 = vld [vmem:[%s428_s3 + $0x8] sm:$0xff]  ;;  %v70_v2 = vld [vmem:[%s428_s3 + $0x10] sm:$0xff] }
   0x2   :  { %v266_v3 = vpack.c.bf16 %v69_v1, %v68_v0  ;;  %v71_v4 = vld [vmem:[%s428_s3 + $0x18] sm:$0xff]  ;;  %v72_v6 = vld [vmem:[%s428_s3 + $0x20] sm:$0xff]  ;;  %v73_v7 = vld [vmem:[%s428_s3 + $0x28] sm:$0xff]  ;;  %v51_v38 = vshrl.u32 %v50_v32, 7 }
   0x3   :  { %v270_v5 = vpack.c.bf16 %v71_v4, %v70_v2  ;;  %v274_v8 = vpack.c.bf16 %v73_v7, %v72_v6  ;;  %v74_v9 = vld [vmem:[%s428_s3 + $0x30] sm:$0xff]  ;;  %v19_v10 = vld [vmem:[%s429_s0] sm:$0xff]  ;;  %v75_v12 = vld [vmem:[%s428_s3 + $0x38] sm:$0xff] }
   0x4   :  { %267 = vmatprep.subr.bf16.mxu0 %v266_v3  ;;  %298 = vmatprep.subr.bf16.mxu1 %v266_v3  ;;  %v205_v11 = vld [vmem:[%s430_s1] ss:$0 sm:$0xff]  ;;  %v21_v15 = vld [vmem:[%s429_s0 + $0x10] sm:$0xff]  ;;  %v278_v18 = vpack.c.bf16 %v75_v12, %v74_v9  ;;  %v77_v21 = vld [vmem:[%s428_s3 + $0x48] sm:$0xff]  ;;  %v54_v42 = vadd.s32 24, %v51_v38 }
   0x5   :  { %269 = vmatpush3.bf16.msra.mxu0 %v266_v3  ;;  %306 = vmatpush3.bf16.msra.mxu1 %v266_v3  ;;  %v30_v13 = vmul.f32 %v205_v11, %v19_v10  ;;  %v206_v14 = vld [vmem:[%s431_s2] ss:$0 sm:$0xff]  ;;  %v32_v16 = vmul.f32 %v205_v11, %v21_v15  ;;  %v78_v25 = vld [vmem:[%s428_s3 + $0x50] sm:$0xff]  ;;  %v79_v26 = vld [vmem:[%s428_s3 + $0x58] sm:$0xff] }
   0x6   :  { %271 = vmatprep.subr.bf16.mxu0 %v270_v5  ;;  %299 = vmatprep.subr.bf16.mxu1 %v270_v5  ;;  %v76_v20 = vld [vmem:[%s428_s3 + $0x40] sm:$0xff]  ;;  %v286_v27 = vpack.c.bf16 %v79_v26, %v78_v25  ;;  %v81_v29 = vld [vmem:[%s428_s3 + $0x68] sm:$0xff]  ;;  %v22_v31 = vld [vmem:[%s429_s0 + $0x18] sm:$0xff]  ;;  %vm63_vm0 = vcmp.lt.s32.totalorder %v54_v42, 30 }
   0x7   :  { %v41_v17 = vadd.f32 %v206_v14, %v30_v13  ;;  %v43_v19 = vadd.f32 %v206_v14, %v32_v16  ;;  %v282_v24 = vpack.c.bf16 %v77_v21, %v76_v20  ;;  %v80_v28 = vld [vmem:[%s428_s3 + $0x60] sm:$0xff]  ;;  %v20_v30 = vld [vmem:[%s429_s0 + $0x8] sm:$0xff]  ;;  %v82_v34 = vld [vmem:[%s428_s3 + $0x70] sm:$0xff]  ;;  %v33_v37 = vmul.f32 %v205_v11, %v22_v31 }
   0x8   :  { %v290_v33 = vpack.c.bf16 %v81_v29, %v80_v28  ;;  %v83_v35 = vld [vmem:[%s428_s3 + $0x78] sm:$0xff]  ;;  %v31_v36 = vmul.f32 %v205_v11, %v20_v30 }
   0x9   :  { %273 = vmatpush3.bf16.msra.mxu0 %v270_v5  ;;  %307 = vmatpush3.bf16.msra.mxu1 %v270_v5  ;;  %v45_v22 = vmax.f32 %v41_v17, 0.0  ;;  %v47_v23 = vmax.f32 %v43_v19, 0.0  ;;  %v294_v39 = vpack.c.bf16 %v83_v35, %v82_v34  ;;  %v44_v41 = vadd.f32 %v206_v14, %v33_v37 }
   0xa   :  { %275 = vmatprep.subr.bf16.mxu0 %v274_v8  ;;  %300 = vmatprep.subr.bf16.mxu1 %v274_v8  ;;  %v42_v40 = vadd.f32 %v206_v14, %v31_v36 }
   0xb   :  { %260 = vmatprep.mubr.f32.mxu0 %v45_v22  ;;  %263 = vmatprep.mubr.f32.mxu1 %v47_v23  ;;  %v48_v44 = vmax.f32 %v44_v41, 0.0 }
   0xc   :  { %v46_v43 = vmax.f32 %v42_v40, 0.0 }
   0xd   :  { %277 = vmatpush3.bf16.msra.mxu0 %v274_v8  ;;  %308 = vmatpush3.bf16.msra.mxu1 %v274_v8 }
   0xe   :  { %279 = vmatprep.subr.bf16.mxu0 %v278_v18  ;;  %301 = vmatprep.subr.bf16.mxu1 %v278_v18 }
  0x11   :  { %281 = vmatpush3.bf16.msra.mxu0 %v278_v18  ;;  %309 = vmatpush3.bf16.msra.mxu1 %v278_v18 }
  0x12   :  { %283 = vmatprep.subr.bf16.mxu0 %v282_v24  ;;  %302 = vmatprep.subr.bf16.mxu1 %v282_v24 }
  0x15   :  { %285 = vmatpush3.bf16.msra.mxu0 %v282_v24  ;;  %310 = vmatpush3.bf16.msra.mxu1 %v282_v24 }
  0x16   :  { %287 = vmatprep.subr.bf16.mxu0 %v286_v27  ;;  %303 = vmatprep.subr.bf16.mxu1 %v286_v27 }
  0x19   :  { %289 = vmatpush3.bf16.msra.mxu0 %v286_v27  ;;  %311 = vmatpush3.bf16.msra.mxu1 %v286_v27 }
  0x1a   :  { %291 = vmatprep.subr.bf16.mxu0 %v290_v33  ;;  %304 = vmatprep.subr.bf16.mxu1 %v290_v33 }
  0x1d   :  { %293 = vmatpush3.bf16.msra.mxu0 %v290_v33  ;;  %312 = vmatpush3.bf16.msra.mxu1 %v290_v33 }
  0x1e   :  { %295 = vmatprep.subr.bf16.mxu0 %v294_v39  ;;  %305 = vmatprep.subr.bf16.mxu1 %v294_v39 }
  0x21   :  { %297 = vmatpush3.bf16.msra.mxu0 %v294_v39  ;;  %313 = vmatpush3.bf16.msra.mxu1 %v294_v39 }
  0x24   :  { %261 = vmatmul.mubr.f32.vlgmr.msra.gmra.mrb[0].mxu0 %v46_v43  ;;  %264 = vmatmul.mubr.msk.f32.vlgmr.msra.gmra.mrb[0].mxu1 %vm63_vm0, %v48_v44 }
  0xf7   :  { %v262_v45 = vpop.f32.mrb[0].mxu0  ;;  %v265_v46 = vpop.f32.mrb[0].mxu1 }
  0xf8   :  { %170 = vst [vmem:[%s432_s4 + $0x8] sm:$0xff] %v262_v45  ;;  %v184_v47 = vmul.f32 %v262_v45, %v262_v45  ;;  %v150_v48 = vpop.f32.mrb[1].mxu0  ;;  %172 = vst [vmem:[%s432_s4 + $0x18] sm:$0xff] %v265_v46  ;;  %v160_v49 = vpop.f32.mrb[1].mxu1  ;;  %v186_v55 = vmul.f32 %v265_v46, %v265_v46 }
  0xf9   :  { %169 = vst [vmem:[%s432_s4] sm:$0xff] %v150_v48  ;;  %v173_v50 = vadd.f32 %v262_v45, %v150_v48  ;;  %v183_v51 = vmul.f32 %v150_v48, %v150_v48  ;;  %171 = vst [vmem:[%s432_s4 + $0x10] sm:$0xff] %v160_v49  ;;  %v185_v52 = vmul.f32 %v160_v49, %v160_v49 }
  0xfb   :  { %v187_v53 = vadd.f32 %v184_v47, %v183_v51  ;;  %v174_v54 = vadd.f32 %v173_v50, %v160_v49 }
  0xfd   :  { %v175_v56 = vadd.f32 %v265_v46, %v174_v54  ;;  %v188_v57 = vadd.f32 %v187_v53, %v185_v52 }
  0xff   :  { %v176_v58 = vrot.slane %v175_v56, 4  ;;  %v189_v59 = vadd.f32 %v188_v57, %v186_v55 }
 0x101   :  { %v177_v60 = vadd.f32 %v176_v58, %v175_v56  ;;  %v190_v61 = vrot.slane %v189_v59, 4 }
 0x103   :  { %v178_v62 = vrot.slane %v177_v60, 2  ;;  %v191_v63 = vadd.f32 %v190_v61, %v189_v59 }
 0x105   :  { %v179_v0 = vadd.f32 %v178_v62, %v177_v60  ;;  %v192_v1 = vrot.slane %v191_v63, 2 }
 0x107   :  { %v180_v2 = vrot.slane %v179_v0, 1  ;;  %v193_v3 = vadd.f32 %v192_v1, %v191_v63 }
 0x109   :  { %v181_v4 = vadd.f32 %v180_v2, %v179_v0  ;;  %v194_v5 = vrot.slane %v193_v3, 1 }
 0x10b   :  { %182 = vst [vmem:[%s433_s5] sm:$0x1] %v181_v4  ;;  %v195_v6 = vadd.f32 %v194_v5, %v193_v3 }
 0x10d   :  { %196 = vst [vmem:[%s433_s5 + $0x1] sm:$0x1] %v195_v6 }

// kernel: metal_network_forward.5
= control target key start
LH: loop header
LB: loop body
LE: loop exit
PB: predicated region body
PF: predicated region fallthrough
CT: control target
= control target key end

     0   :  { %11 = vsyncpa [#allocation3], 0  ;;  %s2238_s18 = smov [#allocation2]   ;;  %s2575_s0 = inlined_call_operand.vmem [shape: f32[32,1024], index: 0, kind: input, shape index: {}]   ;;  %s2576_s1 = inlined_call_operand.vmem [shape: f32[1,1024], index: 1, kind: input, shape index: {}]   ;;  %s2577_s2 = inlined_call_operand.vmem [shape: f32[1,1024], index: 2, kind: input, shape index: {}]   ;;  %s2578_s3 = inlined_call_operand.hbm [shape: f32[1024,512], index: 3, kind: input, shape index: {}]   ;;  %s2579_s4 = inlined_call_operand.vmem [shape: f32[32,512], index: 4, kind: output, shape index: {0}]   ;;  %s2580_s5 = inlined_call_operand.vmem [shape: f32[1,2,512], index: 5, kind: output, shape index: {1}]  }
   0x1   :  { %s23_s19 = sshll.u32 %s2238_s18, 4  ;;  %s2214_s22 = scalar_lea.hbm %s2578_s3, 65536  ;;  %s24_s19 = int_to_ptr.vmem [resolvable:$true] %s23_s19 }
   0x2   :  { %p2215_p0 = scmp.ne.s32.totalorder %s2578_s3, %s2214_s22  ;;  %p2218_p1 = scmp.lt.u32.totalorder %s2214_s22, %s2578_s3 }
   0x4   :  { %p2220_p2 = pnand %p2218_p1, %p2215_p0 }
   0x6   :  { %2223 = shalt.err (!%p2220_p2)
}
   0x7   :  { %s2224_s27 = scalar_lea.vmem %s24_s19, 65536  ;;  %p2229_p4 = scmp.lt.s32.totalorder %s24_s19, %s24_s19 }
   0x8   :  { %p2225_p3 = scmp.ne.s32.totalorder %s24_s19, %s2224_s27  ;;  %p2230_p5 = scmp.lt.s32.totalorder %s2224_s27, %s2224_s27 }
   0xa   :  { %p2231_p6 = por %p2230_p5, %p2229_p4 }
   0xc   :  { %p2232_p7 = pnand %p2231_p6, %p2225_p3 }
   0xe   :  { %2235 = shalt.err (!%p2232_p7)
}
   0xf   :  { %s2239_s28 = smov 512   ;;  %s2240_s29 = smov 32  }
  0x10   :  { %29 = dma.hbm_to_vmem [thread:$0]  %s2578_s3, 65536, %s24_s19, [#allocation3], %s2239_s28, %s2239_s28, %s2240_s29  }
  0x11   :  { %2236 = dma.done.wait [#allocation3], 65536  }
  0x12   :  { %2237 = vsyncadd [#allocation3], 4294901760  ;;  %v246_v0 = vld [vmem:[#allocation2 + $0x8] sm:$0xff]  ;;  %v248_v2 = vld [vmem:[#allocation2 + $0x18] sm:$0xff] }
  0x13   :  { %v250_v1 = vld [vmem:[#allocation2 + $0x28] sm:$0xff]  ;;  %v252_v4 = vld [vmem:[#allocation2 + $0x38] sm:$0xff]  ;;  %v245_v5 = vld [vmem:[#allocation2] sm:$0xff] }
  0x14   :  { %v1648_v3 = vpack.c.bf16 %v250_v1, %v246_v0  ;;  %v249_v6 = vld [vmem:[#allocation2 + $0x20] sm:$0xff]  ;;  %v1904_v7 = vpack.c.bf16 %v252_v4, %v248_v2  ;;  %v247_v9 = vld [vmem:[#allocation2 + $0x10] sm:$0xff]  ;;  %v254_v11 = vld [vmem:[#allocation2 + $0x48] sm:$0xff] }
  0x15   :  { %v1650_v8 = vpack.c.bf16 %v249_v6, %v245_v5  ;;  %v251_v10 = vld [vmem:[#allocation2 + $0x30] sm:$0xff]  ;;  %v258_v13 = vld [vmem:[#allocation2 + $0x68] sm:$0xff]  ;;  %v256_v14 = vld [vmem:[#allocation2 + $0x58] sm:$0xff] }
  0x16   :  { %1649 = vmatprep.subr.bf16.mxu0 %v1648_v3  ;;  %v1906_v12 = vpack.c.bf16 %v251_v10, %v247_v9  ;;  %v260_v15 = vld [vmem:[#allocation2 + $0x78] sm:$0xff]  ;;  %1905 = vmatprep.subr.bf16.mxu1 %v1904_v7  ;;  %v1652_v16 = vpack.c.bf16 %v258_v13, %v254_v11  ;;  %v253_v18 = vld [vmem:[#allocation2 + $0x40] sm:$0xff]  ;;  %v255_v20 = vld [vmem:[#allocation2 + $0x50] sm:$0xff] }
  0x17   :  { %1651 = vmatpush1.bf16.msra.mxu0 %v1650_v8  ;;  %v1908_v17 = vpack.c.bf16 %v260_v15, %v256_v14  ;;  %v257_v19 = vld [vmem:[#allocation2 + $0x60] sm:$0xff]  ;;  %v259_v22 = vld [vmem:[#allocation2 + $0x70] sm:$0xff]  ;;  %v262_v23 = vld [vmem:[#allocation2 + $0x88] sm:$0xff] }
  0x18   :  { %1907 = vmatpush1.bf16.msra.mxu1 %v1906_v12  ;;  %v1654_v21 = vpack.c.bf16 %v257_v19, %v253_v18  ;;  %v266_v24 = vld [vmem:[#allocation2 + $0xa8] sm:$0xff]  ;;  %1653 = vmatprep.subr.bf16.mxu0 %v1652_v16  ;;  %v1910_v25 = vpack.c.bf16 %v259_v22, %v255_v20  ;;  %v264_v27 = vld [vmem:[#allocation2 + $0x98] sm:$0xff]  ;;  %v261_v29 = vld [vmem:[#allocation2 + $0x80] sm:$0xff] }
  0x19   :  { %1909 = vmatprep.subr.bf16.mxu1 %v1908_v17  ;;  %v1656_v26 = vpack.c.bf16 %v266_v24, %v262_v23  ;;  %v268_v28 = vld [vmem:[#allocation2 + $0xb8] sm:$0xff]  ;;  %v265_v31 = vld [vmem:[#allocation2 + $0xa0] sm:$0xff]  ;;  %v263_v32 = vld [vmem:[#allocation2 + $0x90] sm:$0xff] }
  0x1a   :  { %v1912_v30 = vpack.c.bf16 %v268_v28, %v264_v27  ;;  %v267_v33 = vld [vmem:[#allocation2 + $0xb0] sm:$0xff]  ;;  %v1658_v34 = vpack.c.bf16 %v265_v31, %v261_v29  ;;  %v270_v35 = vld [vmem:[#allocation2 + $0xc8] sm:$0xff]  ;;  %v272_v37 = vld [vmem:[#allocation2 + $0xd8] sm:$0xff] }
  0x1b   :  { %1655 = vmatpush1.bf16.msra.mxu0 %v1654_v21  ;;  %v274_v36 = vld [vmem:[#allocation2 + $0xe8] sm:$0xff]  ;;  %v1914_v38 = vpack.c.bf16 %v267_v33, %v263_v32  ;;  %v276_v40 = vld [vmem:[#allocation2 + $0xf8] sm:$0xff]  ;;  %v269_v41 = vld [vmem:[#allocation2 + $0xc0] sm:$0xff] }
  0x1c   :  { %1911 = vmatpush1.bf16.msra.mxu1 %v1910_v25  ;;  %1657 = vmatprep.subr.bf16.mxu0 %v1656_v26  ;;  %v1660_v39 = vpack.c.bf16 %v274_v36, %v270_v35  ;;  %v273_v42 = vld [vmem:[#allocation2 + $0xe0] sm:$0xff]  ;;  %v1916_v43 = vpack.c.bf16 %v276_v40, %v272_v37  ;;  %v271_v44 = vld [vmem:[#allocation2 + $0xd0] sm:$0xff]  ;;  %v278_v46 = vld [vmem:[#allocation2 + $0x108] sm:$0xff] }
  0x1d   :  { %1913 = vmatprep.subr.bf16.mxu1 %v1912_v30  ;;  %v275_v45 = vld [vmem:[#allocation2 + $0xf0] sm:$0xff]  ;;  %v282_v47 = vld [vmem:[#allocation2 + $0x128] sm:$0xff]  ;;  %v280_v48 = vld [vmem:[#allocation2 + $0x118] sm:$0xff]  ;;  %v1662_v50 = vpack.c.bf16 %v273_v42, %v269_v41 }
  0x1e   :  { %v284_v49 = vld [vmem:[#allocation2 + $0x138] sm:$0xff]  ;;  %v1918_v51 = vpack.c.bf16 %v275_v45, %v271_v44  ;;  %v1664_v52 = vpack.c.bf16 %v282_v47, %v278_v46  ;;  %v277_v53 = vld [vmem:[#allocation2 + $0x100] sm:$0xff]  ;;  %v279_v55 = vld [vmem:[#allocation2 + $0x110] sm:$0xff]  ;;  %v67_v47 = vlaneseq }
  0x1f   :  { %1659 = vmatpush1.bf16.msra.mxu0 %v1658_v34  ;;  %v281_v54 = vld [vmem:[#allocation2 + $0x120] sm:$0xff]  ;;  %v1920_v56 = vpack.c.bf16 %v284_v49, %v280_v48  ;;  %v283_v57 = vld [vmem:[#allocation2 + $0x130] sm:$0xff]  ;;  %v286_v58 = vld [vmem:[#allocation2 + $0x148] sm:$0xff] }
  0x20   :  { %1915 = vmatpush1.bf16.msra.mxu1 %v1914_v38  ;;  %1661 = vmatprep.subr.bf16.mxu0 %v1660_v39  ;;  %v290_v59 = vld [vmem:[#allocation2 + $0x168] sm:$0xff]  ;;  %v288_v60 = vld [vmem:[#allocation2 + $0x158] sm:$0xff]  ;;  %v1666_v62 = vpack.c.bf16 %v281_v54, %v277_v53  ;;  %v1922_v63 = vpack.c.bf16 %v283_v57, %v279_v55  ;;  %v285_v1 = vld [vmem:[#allocation2 + $0x140] sm:$0xff]  ;;  %vm1552_vm0 = vcmp.lt.s32.totalorder %v67_v47, 512 }
  0x21   :  { %1917 = vmatprep.subr.bf16.mxu1 %v1916_v43  ;;  %v292_v61 = vld [vmem:[#allocation2 + $0x178] sm:$0xff]  ;;  %v1668_v0 = vpack.c.bf16 %v290_v59, %v286_v58  ;;  %v289_v2 = vld [vmem:[#allocation2 + $0x160] sm:$0xff]  ;;  %v287_v3 = vld [vmem:[#allocation2 + $0x150] sm:$0xff] }
  0x22   :  { %v1924_v4 = vpack.c.bf16 %v292_v61, %v288_v60  ;;  %v291_v5 = vld [vmem:[#allocation2 + $0x170] sm:$0xff]  ;;  %v294_v6 = vld [vmem:[#allocation2 + $0x188] sm:$0xff]  ;;  %v296_v8 = vld [vmem:[#allocation2 + $0x198] sm:$0xff]  ;;  %v1670_v10 = vpack.c.bf16 %v289_v2, %v285_v1  ;;  %v2285_v60 = vshrl.u32 %v67_v47, 7 }
  0x23   :  { %1663 = vmatpush1.bf16.msra.mxu0 %v1662_v50  ;;  %v298_v7 = vld [vmem:[#allocation2 + $0x1a8] sm:$0xff]  ;;  %v300_v9 = vld [vmem:[#allocation2 + $0x1b8] sm:$0xff]  ;;  %v1926_v11 = vpack.c.bf16 %v291_v5, %v287_v3  ;;  %v293_v13 = vld [vmem:[#allocation2 + $0x180] sm:$0xff] }
  0x24   :  { %1919 = vmatpush1.bf16.msra.mxu1 %v1918_v51  ;;  %1665 = vmatprep.subr.bf16.mxu0 %v1664_v52  ;;  %v1672_v12 = vpack.c.bf16 %v298_v7, %v294_v6  ;;  %v297_v14 = vld [vmem:[#allocation2 + $0x1a0] sm:$0xff]  ;;  %v295_v15 = vld [vmem:[#allocation2 + $0x190] sm:$0xff]  ;;  %v1928_v16 = vpack.c.bf16 %v300_v9, %v296_v8  ;;  %v302_v18 = vld [vmem:[#allocation2 + $0x1c8] sm:$0xff] }
  0x25   :  { %1921 = vmatprep.subr.bf16.mxu1 %v1920_v56  ;;  %v299_v17 = vld [vmem:[#allocation2 + $0x1b0] sm:$0xff]  ;;  %v306_v19 = vld [vmem:[#allocation2 + $0x1e8] sm:$0xff]  ;;  %v304_v20 = vld [vmem:[#allocation2 + $0x1d8] sm:$0xff]  ;;  %v1674_v22 = vpack.c.bf16 %v297_v14, %v293_v13 }
  0x26   :  { %v308_v21 = vld [vmem:[#allocation2 + $0x1f8] sm:$0xff]  ;;  %v1930_v23 = vpack.c.bf16 %v299_v17, %v295_v15  ;;  %v1676_v24 = vpack.c.bf16 %v306_v19, %v302_v18  ;;  %v301_v25 = vld [vmem:[#allocation2 + $0x1c0] sm:$0xff]  ;;  %v303_v27 = vld [vmem:[#allocation2 + $0x1d0] sm:$0xff] }
  0x27   :  { %1667 = vmatpush1.bf16.msra.mxu0 %v1666_v62  ;;  %v305_v26 = vld [vmem:[#allocation2 + $0x1e0] sm:$0xff]  ;;  %v1932_v28 = vpack.c.bf16 %v308_v21, %v304_v20  ;;  %v307_v29 = vld [vmem:[#allocation2 + $0x1f0] sm:$0xff]  ;;  %v310_v30 = vld [vmem:[#allocation2 + $0x208] sm:$0xff] }
  0x28   :  { %1923 = vmatpush1.bf16.msra.mxu1 %v1922_v63  ;;  %1669 = vmatprep.subr.bf16.mxu0 %v1668_v0  ;;  %v314_v31 = vld [vmem:[#allocation2 + $0x228] sm:$0xff]  ;;  %v312_v32 = vld [vmem:[#allocation2 + $0x218] sm:$0xff]  ;;  %v1678_v34 = vpack.c.bf16 %v305_v26, %v301_v25  ;;  %v1934_v35 = vpack.c.bf16 %v307_v29, %v303_v27  ;;  %v309_v37 = vld [vmem:[#allocation2 + $0x200] sm:$0xff] }
  0x29   :  { %1925 = vmatprep.subr.bf16.mxu1 %v1924_v4  ;;  %v316_v33 = vld [vmem:[#allocation2 + $0x238] sm:$0xff]  ;;  %v1680_v36 = vpack.c.bf16 %v314_v31, %v310_v30  ;;  %v313_v38 = vld [vmem:[#allocation2 + $0x220] sm:$0xff]  ;;  %v311_v39 = vld [vmem:[#allocation2 + $0x210] sm:$0xff] }
  0x2a   :  { %v1936_v40 = vpack.c.bf16 %v316_v33, %v312_v32  ;;  %v315_v41 = vld [vmem:[#allocation2 + $0x230] sm:$0xff]  ;;  %v318_v42 = vld [vmem:[#allocation2 + $0x248] sm:$0xff]  ;;  %v320_v44 = vld [vmem:[#allocation2 + $0x258] sm:$0xff]  ;;  %v1682_v46 = vpack.c.bf16 %v313_v38, %v309_v37 }
  0x2b   :  { %1671 = vmatpush1.bf16.msra.mxu0 %v1670_v10  ;;  %v322_v43 = vld [vmem:[#allocation2 + $0x268] sm:$0xff]  ;;  %v324_v45 = vld [vmem:[#allocation2 + $0x278] sm:$0xff]  ;;  %v1938_v48 = vpack.c.bf16 %v315_v41, %v311_v39  ;;  %v317_v50 = vld [vmem:[#allocation2 + $0x240] sm:$0xff]  ;;  %v69_v39 = vsub.s32 0, %v2285_v60 }
  0x2c   :  { %1927 = vmatpush1.bf16.msra.mxu1 %v1926_v11  ;;  %1673 = vmatprep.subr.bf16.mxu0 %v1672_v12  ;;  %v1684_v49 = vpack.c.bf16 %v322_v43, %v318_v42  ;;  %v321_v51 = vld [vmem:[#allocation2 + $0x260] sm:$0xff]  ;;  %v319_v52 = vld [vmem:[#allocation2 + $0x250] sm:$0xff]  ;;  %v1940_v53 = vpack.c.bf16 %v324_v45, %v320_v44  ;;  %v326_v55 = vld [vmem:[#allocation2 + $0x288] sm:$0xff]  ;;  %v73_v11 = vsub.s32 1, %v2285_v60 }
  0x2d   :  { %1929 = vmatprep.subr.bf16.mxu1 %v1928_v16  ;;  %v323_v54 = vld [vmem:[#allocation2 + $0x270] sm:$0xff]  ;;  %v330_v56 = vld [vmem:[#allocation2 + $0x2a8] sm:$0xff]  ;;  %v328_v57 = vld [vmem:[#allocation2 + $0x298] sm:$0xff]  ;;  %v1686_v59 = vpack.c.bf16 %v321_v51, %v317_v50 }
  0x2e   :  { %v332_v58 = vld [vmem:[#allocation2 + $0x2b8] sm:$0xff]  ;;  %v1942_v61 = vpack.c.bf16 %v323_v54, %v319_v52  ;;  %v1688_v62 = vpack.c.bf16 %v330_v56, %v326_v55  ;;  %v325_v63 = vld [vmem:[#allocation2 + $0x280] sm:$0xff]  ;;  %v327_v1 = vld [vmem:[#allocation2 + $0x290] sm:$0xff] }
  0x2f   :  { %1675 = vmatpush1.bf16.msra.mxu0 %v1674_v22  ;;  %v329_v0 = vld [vmem:[#allocation2 + $0x2a0] sm:$0xff]  ;;  %v1944_v2 = vpack.c.bf16 %v332_v58, %v328_v57  ;;  %v331_v3 = vld [vmem:[#allocation2 + $0x2b0] sm:$0xff]  ;;  %v334_v4 = vld [vmem:[#allocation2 + $0x2c8] sm:$0xff] }
  0x30   :  { %1931 = vmatpush1.bf16.msra.mxu1 %v1930_v23  ;;  %1677 = vmatprep.subr.bf16.mxu0 %v1676_v24  ;;  %v338_v5 = vld [vmem:[#allocation2 + $0x2e8] sm:$0xff]  ;;  %v336_v6 = vld [vmem:[#allocation2 + $0x2d8] sm:$0xff]  ;;  %v1690_v8 = vpack.c.bf16 %v329_v0, %v325_v63  ;;  %v333_v9 = vld [vmem:[#allocation2 + $0x2c0] sm:$0xff]  ;;  %v1946_v12 = vpack.c.bf16 %v331_v3, %v327_v1 }
  0x31   :  { %1933 = vmatprep.subr.bf16.mxu1 %v1932_v28  ;;  %v340_v7 = vld [vmem:[#allocation2 + $0x2f8] sm:$0xff]  ;;  %v337_v10 = vld [vmem:[#allocation2 + $0x2e0] sm:$0xff]  ;;  %v1692_v13 = vpack.c.bf16 %v338_v5, %v334_v4  ;;  %v335_v14 = vld [vmem:[#allocation2 + $0x2d0] sm:$0xff] }
  0x32   :  { %v339_v15 = vld [vmem:[#allocation2 + $0x2f0] sm:$0xff]  ;;  %v342_v16 = vld [vmem:[#allocation2 + $0x308] sm:$0xff]  ;;  %v1948_v17 = vpack.c.bf16 %v340_v7, %v336_v6  ;;  %v344_v19 = vld [vmem:[#allocation2 + $0x318] sm:$0xff]  ;;  %v1694_v24 = vpack.c.bf16 %v337_v10, %v333_v9 }
  0x33   :  { %1679 = vmatpush1.bf16.msra.mxu0 %v1678_v34  ;;  %v346_v18 = vld [vmem:[#allocation2 + $0x328] sm:$0xff]  ;;  %v348_v20 = vld [vmem:[#allocation2 + $0x338] sm:$0xff]  ;;  %v2294_v22 = vld [vmem:[%s2576_s1] sm:$0xff]  ;;  %v1950_v27 = vpack.c.bf16 %v339_v15, %v335_v14 }
  0x34   :  { %1935 = vmatpush1.bf16.msra.mxu1 %v1934_v35  ;;  %1681 = vmatprep.subr.bf16.mxu0 %v1680_v36  ;;  %v34_v21 = vld [vmem:[%s2575_s0 + $0x8] sm:$0xff]  ;;  %v2299_v23 = vld [vmem:[%s2577_s2] sm:$0xff]  ;;  %v2302_v25 = vrot.slane %v2294_v22, %v73_v11  ;;  %v1696_v28 = vpack.c.bf16 %v346_v18, %v342_v16  ;;  %v343_v31 = vld [vmem:[#allocation2 + $0x310] sm:$0xff]  ;;  %v1952_v32 = vpack.c.bf16 %v348_v20, %v344_v19 }
  0x35   :  { %1937 = vmatprep.subr.bf16.mxu1 %v1936_v40  ;;  %v2305_v26 = vrot.slane %v2299_v23, %v73_v11  ;;  %v341_v29 = vld [vmem:[#allocation2 + $0x300] sm:$0xff]  ;;  %v347_v33 = vld [vmem:[#allocation2 + $0x330] sm:$0xff]  ;;  %v350_v34 = vld [vmem:[#allocation2 + $0x348] sm:$0xff]  ;;  %v2311_v55 = vrot.slane %v2294_v22, %v69_v39  ;;  %v2318_v7 = vrot.slane %v2299_v23, %v69_v39 }
  0x36   :  { %v345_v30 = vld [vmem:[#allocation2 + $0x320] sm:$0xff]  ;;  %v354_v35 = vld [vmem:[#allocation2 + $0x368] sm:$0xff]  ;;  %v108_v36 = vmul.f32 %v2302_v25, %v34_v21  ;;  %v352_v37 = vld [vmem:[#allocation2 + $0x358] sm:$0xff]  ;;  %v1954_v42 = vpack.c.bf16 %v347_v33, %v343_v31 }
  0x37   :  { %1683 = vmatpush1.bf16.msra.mxu0 %v1682_v46  ;;  %v356_v38 = vld [vmem:[#allocation2 + $0x378] sm:$0xff]  ;;  %v1698_v40 = vpack.c.bf16 %v345_v30, %v341_v29  ;;  %v1700_v43 = vpack.c.bf16 %v354_v35, %v350_v34  ;;  %v349_v44 = vld [vmem:[#allocation2 + $0x340] sm:$0xff]  ;;  %v351_v46 = vld [vmem:[#allocation2 + $0x350] sm:$0xff] }
  0x38   :  { %1939 = vmatpush1.bf16.msra.mxu1 %v1938_v48  ;;  %1685 = vmatprep.subr.bf16.mxu0 %v1684_v49  ;;  %v182_v41 = vadd.f32 %v2305_v26, %v108_v36  ;;  %v353_v45 = vld [vmem:[#allocation2 + $0x360] sm:$0xff]  ;;  %v1956_v48 = vpack.c.bf16 %v356_v38, %v352_v37  ;;  %v355_v49 = vld [vmem:[#allocation2 + $0x370] sm:$0xff]  ;;  %v358_v50 = vld [vmem:[#allocation2 + $0x388] sm:$0xff] }
  0x39   :  { %1941 = vmatprep.subr.bf16.mxu1 %v1940_v53  ;;  %v362_v51 = vld [vmem:[#allocation2 + $0x3a8] sm:$0xff]  ;;  %v360_v53 = vld [vmem:[#allocation2 + $0x398] sm:$0xff]  ;;  %v1702_v56 = vpack.c.bf16 %v353_v45, %v349_v44  ;;  %v33_v57 = vld [vmem:[%s2575_s0] sm:$0xff]  ;;  %v1958_v58 = vpack.c.bf16 %v355_v49, %v351_v46 }
  0x3a   :  { %v214_v52 = vmax.f32 %v182_v41, 0.0  ;;  %v364_v54 = vld [vmem:[#allocation2 + $0x3b8] sm:$0xff]  ;;  %v359_v63 = vld [vmem:[#allocation2 + $0x390] sm:$0xff]  ;;  %v370_v3 = vld [vmem:[#allocation2 + $0x3e8] sm:$0xff]  ;;  %v107_v6 = vmul.f32 %v2311_v55, %v33_v57 }
  0x3b   :  { %1687 = vmatpush1.bf16.msra.mxu0 %v1686_v59  ;;  %v1704_v59 = vpack.c.bf16 %v362_v51, %v358_v50  ;;  %v1960_v0 = vpack.c.bf16 %v364_v54, %v360_v53  ;;  %v363_v1 = vld [vmem:[#allocation2 + $0x3b0] sm:$0xff]  ;;  %v368_v4 = vld [vmem:[#allocation2 + $0x3d8] sm:$0xff]  ;;  %v365_v11 = vld [vmem:[#allocation2 + $0x3c0] sm:$0xff] }
  0x3c   :  { %1943 = vmatpush1.bf16.msra.mxu1 %v1942_v61  ;;  %1689 = vmatprep.subr.bf16.mxu0 %v1688_v62  ;;  %v357_v61 = vld [vmem:[#allocation2 + $0x380] sm:$0xff]  ;;  %v372_v5 = vld [vmem:[#allocation2 + $0x3f8] sm:$0xff]  ;;  %v1962_v9 = vpack.c.bf16 %v363_v1, %v359_v63  ;;  %v371_v15 = vld [vmem:[#allocation2 + $0x3f0] sm:$0xff]  ;;  %v181_v20 = vadd.f32 %v2318_v7, %v107_v6 }
  0x3d   :  { %1945 = vmatprep.subr.bf16.mxu1 %v1944_v2  ;;  %821 = vmatprep.mubr.f32.mxu0 %v214_v52  ;;  %v361_v62 = vld [vmem:[#allocation2 + $0x3a0] sm:$0xff]  ;;  %v366_v2 = vld [vmem:[#allocation2 + $0x3c8] sm:$0xff]  ;;  %v1964_v14 = vpack.c.bf16 %v372_v5, %v368_v4  ;;  %v376_v18 = vld [vmem:[#allocation2 + $0x418] sm:$0xff] }
  0x3e   :  { %1177 = vmatprep.mubr.f32.mxu1 %v214_v52  ;;  %v1708_v10 = vpack.c.bf16 %v370_v3, %v366_v2  ;;  %v374_v16 = vld [vmem:[#allocation2 + $0x408] sm:$0xff]  ;;  %v380_v19 = vld [vmem:[#allocation2 + $0x438] sm:$0xff]  ;;  %v377_v29 = vld [vmem:[#allocation2 + $0x420] sm:$0xff]  ;;  %v213_v35 = vmax.f32 %v181_v20, 0.0 }
  0x3f   :  { %1691 = vmatpush1.bf16.msra.mxu0 %v1690_v8  ;;  %v1706_v8 = vpack.c.bf16 %v361_v62, %v357_v61  ;;  %v375_v30 = vld [vmem:[#allocation2 + $0x410] sm:$0xff]  ;;  %v1968_v31 = vpack.c.bf16 %v380_v19, %v376_v18  ;;  %v382_v33 = vld [vmem:[#allocation2 + $0x448] sm:$0xff]  ;;  %v384_v36 = vld [vmem:[#allocation2 + $0x458] sm:$0xff] }
  0x40   :  { %1947 = vmatpush1.bf16.msra.mxu1 %v1946_v12  ;;  %1693 = vmatprep.subr.bf16.mxu0 %v1692_v13  ;;  %v369_v12 = vld [vmem:[#allocation2 + $0x3e0] sm:$0xff]  ;;  %v367_v13 = vld [vmem:[#allocation2 + $0x3d0] sm:$0xff]  ;;  %v386_v34 = vld [vmem:[#allocation2 + $0x468] sm:$0xff] }
  0x41   :  { %1949 = vmatprep.subr.bf16.mxu1 %v1948_v17  ;;  %v378_v17 = vld [vmem:[#allocation2 + $0x428] sm:$0xff]  ;;  %v1710_v21 = vpack.c.bf16 %v369_v12, %v365_v11  ;;  %v388_v37 = vld [vmem:[#allocation2 + $0x478] sm:$0xff]  ;;  %v381_v41 = vld [vmem:[#allocation2 + $0x440] sm:$0xff] }
  0x42   :  { %v1972_v44 = vpack.c.bf16 %v388_v37, %v384_v36  ;;  %v387_v45 = vld [vmem:[#allocation2 + $0x470] sm:$0xff]  ;;  %v390_v46 = vld [vmem:[#allocation2 + $0x488] sm:$0xff]  ;;  %v392_v49 = vld [vmem:[#allocation2 + $0x498] sm:$0xff]  ;;  %v81_v36 = vsub.s32 3, %v2285_v60 }
  0x43   :  { %1695 = vmatpush1.bf16.msra.mxu0 %v1694_v24  ;;  %v1966_v24 = vpack.c.bf16 %v371_v15, %v367_v13  ;;  %v396_v50 = vld [vmem:[#allocation2 + $0x4b8] sm:$0xff]  ;;  %v389_v54 = vld [vmem:[#allocation2 + $0x480] sm:$0xff]  ;;  %v391_v57 = vld [vmem:[#allocation2 + $0x490] sm:$0xff] }
  0x44   :  { %1951 = vmatpush1.bf16.msra.mxu1 %v1950_v27  ;;  %1697 = vmatprep.subr.bf16.mxu0 %v1696_v28  ;;  %v1712_v27 = vpack.c.bf16 %v378_v17, %v374_v16  ;;  %v373_v28 = vld [vmem:[#allocation2 + $0x400] sm:$0xff]  ;;  %v398_v61 = vld [vmem:[#allocation2 + $0x4c8] sm:$0xff]  ;;  %v400_v63 = vld [vmem:[#allocation2 + $0x4d8] sm:$0xff] }
  0x45   :  { %1953 = vmatprep.subr.bf16.mxu1 %v1952_v32  ;;  %v379_v32 = vld [vmem:[#allocation2 + $0x430] sm:$0xff]  ;;  %v1714_v38 = vpack.c.bf16 %v377_v29, %v373_v28  ;;  %v402_v62 = vld [vmem:[#allocation2 + $0x4e8] sm:$0xff]  ;;  %v397_v4 = vld [vmem:[#allocation2 + $0x4c0] sm:$0xff] }
  0x46   :  { %v1970_v39 = vpack.c.bf16 %v379_v32, %v375_v30  ;;  %v1724_v3 = vpack.c.bf16 %v402_v62, %v398_v61  ;;  %v401_v5 = vld [vmem:[#allocation2 + $0x4e0] sm:$0xff]  ;;  %v399_v6 = vld [vmem:[#allocation2 + $0x4d0] sm:$0xff]  ;;  %v410_v11 = vld [vmem:[#allocation2 + $0x528] sm:$0xff] }
  0x47   :  { %1699 = vmatpush1.bf16.msra.mxu0 %v1698_v40  ;;  %v1716_v40 = vpack.c.bf16 %v386_v34, %v382_v33  ;;  %v408_v12 = vld [vmem:[#allocation2 + $0x518] sm:$0xff]  ;;  %v405_v15 = vld [vmem:[#allocation2 + $0x500] sm:$0xff]  ;;  %v407_v19 = vld [vmem:[#allocation2 + $0x510] sm:$0xff] }
  0x48   :  { %1955 = vmatpush1.bf16.msra.mxu1 %v1954_v42  ;;  %1701 = vmatprep.subr.bf16.mxu0 %v1700_v43  ;;  %v385_v42 = vld [vmem:[#allocation2 + $0x460] sm:$0xff]  ;;  %v383_v43 = vld [vmem:[#allocation2 + $0x450] sm:$0xff]  ;;  %v412_v13 = vld [vmem:[#allocation2 + $0x538] sm:$0xff] }
  0x49   :  { %1957 = vmatprep.subr.bf16.mxu1 %v1956_v48  ;;  %v394_v48 = vld [vmem:[#allocation2 + $0x4a8] sm:$0xff]  ;;  %v1718_v51 = vpack.c.bf16 %v385_v42, %v381_v41  ;;  %v1974_v52 = vpack.c.bf16 %v387_v45, %v383_v43  ;;  %v409_v18 = vld [vmem:[#allocation2 + $0x520] sm:$0xff]  ;;  %v411_v20 = vld [vmem:[#allocation2 + $0x530] sm:$0xff] }
  0x4a   :  { %v1720_v53 = vpack.c.bf16 %v394_v48, %v390_v46  ;;  %v42_v28 = vld [vmem:[%s2575_s0 + $0x48] sm:$0xff]  ;;  %v416_v29 = vld [vmem:[#allocation2 + $0x558] sm:$0xff]  ;;  %v1730_v32 = vpack.c.bf16 %v409_v18, %v405_v15  ;;  %v1986_v33 = vpack.c.bf16 %v411_v20, %v407_v19  ;;  %v413_v34 = vld [vmem:[#allocation2 + $0x540] sm:$0xff] }
  0x4b   :  { %1703 = vmatpush1.bf16.msra.mxu0 %v1702_v56  ;;  %v393_v56 = vld [vmem:[#allocation2 + $0x4a0] sm:$0xff]  ;;  %v420_v30 = vld [vmem:[#allocation2 + $0x578] sm:$0xff]  ;;  %v426_v45 = vld [vmem:[#allocation2 + $0x5a8] sm:$0xff] }
  0x4c   :  { %1959 = vmatpush1.bf16.msra.mxu1 %v1958_v58  ;;  %1705 = vmatprep.subr.bf16.mxu0 %v1704_v59  ;;  %v1976_v58 = vpack.c.bf16 %v396_v50, %v392_v49  ;;  %v395_v59 = vld [vmem:[#allocation2 + $0x4b0] sm:$0xff]  ;;  %v1722_v1 = vpack.c.bf16 %v393_v56, %v389_v54  ;;  %v1988_v43 = vpack.c.bf16 %v420_v30, %v416_v29  ;;  %v50_v46 = vld [vmem:[%s2575_s0 + $0x88] sm:$0xff]  ;;  %v424_v48 = vld [vmem:[#allocation2 + $0x598] sm:$0xff] }
  0x4d   :  { %1961 = vmatprep.subr.bf16.mxu1 %v1960_v0  ;;  %v404_v0 = vld [vmem:[#allocation2 + $0x4f8] sm:$0xff]  ;;  %v1978_v2 = vpack.c.bf16 %v395_v59, %v391_v57  ;;  %v421_v56 = vld [vmem:[#allocation2 + $0x580] sm:$0xff]  ;;  %v435_v30 = vld [vmem:[#allocation2 + $0x5f0] sm:$0xff] }
  0x4e   :  { %v428_v49 = vld [vmem:[#allocation2 + $0x5b8] sm:$0xff]  ;;  %v425_v62 = vld [vmem:[#allocation2 + $0x5a0] sm:$0xff] }
  0x4f   :  { %1707 = vmatpush1.bf16.msra.mxu0 %v1706_v8  ;;  %v1980_v8 = vpack.c.bf16 %v404_v0, %v400_v63  ;;  %v423_v63 = vld [vmem:[#allocation2 + $0x590] sm:$0xff]  ;;  %v1738_v15 = vpack.c.bf16 %v425_v62, %v421_v56  ;;  %v36_v18 = vld [vmem:[%s2575_s0 + $0x18] sm:$0xff]  ;;  %v458_v62 = vld [vmem:[#allocation2 + $0x6a8] sm:$0xff] }
  0x50   :  { %1963 = vmatpush1.bf16.msra.mxu1 %v1962_v9  ;;  %1709 = vmatprep.subr.bf16.mxu0 %v1708_v10  ;;  %v403_v9 = vld [vmem:[#allocation2 + $0x4f0] sm:$0xff]  ;;  %v406_v10 = vld [vmem:[#allocation2 + $0x508] sm:$0xff] }
  0x51   :  { %1965 = vmatprep.subr.bf16.mxu1 %v1964_v14  ;;  %v1726_v14 = vpack.c.bf16 %v401_v5, %v397_v4  ;;  %v1982_v16 = vpack.c.bf16 %v403_v9, %v399_v6  ;;  %v1728_v17 = vpack.c.bf16 %v410_v11, %v406_v10  ;;  %v427_v4 = vld [vmem:[#allocation2 + $0x5b0] sm:$0xff]  ;;  %v430_v5 = vld [vmem:[#allocation2 + $0x5c8] sm:$0xff]  ;;  %v432_v10 = vld [vmem:[#allocation2 + $0x5d8] sm:$0xff] }
  0x52   :  { %v434_v6 = vld [vmem:[#allocation2 + $0x5e8] sm:$0xff]  ;;  %v436_v11 = vld [vmem:[#allocation2 + $0x5f8] sm:$0xff]  ;;  %v1994_v19 = vpack.c.bf16 %v427_v4, %v423_v63  ;;  %v447_v56 = vld [vmem:[#allocation2 + $0x650] sm:$0xff] }
  0x53   :  { %1711 = vmatpush1.bf16.msra.mxu0 %v1710_v21  ;;  %v1984_v21 = vpack.c.bf16 %v412_v13, %v408_v12  ;;  %v57_v13 = vld [vmem:[%s2575_s0 + $0xc0] sm:$0xff]  ;;  %v1740_v20 = vpack.c.bf16 %v434_v6, %v430_v5  ;;  %v1996_v29 = vpack.c.bf16 %v436_v11, %v432_v10  ;;  %v456_v63 = vld [vmem:[#allocation2 + $0x698] sm:$0xff]  ;;  %v455_v6 = vld [vmem:[#allocation2 + $0x690] sm:$0xff] }
  0x54   :  { %1967 = vmatpush1.bf16.msra.mxu1 %v1966_v24  ;;  %1713 = vmatprep.subr.bf16.mxu0 %v1712_v27  ;;  %v414_v24 = vld [vmem:[#allocation2 + $0x548] sm:$0xff]  ;;  %v453_v4 = vld [vmem:[#allocation2 + $0x680] sm:$0xff] }
  0x55   :  { %1969 = vmatprep.subr.bf16.mxu1 %v1968_v31  ;;  %v418_v27 = vld [vmem:[#allocation2 + $0x568] sm:$0xff]  ;;  %v116_v31 = vmul.f32 %v2302_v25, %v42_v28  ;;  %v457_v5 = vld [vmem:[#allocation2 + $0x6a0] sm:$0xff] }
  0x56   :  { %822 = vmatmul.mubr.f32.vlgmr.msra.gmra.mrb[0].mxu0 %v213_v35  ;;  %v1732_v37 = vpack.c.bf16 %v418_v27, %v414_v24  ;;  %v433_v24 = vld [vmem:[#allocation2 + $0x5e0] sm:$0xff]  ;;  %v431_v27 = vld [vmem:[#allocation2 + $0x5d0] sm:$0xff]  ;;  %v462_v10 = vld [vmem:[#allocation2 + $0x6c8] sm:$0xff] }
  0x57   :  { %1715 = vmatpush1.bf16.msra.mxu0 %v1714_v38  ;;  %1178 = vmatmul.mubr.f32.vlgmr.msra.gmra.mrb[0].mxu1 %v213_v35  ;;  %v41_v35 = vld [vmem:[%s2575_s0 + $0x40] sm:$0xff]  ;;  %v190_v41 = vadd.f32 %v2305_v26, %v116_v31  ;;  %v438_v31 = vld [vmem:[#allocation2 + $0x608] sm:$0xff] }
  0x58   :  { %1971 = vmatpush1.bf16.msra.mxu1 %v1970_v39  ;;  %1717 = vmatprep.subr.bf16.mxu0 %v1716_v40  ;;  %v417_v38 = vld [vmem:[#allocation2 + $0x560] sm:$0xff]  ;;  %v415_v39 = vld [vmem:[#allocation2 + $0x550] sm:$0xff]  ;;  %v115_v42 = vmul.f32 %v2311_v55, %v41_v35  ;;  %v466_v11 = vld [vmem:[#allocation2 + $0x6e8] sm:$0xff] }
  0x59   :  { %1973 = vmatprep.subr.bf16.mxu1 %v1972_v44  ;;  %v419_v40 = vld [vmem:[#allocation2 + $0x570] sm:$0xff]  ;;  %v422_v44 = vld [vmem:[#allocation2 + $0x588] sm:$0xff]  ;;  %v222_v50 = vmax.f32 %v190_v41, 0.0  ;;  %v1734_v54 = vpack.c.bf16 %v417_v38, %v413_v34  ;;  %v444_v34 = vld [vmem:[#allocation2 + $0x638] sm:$0xff]  ;;  %v1998_v38 = vpack.c.bf16 %v435_v30, %v431_v27 }
  0x5a   :  { %v1990_v59 = vpack.c.bf16 %v419_v40, %v415_v39  ;;  %v1736_v61 = vpack.c.bf16 %v426_v45, %v422_v44  ;;  %v437_v40 = vld [vmem:[#allocation2 + $0x600] sm:$0xff]  ;;  %v446_v44 = vld [vmem:[#allocation2 + $0x648] sm:$0xff] }
  0x5b   :  { %1719 = vmatpush1.bf16.msra.mxu0 %v1718_v51  ;;  %v189_v51 = vadd.f32 %v2318_v7, %v115_v42  ;;  %827 = vmatprep.mubr.f32.mxu0 %v222_v50  ;;  %v441_v41 = vld [vmem:[#allocation2 + $0x620] sm:$0xff]  ;;  %v439_v42 = vld [vmem:[#allocation2 + $0x610] sm:$0xff]  ;;  %v450_v45 = vld [vmem:[#allocation2 + $0x668] sm:$0xff] }
  0x5c   :  { %1975 = vmatpush1.bf16.msra.mxu1 %v1974_v52  ;;  %1721 = vmatprep.subr.bf16.mxu0 %v1720_v53  ;;  %v124_v52 = vmul.f32 %v2302_v25, %v50_v46  ;;  %v49_v53 = vld [vmem:[%s2575_s0 + $0x80] sm:$0xff]  ;;  %v474_v27 = vld [vmem:[#allocation2 + $0x728] sm:$0xff] }
  0x5d   :  { %1977 = vmatprep.subr.bf16.mxu1 %v1976_v58  ;;  %v123_v57 = vmul.f32 %v2311_v55, %v49_v53  ;;  %v2341_v58 = vrot.slane %v2294_v22, %v81_v36  ;;  %v221_v0 = vmax.f32 %v189_v51, 0.0  ;;  %1183 = vmatprep.mubr.f32.mxu1 %v222_v50  ;;  %v1746_v50 = vpack.c.bf16 %v441_v41, %v437_v40  ;;  %v445_v53 = vld [vmem:[#allocation2 + $0x640] sm:$0xff] }
  0x5e   :  { %v77_v40 = vsub.s32 2, %v2285_v60 }
  0x5f   :  { %1723 = vmatpush1.bf16.msra.mxu0 %v1722_v1  ;;  %v198_v1 = vadd.f32 %v2305_v26, %v124_v52  ;;  %1184 = vmatmul.mubr.f32.gmra.mrb[2].mxu1 %v221_v0  ;;  %v110_v28 = vmul.f32 %v2341_v58, %v36_v18  ;;  %v1748_v52 = vpack.c.bf16 %v450_v45, %v446_v44  ;;  %v465_v18 = vld [vmem:[#allocation2 + $0x6e0] sm:$0xff]  ;;  %v479_v45 = vld [vmem:[#allocation2 + $0x750] sm:$0xff] }
  0x60   :  { %1979 = vmatpush1.bf16.msra.mxu1 %v1978_v2  ;;  %1725 = vmatprep.subr.bf16.mxu0 %v1724_v3  ;;  %v58_v2 = vld [vmem:[%s2575_s0 + $0xc8] sm:$0xff]  ;;  %v1992_v3 = vpack.c.bf16 %v428_v49, %v424_v48  ;;  %v448_v48 = vld [vmem:[#allocation2 + $0x658] sm:$0xff]  ;;  %v481_v44 = vld [vmem:[#allocation2 + $0x760] sm:$0xff] }
  0x61   :  { %1981 = vmatprep.subr.bf16.mxu1 %v1980_v8  ;;  %v197_v8 = vadd.f32 %v2318_v7, %v123_v57  ;;  %v132_v9 = vmul.f32 %v2302_v25, %v58_v2  ;;  %828 = vmatmul.mubr.f32.gmra.mrb[2].mxu0 %v221_v0  ;;  %v230_v12 = vmax.f32 %v198_v1, 0.0  ;;  %v131_v25 = vmul.f32 %v2311_v55, %v57_v13  ;;  %v452_v49 = vld [vmem:[#allocation2 + $0x678] sm:$0xff] }
  0x62   :  { %v2004_v57 = vpack.c.bf16 %v452_v49, %v448_v48  ;;  %v460_v0 = vld [vmem:[#allocation2 + $0x6b8] sm:$0xff]  ;;  %v483_v48 = vld [vmem:[#allocation2 + $0x770] sm:$0xff]  ;;  %v486_v49 = vld [vmem:[#allocation2 + $0x788] sm:$0xff] }
  0x63   :  { %1727 = vmatpush1.bf16.msra.mxu0 %v1726_v14  ;;  %v2353_v14 = vrot.slane %v2299_v23, %v81_v36  ;;  %833 = vmatprep.mubr.f32.mxu0 %v230_v12  ;;  %v468_v13 = vld [vmem:[#allocation2 + $0x6f8] sm:$0xff] }
  0x64   :  { %1983 = vmatpush1.bf16.msra.mxu1 %v1982_v16  ;;  %1729 = vmatprep.subr.bf16.mxu0 %v1728_v17  ;;  %v229_v16 = vmax.f32 %v197_v8, 0.0  ;;  %v206_v17 = vadd.f32 %v2305_v26, %v132_v9  ;;  %v442_v26 = vld [vmem:[#allocation2 + $0x628] sm:$0xff]  ;;  %v2008_v8 = vpack.c.bf16 %v460_v0, %v456_v63  ;;  %v459_v9 = vld [vmem:[#allocation2 + $0x6b0] sm:$0xff] }
  0x65   :  { %1985 = vmatprep.subr.bf16.mxu1 %v1984_v21  ;;  %v429_v21 = vld [vmem:[#allocation2 + $0x5c0] sm:$0xff]  ;;  %1189 = vmatprep.mubr.f32.mxu1 %v230_v12  ;;  %v184_v35 = vadd.f32 %v2353_v14, %v110_v28  ;;  %v1744_v39 = vpack.c.bf16 %v442_v26, %v438_v31  ;;  %v464_v12 = vld [vmem:[#allocation2 + $0x6d8] sm:$0xff]  ;;  %v487_v63 = vld [vmem:[#allocation2 + $0x790] sm:$0xff] }
  0x66   :  { %v238_v55 = vmax.f32 %v206_v17, 0.0  ;;  %834 = vmatmul.mubr.f32.gmra.mrb[4].mxu0 %v229_v16  ;;  %v1742_v36 = vpack.c.bf16 %v433_v24, %v429_v21  ;;  %1190 = vmatmul.mubr.f32.gmra.mrb[4].mxu1 %v229_v16  ;;  %v2010_v16 = vpack.c.bf16 %v459_v9, %v455_v6  ;;  %v1756_v17 = vpack.c.bf16 %v466_v11, %v462_v10  ;;  %v467_v21 = vld [vmem:[#allocation2 + $0x6f0] sm:$0xff]  ;;  %v470_v24 = vld [vmem:[#allocation2 + $0x708] sm:$0xff]  ;;  %v472_v28 = vld [vmem:[#allocation2 + $0x718] sm:$0xff] }
  0x67   :  { %1731 = vmatpush1.bf16.msra.mxu0 %v1730_v32  ;;  %v205_v32 = vadd.f32 %v2318_v7, %v131_v25  ;;  %v443_v7 = vld [vmem:[#allocation2 + $0x630] sm:$0xff]  ;;  %v216_v46 = vmax.f32 %v184_v35, 0.0  ;;  %v461_v25 = vld [vmem:[#allocation2 + $0x6c0] sm:$0xff]  ;;  %v1760_v26 = vpack.c.bf16 %v474_v27, %v470_v24 }
  0x68   :  { %1987 = vmatpush1.bf16.msra.mxu1 %v1986_v33  ;;  %1733 = vmatprep.subr.bf16.mxu0 %v1732_v37  ;;  %v440_v33 = vld [vmem:[#allocation2 + $0x618] sm:$0xff]  ;;  %v2002_v51 = vpack.c.bf16 %v443_v7, %v439_v42  ;;  %v1758_v30 = vpack.c.bf16 %v465_v18, %v461_v25  ;;  %v475_v35 = vld [vmem:[#allocation2 + $0x730] sm:$0xff]  ;;  %v477_v7 = vld [vmem:[#allocation2 + $0x740] sm:$0xff] }
  0x69   :  { %1989 = vmatprep.subr.bf16.mxu1 %v1988_v43  ;;  %v237_v37 = vmax.f32 %v205_v32, 0.0  ;;  %v2000_v43 = vpack.c.bf16 %v444_v34, %v440_v33  ;;  %839 = vmatprep.mubr.f32.mxu0 %v238_v55  ;;  %v473_v32 = vld [vmem:[#allocation2 + $0x720] sm:$0xff]  ;;  %v471_v33 = vld [vmem:[#allocation2 + $0x710] sm:$0xff]  ;;  %v502_v25 = vld [vmem:[#allocation2 + $0x808] sm:$0xff] }
  0x6a   :  { %1195 = vmatprep.mubr.f32.mxu1 %v238_v55  ;;  %v469_v55 = vld [vmem:[#allocation2 + $0x700] sm:$0xff]  ;;  %v2018_v42 = vpack.c.bf16 %v475_v35, %v471_v33  ;;  %v506_v18 = vld [vmem:[#allocation2 + $0x828] sm:$0xff] }
  0x6b   :  { %1735 = vmatpush1.bf16.msra.mxu0 %v1734_v54  ;;  %1196 = vmatmul.mubr.f32.gmra.mrb[6].mxu1 %v237_v37  ;;  %v449_v54 = vld [vmem:[#allocation2 + $0x660] sm:$0xff]  ;;  %v1762_v41 = vpack.c.bf16 %v473_v32, %v469_v55  ;;  %v43_v32 = vld [vmem:[%s2575_s0 + $0x50] sm:$0xff]  ;;  %v510_v35 = vld [vmem:[#allocation2 + $0x848] sm:$0xff] }
  0x6c   :  { %1991 = vmatpush1.bf16.msra.mxu1 %v1990_v59  ;;  %1737 = vmatprep.subr.bf16.mxu0 %v1736_v61  ;;  %v451_v59 = vld [vmem:[#allocation2 + $0x670] sm:$0xff]  ;;  %v454_v61 = vld [vmem:[#allocation2 + $0x688] sm:$0xff]  ;;  %v1750_v1 = vpack.c.bf16 %v449_v54, %v445_v53  ;;  %v2365_v53 = vrot.slane %v2294_v22, %v77_v40  ;;  %v1766_v54 = vpack.c.bf16 %v481_v44, %v477_v7  ;;  %v501_v27 = vld [vmem:[#allocation2 + $0x800] sm:$0xff] }
  0x6d   :  { %1993 = vmatprep.subr.bf16.mxu1 %v1992_v3  ;;  %840 = vmatmul.mubr.f32.gmra.mrb[6].mxu0 %v237_v37  ;;  %v2006_v2 = vpack.c.bf16 %v451_v59, %v447_v56  ;;  %v1752_v3 = vpack.c.bf16 %v458_v62, %v454_v61  ;;  %v482_v37 = vld [vmem:[#allocation2 + $0x768] sm:$0xff]  ;;  %v35_v56 = vld [vmem:[%s2575_s0 + $0x10] sm:$0xff]  ;;  %v485_v61 = vld [vmem:[#allocation2 + $0x780] sm:$0xff] }
  0x6e   :  { %910 = vmatprep.mubr.f32.mxu0 %v216_v46  ;;  %1266 = vmatprep.mubr.f32.mxu1 %v216_v46  ;;  %v489_v62 = vld [vmem:[#allocation2 + $0x7a0] sm:$0xff]  ;;  %v109_v6 = vmul.f32 %v2365_v53, %v35_v56 }
  0x6f   :  { %1739 = vmatpush1.bf16.msra.mxu0 %v1738_v15  ;;  %v1754_v15 = vpack.c.bf16 %v457_v5, %v453_v4  ;;  %v496_v4 = vld [vmem:[#allocation2 + $0x7d8] sm:$0xff]  ;;  %v1770_v9 = vpack.c.bf16 %v489_v62, %v485_v61  ;;  %v509_v44 = vld [vmem:[#allocation2 + $0x840] sm:$0xff] }
  0x70   :  { %1995 = vmatpush1.bf16.msra.mxu1 %v1994_v19  ;;  %1741 = vmatprep.subr.bf16.mxu0 %v1740_v20  ;;  %v463_v19 = vld [vmem:[#allocation2 + $0x6d0] sm:$0xff]  ;;  %v2012_v20 = vpack.c.bf16 %v468_v13, %v464_v12  ;;  %v500_v5 = vld [vmem:[#allocation2 + $0x7f8] sm:$0xff]  ;;  %v493_v12 = vld [vmem:[#allocation2 + $0x7c0] sm:$0xff] }
  0x71   :  { %1997 = vmatprep.subr.bf16.mxu1 %v1996_v29  ;;  %v476_v29 = vld [vmem:[#allocation2 + $0x738] sm:$0xff]  ;;  %v2014_v31 = vpack.c.bf16 %v467_v21, %v463_v19  ;;  %v497_v13 = vld [vmem:[#allocation2 + $0x7e0] sm:$0xff] }
  0x72   :  { %v2016_v34 = vpack.c.bf16 %v476_v29, %v472_v28  ;;  %v504_v19 = vld [vmem:[#allocation2 + $0x818] sm:$0xff]  ;;  %v1774_v24 = vpack.c.bf16 %v497_v13, %v493_v12 }
  0x73   :  { %1743 = vmatpush1.bf16.msra.mxu0 %v1742_v36  ;;  %v478_v36 = vld [vmem:[#allocation2 + $0x748] sm:$0xff]  ;;  %v44_v28 = vld [vmem:[%s2575_s0 + $0x58] sm:$0xff] }
  0x74   :  { %1999 = vmatpush1.bf16.msra.mxu1 %v1998_v38  ;;  %1745 = vmatprep.subr.bf16.mxu0 %v1744_v39  ;;  %v480_v38 = vld [vmem:[#allocation2 + $0x758] sm:$0xff]  ;;  %v118_v55 = vmul.f32 %v2341_v58, %v44_v28 }
  0x75   :  { %2001 = vmatprep.subr.bf16.mxu1 %v2000_v43  ;;  %v484_v39 = vld [vmem:[#allocation2 + $0x778] sm:$0xff]  ;;  %v1764_v43 = vpack.c.bf16 %v482_v37, %v478_v36  ;;  %v514_v36 = vld [vmem:[#allocation2 + $0x868] sm:$0xff]  ;;  %v117_v37 = vmul.f32 %v2365_v53, %v43_v32  ;;  %v529_v32 = vld [vmem:[#allocation2 + $0x8e0] sm:$0xff] }
  0x76   :  { %v2020_v46 = vpack.c.bf16 %v484_v39, %v480_v38  ;;  %v512_v39 = vld [vmem:[#allocation2 + $0x858] sm:$0xff] }
  0x77   :  { %1747 = vmatpush1.bf16.msra.mxu0 %v1746_v50  ;;  %v490_v50 = vld [vmem:[#allocation2 + $0x7a8] sm:$0xff]  ;;  %v532_v28 = vld [vmem:[#allocation2 + $0x8f8] sm:$0xff] }
  0x78   :  { %2003 = vmatpush1.bf16.msra.mxu1 %v2002_v51  ;;  %1749 = vmatprep.subr.bf16.mxu0 %v1748_v52  ;;  %v488_v51 = vld [vmem:[#allocation2 + $0x798] sm:$0xff]  ;;  %v1768_v59 = vpack.c.bf16 %v490_v50, %v486_v49  ;;  %v1780_v50 = vpack.c.bf16 %v514_v36, %v510_v35  ;;  %v534_v35 = vld [vmem:[#allocation2 + $0x908] sm:$0xff] }
  0x79   :  { %2005 = vmatprep.subr.bf16.mxu1 %v2004_v57  ;;  %v492_v52 = vld [vmem:[#allocation2 + $0x7b8] sm:$0xff]  ;;  %v2022_v57 = vpack.c.bf16 %v483_v48, %v479_v45  ;;  %v513_v45 = vld [vmem:[#allocation2 + $0x860] sm:$0xff]  ;;  %v538_v36 = vld [vmem:[#allocation2 + $0x928] sm:$0xff] }
  0x7a   :  { %v2024_v0 = vpack.c.bf16 %v492_v52, %v488_v51  ;;  %v511_v51 = vld [vmem:[#allocation2 + $0x850] sm:$0xff] }
  0x7b   :  { %1751 = vmatpush1.bf16.msra.mxu0 %v1750_v1  ;;  %v491_v1 = vld [vmem:[#allocation2 + $0x7b0] sm:$0xff] }
  0x7c   :  { %2007 = vmatpush1.bf16.msra.mxu1 %v2006_v2  ;;  %1753 = vmatprep.subr.bf16.mxu0 %v1752_v3  ;;  %v494_v2 = vld [vmem:[#allocation2 + $0x7c8] sm:$0xff]  ;;  %v2026_v10 = vpack.c.bf16 %v491_v1, %v487_v63  ;;  %v515_v52 = vld [vmem:[#allocation2 + $0x870] sm:$0xff]  ;;  %v520_v1 = vld [vmem:[#allocation2 + $0x898] sm:$0xff] }
  0x7d   :  { %2009 = vmatprep.subr.bf16.mxu1 %v2008_v8  ;;  %v498_v3 = vld [vmem:[#allocation2 + $0x7e8] sm:$0xff]  ;;  %v2372_v8 = vrot.slane %v2299_v23, %v77_v40  ;;  %v516_v40 = vld [vmem:[#allocation2 + $0x878] sm:$0xff]  ;;  %v2038_v12 = vpack.c.bf16 %v515_v52, %v511_v51 }
  0x7e   :  { %v1772_v11 = vpack.c.bf16 %v498_v3, %v494_v2  ;;  %v2036_v56 = vpack.c.bf16 %v516_v40, %v512_v39  ;;  %v524_v2 = vld [vmem:[#allocation2 + $0x8b8] sm:$0xff] }
  0x7f   :  { %1755 = vmatpush1.bf16.msra.mxu0 %v1754_v15  ;;  %v495_v15 = vld [vmem:[#allocation2 + $0x7d0] sm:$0xff]  ;;  %v183_v21 = vadd.f32 %v2372_v8, %v109_v6  ;;  %v1782_v6 = vpack.c.bf16 %v513_v45, %v509_v44  ;;  %v540_v39 = vld [vmem:[#allocation2 + $0x938] sm:$0xff]  ;;  %v537_v44 = vld [vmem:[#allocation2 + $0x920] sm:$0xff] }
  0x80   :  { %2011 = vmatpush1.bf16.msra.mxu1 %v2010_v16  ;;  %1757 = vmatprep.subr.bf16.mxu0 %v1756_v17  ;;  %v2028_v16 = vpack.c.bf16 %v500_v5, %v496_v4  ;;  %v499_v17 = vld [vmem:[#allocation2 + $0x7f0] sm:$0xff]  ;;  %v544_v52 = vld [vmem:[#allocation2 + $0x958] sm:$0xff] }
  0x81   :  { %2013 = vmatprep.subr.bf16.mxu1 %v2012_v20  ;;  %v508_v20 = vld [vmem:[#allocation2 + $0x838] sm:$0xff]  ;;  %v2030_v29 = vpack.c.bf16 %v499_v17, %v495_v15  ;;  %v215_v38 = vmax.f32 %v183_v21, 0.0  ;;  %v521_v15 = vld [vmem:[#allocation2 + $0x8a0] sm:$0xff]  ;;  %v2040_v17 = vpack.c.bf16 %v524_v2, %v520_v1  ;;  %v38_v21 = vld [vmem:[%s2575_s0 + $0x28] sm:$0xff] }
  0x82   :  { %v2032_v33 = vpack.c.bf16 %v508_v20, %v504_v19  ;;  %v535_v45 = vld [vmem:[#allocation2 + $0x910] sm:$0xff]  ;;  %v550_v2 = vld [vmem:[#allocation2 + $0x988] sm:$0xff] }
  0x83   :  { %1759 = vmatpush1.bf16.msra.mxu0 %v1758_v30  ;;  %v1776_v30 = vpack.c.bf16 %v506_v18, %v502_v25  ;;  %v526_v25 = vld [vmem:[#allocation2 + $0x8c8] sm:$0xff]  ;;  %v547_v1 = vld [vmem:[#allocation2 + $0x970] sm:$0xff] }
  0x84   :  { %2015 = vmatpush1.bf16.msra.mxu1 %v2014_v31  ;;  %1761 = vmatprep.subr.bf16.mxu0 %v1760_v26  ;;  %v505_v31 = vld [vmem:[#allocation2 + $0x820] sm:$0xff]  ;;  %v503_v26 = vld [vmem:[#allocation2 + $0x810] sm:$0xff]  ;;  %v530_v18 = vld [vmem:[#allocation2 + $0x8e8] sm:$0xff] }
  0x85   :  { %2017 = vmatprep.subr.bf16.mxu1 %v2016_v34  ;;  %v507_v34 = vld [vmem:[#allocation2 + $0x830] sm:$0xff]  ;;  %v1778_v7 = vpack.c.bf16 %v505_v31, %v501_v27  ;;  %v528_v27 = vld [vmem:[#allocation2 + $0x8d8] sm:$0xff] }
  0x86   :  { %v2034_v49 = vpack.c.bf16 %v507_v34, %v503_v26  ;;  %v1788_v26 = vpack.c.bf16 %v530_v18, %v526_v25  ;;  %v531_v34 = vld [vmem:[#allocation2 + $0x8f0] sm:$0xff]  ;;  %v560_v25 = vld [vmem:[#allocation2 + $0x9d8] sm:$0xff] }
  0x87   :  { %1763 = vmatpush1.bf16.msra.mxu0 %v1762_v41  ;;  %v192_v41 = vadd.f32 %v2353_v14, %v118_v55  ;;  %v525_v55 = vld [vmem:[#allocation2 + $0x8c0] sm:$0xff]  ;;  %v564_v18 = vld [vmem:[#allocation2 + $0x9f8] sm:$0xff] }
  0x88   :  { %2019 = vmatpush1.bf16.msra.mxu1 %v2018_v42  ;;  %1765 = vmatprep.subr.bf16.mxu0 %v1764_v43  ;;  %v52_v42 = vld [vmem:[%s2575_s0 + $0x98] sm:$0xff]  ;;  %v89_v43 = vsub.s32 5, %v2285_v60 }
  0x89   :  { %2021 = vmatprep.subr.bf16.mxu1 %v2020_v46  ;;  %v191_v46 = vadd.f32 %v2372_v8, %v117_v37  ;;  %v126_v48 = vmul.f32 %v2341_v58, %v52_v42  ;;  %v224_v61 = vmax.f32 %v192_v41, 0.0  ;;  %v1790_v41 = vpack.c.bf16 %v529_v32, %v525_v55  ;;  %v572_v55 = vld [vmem:[#allocation2 + $0xa38] sm:$0xff] }
  0x8a   :  { %v2400_v5 = vrot.slane %v2294_v22, %v89_v43 }
  0x8b   :  { %1767 = vmatpush1.bf16.msra.mxu0 %v1766_v54  ;;  %v51_v54 = vld [vmem:[%s2575_s0 + $0x90] sm:$0xff]  ;;  %v200_v62 = vadd.f32 %v2353_v14, %v126_v48  ;;  %v223_v3 = vmax.f32 %v191_v46, 0.0 }
  0x8c   :  { %2023 = vmatpush1.bf16.msra.mxu1 %v2022_v57  ;;  %1769 = vmatprep.subr.bf16.mxu0 %v1768_v59  ;;  %v518_v57 = vld [vmem:[#allocation2 + $0x888] sm:$0xff]  ;;  %v125_v63 = vmul.f32 %v2365_v53, %v51_v54  ;;  %v539_v48 = vld [vmem:[#allocation2 + $0x930] sm:$0xff]  ;;  %v548_v54 = vld [vmem:[#allocation2 + $0x978] sm:$0xff] }
  0x8d   :  { %2025 = vmatprep.subr.bf16.mxu1 %v2024_v0  ;;  %v522_v59 = vld [vmem:[#allocation2 + $0x8a8] sm:$0xff]  ;;  %v60_v0 = vld [vmem:[%s2575_s0 + $0xd8] sm:$0xff]  ;;  %v232_v19 = vmax.f32 %v200_v62, 0.0  ;;  %v545_v62 = vld [vmem:[#allocation2 + $0x960] sm:$0xff] }
  0x8e   :  { %v134_v4 = vmul.f32 %v2341_v58, %v60_v0  ;;  %v1784_v13 = vpack.c.bf16 %v522_v59, %v518_v57  ;;  %v523_v58 = vld [vmem:[#allocation2 + $0x8b0] sm:$0xff]  ;;  %v2050_v57 = vpack.c.bf16 %v539_v48, %v535_v45  ;;  %v2052_v0 = vpack.c.bf16 %v548_v54, %v544_v52  ;;  %v577_v45 = vld [vmem:[#allocation2 + $0xa60] sm:$0xff]  ;;  %v584_v52 = vld [vmem:[#allocation2 + $0xa98] sm:$0xff] }
  0x8f   :  { %1771 = vmatpush1.bf16.msra.mxu0 %v1770_v9  ;;  %v517_v9 = vld [vmem:[#allocation2 + $0x880] sm:$0xff]  ;;  %v588_v54 = vld [vmem:[#allocation2 + $0xab8] sm:$0xff] }
  0x90   :  { %2027 = vmatpush1.bf16.msra.mxu1 %v2026_v10  ;;  %1773 = vmatprep.subr.bf16.mxu0 %v1772_v11  ;;  %v199_v10 = vadd.f32 %v2372_v8, %v125_v63  ;;  %v59_v11 = vld [vmem:[%s2575_s0 + $0xd0] sm:$0xff]  ;;  %v208_v20 = vadd.f32 %v2353_v14, %v134_v4  ;;  %v1786_v31 = vpack.c.bf16 %v521_v15, %v517_v9  ;;  %v552_v4 = vld [vmem:[#allocation2 + $0x998] sm:$0xff] }
  0x91   :  { %2029 = vmatprep.subr.bf16.mxu1 %v2028_v16  ;;  %v519_v16 = vld [vmem:[#allocation2 + $0x890] sm:$0xff]  ;;  %v133_v22 = vmul.f32 %v2365_v53, %v59_v11 }
  0x92   :  { %v231_v53 = vmax.f32 %v199_v10, 0.0  ;;  %v2042_v14 = vpack.c.bf16 %v523_v58, %v519_v16  ;;  %v240_v37 = vmax.f32 %v208_v20, 0.0  ;;  %v543_v63 = vld [vmem:[#allocation2 + $0x950] sm:$0xff] }
  0x93   :  { %1775 = vmatpush1.bf16.msra.mxu0 %v1774_v24  ;;  %v2412_v24 = vrot.slane %v2299_v23, %v89_v43  ;;  %v527_v23 = vld [vmem:[#allocation2 + $0x8d0] sm:$0xff]  ;;  %v1792_v43 = vpack.c.bf16 %v538_v36, %v534_v35  ;;  %v2054_v10 = vpack.c.bf16 %v547_v1, %v543_v63  ;;  %v569_v35 = vld [vmem:[#allocation2 + $0xa20] sm:$0xff] }
  0x94   :  { %2031 = vmatpush1.bf16.msra.mxu1 %v2030_v29  ;;  %1777 = vmatprep.subr.bf16.mxu0 %v1776_v30  ;;  %v207_v29 = vadd.f32 %v2372_v8, %v133_v22  ;;  %v112_v30 = vmul.f32 %v2400_v5, %v38_v21  ;;  %v2046_v42 = vpack.c.bf16 %v531_v34, %v527_v23  ;;  %v551_v15 = vld [vmem:[#allocation2 + $0x990] sm:$0xff]  ;;  %v558_v22 = vld [vmem:[#allocation2 + $0x9c8] sm:$0xff]  ;;  %v565_v34 = vld [vmem:[#allocation2 + $0xa00] sm:$0xff] }
  0x95   :  { %2033 = vmatprep.subr.bf16.mxu1 %v2032_v33  ;;  %v2044_v33 = vpack.c.bf16 %v532_v28, %v528_v27  ;;  %v555_v58 = vld [vmem:[#allocation2 + $0x9b0] sm:$0xff]  ;;  %v557_v27 = vld [vmem:[#allocation2 + $0x9c0] sm:$0xff] }
  0x96   :  { %911 = vmatmul.mubr.f32.vlgmr.msra.gmra.mrb[0].mxu0 %v215_v38  ;;  %v186_v8 = vadd.f32 %v2412_v24, %v112_v30  ;;  %v239_v40 = vmax.f32 %v207_v29, 0.0  ;;  %v2058_v20 = vpack.c.bf16 %v555_v58, %v551_v15  ;;  %v561_v28 = vld [vmem:[#allocation2 + $0x9e0] sm:$0xff]  ;;  %v2060_v29 = vpack.c.bf16 %v564_v18, %v560_v25  ;;  %v563_v30 = vld [vmem:[#allocation2 + $0x9f0] sm:$0xff]  ;;  %v600_v25 = vld [vmem:[#allocation2 + $0xb18] sm:$0xff] }
  0x97   :  { %1779 = vmatpush1.bf16.msra.mxu0 %v1778_v7  ;;  %1267 = vmatmul.mubr.f32.vlgmr.msra.gmra.mrb[0].mxu1 %v215_v38  ;;  %v536_v38 = vld [vmem:[#allocation2 + $0x918] sm:$0xff]  ;;  %v533_v7 = vld [vmem:[#allocation2 + $0x900] sm:$0xff]  ;;  %v1806_v32 = vpack.c.bf16 %v561_v28, %v557_v27  ;;  %v567_v36 = vld [vmem:[#allocation2 + $0xa10] sm:$0xff] }
  0x98   :  { %2035 = vmatpush1.bf16.msra.mxu1 %v2034_v49  ;;  %1781 = vmatprep.subr.bf16.mxu0 %v1780_v50  ;;  %v2048_v46 = vpack.c.bf16 %v540_v39, %v536_v38  ;;  %v542_v49 = vld [vmem:[#allocation2 + $0x948] sm:$0xff]  ;;  %v218_v51 = vmax.f32 %v186_v8, 0.0  ;;  %v571_v8 = vld [vmem:[#allocation2 + $0xa30] sm:$0xff]  ;;  %v604_v18 = vld [vmem:[#allocation2 + $0xb38] sm:$0xff] }
  0x99   :  { %2037 = vmatprep.subr.bf16.mxu1 %v2036_v56  ;;  %916 = vmatprep.mubr.f32.mxu0 %v224_v61  ;;  %v546_v50 = vld [vmem:[#allocation2 + $0x968] sm:$0xff]  ;;  %v1794_v56 = vpack.c.bf16 %v537_v44, %v533_v7  ;;  %v573_v44 = vld [vmem:[#allocation2 + $0xa40] sm:$0xff]  ;;  %v583_v63 = vld [vmem:[#allocation2 + $0xa90] sm:$0xff] }
  0x9a   :  { %1272 = vmatprep.mubr.f32.mxu1 %v224_v61  ;;  %917 = vmatmul.mubr.f32.gmra.mrb[2].mxu0 %v223_v3  ;;  %v1796_v59 = vpack.c.bf16 %v546_v50, %v542_v49  ;;  %v541_v61 = vld [vmem:[#allocation2 + $0x940] sm:$0xff]  ;;  %v574_v38 = vld [vmem:[#allocation2 + $0xa48] sm:$0xff]  ;;  %v579_v49 = vld [vmem:[#allocation2 + $0xa70] sm:$0xff] }
  0x9b   :  { %1783 = vmatpush1.bf16.msra.mxu0 %v1782_v6  ;;  %1273 = vmatmul.mubr.f32.gmra.mrb[2].mxu1 %v223_v3  ;;  %v554_v3 = vld [vmem:[#allocation2 + $0x9a8] sm:$0xff]  ;;  %v556_v6 = vld [vmem:[#allocation2 + $0x9b8] sm:$0xff]  ;;  %v1798_v9 = vpack.c.bf16 %v545_v62, %v541_v61  ;;  %v581_v61 = vld [vmem:[#allocation2 + $0xa80] sm:$0xff] }
  0x9c   :  { %2039 = vmatpush1.bf16.msra.mxu1 %v2038_v12  ;;  %1785 = vmatprep.subr.bf16.mxu0 %v1784_v13  ;;  %v1800_v11 = vpack.c.bf16 %v554_v3, %v550_v2  ;;  %v549_v12 = vld [vmem:[#allocation2 + $0x980] sm:$0xff]  ;;  %v2056_v16 = vpack.c.bf16 %v556_v6, %v552_v4  ;;  %v578_v39 = vld [vmem:[#allocation2 + $0xa68] sm:$0xff]  ;;  %v587_v1 = vld [vmem:[#allocation2 + $0xab0] sm:$0xff] }
  0x9d   :  { %2041 = vmatprep.subr.bf16.mxu1 %v2040_v17  ;;  %922 = vmatprep.mubr.f32.mxu0 %v232_v19  ;;  %v553_v13 = vld [vmem:[#allocation2 + $0x9a0] sm:$0xff]  ;;  %v562_v17 = vld [vmem:[#allocation2 + $0x9e8] sm:$0xff]  ;;  %v1812_v7 = vpack.c.bf16 %v578_v39, %v574_v38  ;;  %v592_v4 = vld [vmem:[#allocation2 + $0xad8] sm:$0xff] }
  0x9e   :  { %1278 = vmatprep.mubr.f32.mxu1 %v232_v19  ;;  %923 = vmatmul.mubr.f32.gmra.mrb[4].mxu0 %v231_v53  ;;  %v1802_v19 = vpack.c.bf16 %v553_v13, %v549_v12  ;;  %v1804_v21 = vpack.c.bf16 %v562_v17, %v558_v22  ;;  %v582_v50 = vld [vmem:[#allocation2 + $0xa88] sm:$0xff]  ;;  %v585_v62 = vld [vmem:[#allocation2 + $0xaa0] sm:$0xff]  ;;  %v596_v6 = vld [vmem:[#allocation2 + $0xaf8] sm:$0xff] }
  0x9f   :  { %1787 = vmatpush1.bf16.msra.mxu0 %v1786_v31  ;;  %1279 = vmatmul.mubr.f32.gmra.mrb[4].mxu1 %v231_v53  ;;  %v559_v53 = vld [vmem:[#allocation2 + $0x9d0] sm:$0xff]  ;;  %v566_v31 = vld [vmem:[#allocation2 + $0xa08] sm:$0xff]  ;;  %v589_v12 = vld [vmem:[#allocation2 + $0xac0] sm:$0xff] }
  0xa0   :  { %2043 = vmatpush1.bf16.msra.mxu1 %v2042_v14  ;;  %1789 = vmatprep.subr.bf16.mxu0 %v1788_v26  ;;  %v570_v14 = vld [vmem:[#allocation2 + $0xa28] sm:$0xff]  ;;  %v568_v26 = vld [vmem:[#allocation2 + $0xa18] sm:$0xff]  ;;  %v2062_v23 = vpack.c.bf16 %v563_v30, %v559_v53  ;;  %v593_v13 = vld [vmem:[#allocation2 + $0xae0] sm:$0xff] }
  0xa1   :  { %2045 = vmatprep.subr.bf16.mxu1 %v2044_v33  ;;  %928 = vmatprep.mubr.f32.mxu0 %v240_v37  ;;  %v1808_v33 = vpack.c.bf16 %v570_v14, %v566_v31  ;;  %v590_v2 = vld [vmem:[#allocation2 + $0xac8] sm:$0xff]  ;;  %v591_v15 = vld [vmem:[#allocation2 + $0xad0] sm:$0xff]  ;;  %v597_v27 = vld [vmem:[#allocation2 + $0xb00] sm:$0xff] }
  0xa2   :  { %1284 = vmatprep.mubr.f32.mxu1 %v240_v37  ;;  %929 = vmatmul.mubr.f32.gmra.mrb[6].mxu0 %v239_v40  ;;  %v2064_v37 = vpack.c.bf16 %v572_v55, %v568_v26  ;;  %v594_v3 = vld [vmem:[#allocation2 + $0xae8] sm:$0xff]  ;;  %v595_v58 = vld [vmem:[#allocation2 + $0xaf0] sm:$0xff]  ;;  %v601_v28 = vld [vmem:[#allocation2 + $0xb20] sm:$0xff] }
  0xa3   :  { %1791 = vmatpush1.bf16.msra.mxu0 %v1790_v41  ;;  %1285 = vmatmul.mubr.f32.gmra.mrb[6].mxu1 %v239_v40  ;;  %v576_v40 = vld [vmem:[#allocation2 + $0xa58] sm:$0xff]  ;;  %v598_v22 = vld [vmem:[#allocation2 + $0xb08] sm:$0xff]  ;;  %v599_v53 = vld [vmem:[#allocation2 + $0xb10] sm:$0xff] }
  0xa4   :  { %2047 = vmatpush1.bf16.msra.mxu1 %v2046_v42  ;;  %1793 = vmatprep.subr.bf16.mxu0 %v1792_v43  ;;  %v580_v41 = vld [vmem:[#allocation2 + $0xa78] sm:$0xff]  ;;  %v1810_v42 = vpack.c.bf16 %v569_v35, %v565_v34  ;;  %v2066_v43 = vpack.c.bf16 %v571_v8, %v567_v36  ;;  %v602_v17 = vld [vmem:[#allocation2 + $0xb28] sm:$0xff]  ;;  %v603_v30 = vld [vmem:[#allocation2 + $0xb30] sm:$0xff] }
  0xa5   :  { %2049 = vmatprep.subr.bf16.mxu1 %v2048_v46  ;;  %999 = vmatprep.mubr.f32.mxu0 %v218_v51  ;;  %v575_v46 = vld [vmem:[#allocation2 + $0xa50] sm:$0xff]  ;;  %v2068_v48 = vpack.c.bf16 %v580_v41, %v576_v40  ;;  %v606_v31 = vld [vmem:[#allocation2 + $0xb48] sm:$0xff]  ;;  %v608_v26 = vld [vmem:[#allocation2 + $0xb58] sm:$0xff] }
  0xa6   :  { %1355 = vmatprep.mubr.f32.mxu1 %v218_v51  ;;  %v586_v51 = vld [vmem:[#allocation2 + $0xaa8] sm:$0xff]  ;;  %v612_v55 = vld [vmem:[#allocation2 + $0xb78] sm:$0xff]  ;;  %v605_v35 = vld [vmem:[#allocation2 + $0xb40] sm:$0xff] }
  0xa7   :  { %1795 = vmatpush1.bf16.msra.mxu0 %v1794_v56  ;;  %v1814_v56 = vpack.c.bf16 %v577_v45, %v573_v44  ;;  %v610_v14 = vld [vmem:[#allocation2 + $0xb68] sm:$0xff]  ;;  %v609_v36 = vld [vmem:[#allocation2 + $0xb60] sm:$0xff]  ;;  %v2084_v8 = vpack.c.bf16 %v612_v55, %v608_v26  ;;  %v611_v38 = vld [vmem:[#allocation2 + $0xb70] sm:$0xff] }
  0xa8   :  { %2051 = vmatpush1.bf16.msra.mxu1 %v2050_v57  ;;  %1797 = vmatprep.subr.bf16.mxu0 %v1796_v59  ;;  %v2070_v57 = vpack.c.bf16 %v579_v49, %v575_v46  ;;  %v1816_v59 = vpack.c.bf16 %v586_v51, %v582_v50  ;;  %v1828_v34 = vpack.c.bf16 %v610_v14, %v606_v31  ;;  %v614_v39 = vld [vmem:[#allocation2 + $0xb88] sm:$0xff]  ;;  %v616_v41 = vld [vmem:[#allocation2 + $0xb98] sm:$0xff]  ;;  %v37_v45 = vld [vmem:[%s2575_s0 + $0x20] sm:$0xff]  ;;  %v97_v31 = vsub.s32 7, %v2285_v60 }
  0xa9   :  { %2053 = vmatprep.subr.bf16.mxu1 %v2052_v0  ;;  %v2072_v0 = vpack.c.bf16 %v588_v54, %v584_v52  ;;  %v618_v40 = vld [vmem:[#allocation2 + $0xba8] sm:$0xff]  ;;  %v1830_v44 = vpack.c.bf16 %v609_v36, %v605_v35  ;;  %v613_v49 = vld [vmem:[#allocation2 + $0xb80] sm:$0xff]  ;;  %v615_v51 = vld [vmem:[#allocation2 + $0xb90] sm:$0xff] }
  0xaa   :  { %v617_v50 = vld [vmem:[#allocation2 + $0xba0] sm:$0xff]  ;;  %v619_v54 = vld [vmem:[#allocation2 + $0xbb0] sm:$0xff]  ;;  %v638_v55 = vld [vmem:[#allocation2 + $0xc48] sm:$0xff] }
  0xab   :  { %1799 = vmatpush1.bf16.msra.mxu0 %v1798_v9  ;;  %v1818_v9 = vpack.c.bf16 %v585_v62, %v581_v61  ;;  %v628_v61 = vld [vmem:[#allocation2 + $0xbf8] sm:$0xff]  ;;  %v635_v26 = vld [vmem:[#allocation2 + $0xc30] sm:$0xff] }
  0xac   :  { %2055 = vmatpush1.bf16.msra.mxu1 %v2054_v10  ;;  %1801 = vmatprep.subr.bf16.mxu0 %v1800_v11  ;;  %v2074_v10 = vpack.c.bf16 %v587_v1, %v583_v63  ;;  %v1820_v11 = vpack.c.bf16 %v594_v3, %v590_v2  ;;  %v2433_v63 = vld [vmem:[%s2577_s2] sm:$0xff]  ;;  %v46_v1 = vld [vmem:[%s2575_s0 + $0x68] sm:$0xff]  ;;  %v1834_v2 = vpack.c.bf16 %v617_v50, %v613_v49  ;;  %v640_v35 = vld [vmem:[#allocation2 + $0xc58] sm:$0xff] }
  0xad   :  { %2057 = vmatprep.subr.bf16.mxu1 %v2056_v16  ;;  %v2076_v16 = vpack.c.bf16 %v596_v6, %v592_v4  ;;  %v45_v3 = vld [vmem:[%s2575_s0 + $0x60] sm:$0xff]  ;;  %v2090_v4 = vpack.c.bf16 %v619_v54, %v615_v51  ;;  %v644_v36 = vld [vmem:[#allocation2 + $0xc78] sm:$0xff]  ;;  %v643_v50 = vld [vmem:[#allocation2 + $0xc70] sm:$0xff] }
  0xae   :  { %v2100_v49 = vpack.c.bf16 %v644_v36, %v640_v35  ;;  %v646_v51 = vld [vmem:[#allocation2 + $0xc88] sm:$0xff] }
  0xaf   :  { %1803 = vmatpush1.bf16.msra.mxu0 %v1802_v19  ;;  %v1822_v19 = vpack.c.bf16 %v593_v13, %v589_v12  ;;  %v627_v13 = vld [vmem:[#allocation2 + $0xbf0] sm:$0xff] }
  0xb0   :  { %2059 = vmatpush1.bf16.msra.mxu1 %v2058_v20  ;;  %1805 = vmatprep.subr.bf16.mxu0 %v1804_v21  ;;  %v2078_v20 = vpack.c.bf16 %v595_v58, %v591_v15  ;;  %v1824_v21 = vpack.c.bf16 %v602_v17, %v598_v22  ;;  %v630_v15 = vld [vmem:[#allocation2 + $0xc08] sm:$0xff]  ;;  %v120_v58 = vmul.f32 %v2400_v5, %v46_v1  ;;  %v632_v22 = vld [vmem:[#allocation2 + $0xc18] sm:$0xff] }
  0xb1   :  { %2061 = vmatprep.subr.bf16.mxu1 %v2060_v29  ;;  %v2080_v29 = vpack.c.bf16 %v604_v18, %v600_v25  ;;  %v636_v17 = vld [vmem:[#allocation2 + $0xc38] sm:$0xff] }
  0xb2   :  { %v2096_v14 = vpack.c.bf16 %v636_v17, %v632_v22 }
  0xb3   :  { %1807 = vmatpush1.bf16.msra.mxu0 %v1806_v32  ;;  %v85_v32 = vsub.s32 4, %v2285_v60 }
  0xb4   :  { %2063 = vmatpush1.bf16.msra.mxu1 %v2062_v23  ;;  %1809 = vmatprep.subr.bf16.mxu0 %v1808_v33  ;;  %v1826_v23 = vpack.c.bf16 %v601_v28, %v597_v27  ;;  %v2082_v33 = vpack.c.bf16 %v603_v30, %v599_v53  ;;  %v629_v53 = vld [vmem:[#allocation2 + $0xc00] sm:$0xff]  ;;  %v631_v30 = vld [vmem:[#allocation2 + $0xc10] sm:$0xff] }
  0xb5   :  { %2065 = vmatprep.subr.bf16.mxu1 %v2064_v37  ;;  %v607_v37 = vld [vmem:[#allocation2 + $0xb50] sm:$0xff] }
  0xb6   :  { %v2086_v46 = vpack.c.bf16 %v611_v38, %v607_v37  ;;  %v62_v38 = vld [vmem:[%s2575_s0 + $0xe8] sm:$0xff] }
  0xb7   :  { %1811 = vmatpush1.bf16.msra.mxu0 %v1810_v42  ;;  %v620_v42 = vld [vmem:[#allocation2 + $0xbb8] sm:$0xff] }
  0xb8   :  { %2067 = vmatpush1.bf16.msra.mxu1 %v2066_v43  ;;  %1813 = vmatprep.subr.bf16.mxu0 %v1812_v7  ;;  %v2421_v43 = vld [vmem:[%s2576_s1] sm:$0xff]  ;;  %v2088_v52 = vpack.c.bf16 %v620_v42, %v616_v41  ;;  %v2098_v41 = vpack.c.bf16 %v635_v26, %v631_v30  ;;  %v655_v30 = vld [vmem:[#allocation2 + $0xcd0] sm:$0xff]  ;;  %v666_v26 = vld [vmem:[#allocation2 + $0xd28] sm:$0xff] }
  0xb9   :  { %2069 = vmatprep.subr.bf16.mxu1 %v2068_v48  ;;  %v2424_v7 = vrot.slane %v2421_v43, %v85_v32  ;;  %v1832_v48 = vpack.c.bf16 %v618_v40, %v614_v39  ;;  %v61_v40 = vld [vmem:[%s2575_s0 + $0xe0] sm:$0xff] }
  0xbb   :  { %1815 = vmatpush1.bf16.msra.mxu0 %v1814_v56  ;;  %v622_v56 = vld [vmem:[#allocation2 + $0xbc8] sm:$0xff]  ;;  %v111_v62 = vmul.f32 %v2424_v7, %v37_v45  ;;  %v119_v18 = vmul.f32 %v2424_v7, %v45_v3  ;;  %v641_v45 = vld [vmem:[#allocation2 + $0xc60] sm:$0xff]  ;;  %v40_v3 = vld [vmem:[%s2575_s0 + $0x38] sm:$0xff] }
  0xbc   :  { %2071 = vmatpush1.bf16.msra.mxu1 %v2070_v57  ;;  %1817 = vmatprep.subr.bf16.mxu0 %v1816_v59  ;;  %v626_v57 = vld [vmem:[#allocation2 + $0xbe8] sm:$0xff]  ;;  %v624_v59 = vld [vmem:[#allocation2 + $0xbd8] sm:$0xff] }
  0xbd   :  { %2073 = vmatprep.subr.bf16.mxu1 %v2072_v0  ;;  %v2436_v0 = vrot.slane %v2433_v63, %v85_v32  ;;  %v1836_v6 = vpack.c.bf16 %v626_v57, %v622_v56  ;;  %v2092_v12 = vpack.c.bf16 %v628_v61, %v624_v59  ;;  %v642_v32 = vld [vmem:[#allocation2 + $0xc68] sm:$0xff]  ;;  %v136_v57 = vmul.f32 %v2400_v5, %v62_v38  ;;  %v648_v59 = vld [vmem:[#allocation2 + $0xc98] sm:$0xff]  ;;  %v663_v38 = vld [vmem:[#allocation2 + $0xd10] sm:$0xff] }
  0xbe   :  { %v1844_v42 = vpack.c.bf16 %v642_v32, %v638_v55  ;;  %v652_v61 = vld [vmem:[#allocation2 + $0xcb8] sm:$0xff] }
  0xbf   :  { %1819 = vmatpush1.bf16.msra.mxu0 %v1818_v9  ;;  %v621_v9 = vld [vmem:[#allocation2 + $0xbc0] sm:$0xff]  ;;  %v185_v25 = vadd.f32 %v2436_v0, %v111_v62  ;;  %v193_v37 = vadd.f32 %v2436_v0, %v119_v18  ;;  %v210_v22 = vadd.f32 %v2412_v24, %v136_v57  ;;  %v660_v18 = vld [vmem:[#allocation2 + $0xcf8] sm:$0xff] }
  0xc0   :  { %2075 = vmatpush1.bf16.msra.mxu1 %v2074_v10  ;;  %1821 = vmatprep.subr.bf16.mxu0 %v1820_v11  ;;  %v625_v10 = vld [vmem:[#allocation2 + $0xbe0] sm:$0xff]  ;;  %v623_v11 = vld [vmem:[#allocation2 + $0xbd0] sm:$0xff] }
  0xc1   :  { %2077 = vmatprep.subr.bf16.mxu1 %v2076_v16  ;;  %v634_v16 = vld [vmem:[#allocation2 + $0xc28] sm:$0xff]  ;;  %v2094_v27 = vpack.c.bf16 %v627_v13, %v623_v11  ;;  %v225_v62 = vmax.f32 %v193_v37, 0.0  ;;  %v647_v11 = vld [vmem:[#allocation2 + $0xc90] sm:$0xff]  ;;  %v2104_v13 = vpack.c.bf16 %v652_v61, %v648_v59  ;;  %v242_v55 = vmax.f32 %v210_v22, 0.0  ;;  %v661_v37 = vld [vmem:[#allocation2 + $0xd00] sm:$0xff] }
  0xc2   :  { %v1840_v28 = vpack.c.bf16 %v634_v16, %v630_v15  ;;  %v654_v15 = vld [vmem:[#allocation2 + $0xcc8] sm:$0xff]  ;;  %v675_v59 = vld [vmem:[#allocation2 + $0xd70] sm:$0xff] }
  0xc3   :  { %1823 = vmatpush1.bf16.msra.mxu0 %v1822_v19  ;;  %v54_v19 = vld [vmem:[%s2575_s0 + $0xa8] sm:$0xff] }
  0xc4   :  { %2079 = vmatpush1.bf16.msra.mxu1 %v2078_v20  ;;  %1825 = vmatprep.subr.bf16.mxu0 %v1824_v21  ;;  %v1838_v20 = vpack.c.bf16 %v625_v10, %v621_v9  ;;  %v53_v21 = vld [vmem:[%s2575_s0 + $0xa0] sm:$0xff]  ;;  %v658_v16 = vld [vmem:[#allocation2 + $0xce8] sm:$0xff] }
  0xc5   :  { %2081 = vmatprep.subr.bf16.mxu1 %v2080_v29  ;;  %v633_v29 = vld [vmem:[#allocation2 + $0xc20] sm:$0xff]  ;;  %v678_v61 = vld [vmem:[#allocation2 + $0xd88] sm:$0xff] }
  0xc6   :  { %v1842_v39 = vpack.c.bf16 %v633_v29, %v629_v53  ;;  %v649_v10 = vld [vmem:[#allocation2 + $0xca0] sm:$0xff] }
  0xc7   :  { %1827 = vmatpush1.bf16.msra.mxu0 %v1826_v23  ;;  %v194_v23 = vadd.f32 %v2412_v24, %v120_v58  ;;  %v653_v53 = vld [vmem:[#allocation2 + $0xcc0] sm:$0xff] }
  0xc8   :  { %2083 = vmatpush1.bf16.msra.mxu1 %v2082_v33  ;;  %1829 = vmatprep.subr.bf16.mxu0 %v1828_v34  ;;  %v128_v33 = vmul.f32 %v2400_v5, %v54_v19  ;;  %v217_v34 = vmax.f32 %v185_v25, 0.0  ;;  %v645_v5 = vld [vmem:[#allocation2 + $0xc80] sm:$0xff]  ;;  %v656_v25 = vld [vmem:[#allocation2 + $0xcd8] sm:$0xff] }
  0xc9   :  { %2085 = vmatprep.subr.bf16.mxu1 %v2084_v8  ;;  %v127_v8 = vmul.f32 %v2424_v7, %v53_v21  ;;  %v226_v54 = vmax.f32 %v194_v23, 0.0  ;;  %v1850_v21 = vpack.c.bf16 %v649_v10, %v645_v5  ;;  %v657_v29 = vld [vmem:[#allocation2 + $0xce0] sm:$0xff]  ;;  %v668_v23 = vld [vmem:[#allocation2 + $0xd38] sm:$0xff]  ;;  %v679_v10 = vld [vmem:[#allocation2 + $0xd90] sm:$0xff] }
  0xca   :  { %v202_v56 = vadd.f32 %v2412_v24, %v128_v33  ;;  %v2108_v24 = vpack.c.bf16 %v660_v18, %v656_v25  ;;  %v681_v5 = vld [vmem:[#allocation2 + $0xda0] sm:$0xff] }
  0xcb   :  { %1831 = vmatpush1.bf16.msra.mxu0 %v1830_v44  ;;  %v637_v44 = vld [vmem:[#allocation2 + $0xc40] sm:$0xff]  ;;  %v201_v1 = vadd.f32 %v2436_v0, %v127_v8 }
  0xcc   :  { %2087 = vmatpush1.bf16.msra.mxu1 %v2086_v46  ;;  %1833 = vmatprep.subr.bf16.mxu0 %v1832_v48  ;;  %v639_v46 = vld [vmem:[#allocation2 + $0xc50] sm:$0xff]  ;;  %v2465_v48 = vrot.slane %v2421_v43, %v97_v31  ;;  %v234_v58 = vmax.f32 %v202_v56, 0.0  ;;  %v665_v8 = vld [vmem:[#allocation2 + $0xd20] sm:$0xff] }
  0xcd   :  { %2089 = vmatprep.subr.bf16.mxu1 %v2088_v52  ;;  %v650_v52 = vld [vmem:[#allocation2 + $0xca8] sm:$0xff]  ;;  %v233_v19 = vmax.f32 %v201_v1, 0.0  ;;  %v671_v56 = vld [vmem:[#allocation2 + $0xd50] sm:$0xff]  ;;  %v680_v1 = vld [vmem:[#allocation2 + $0xd98] sm:$0xff] }
  0xce   :  { %v1848_v9 = vpack.c.bf16 %v650_v52, %v646_v51  ;;  %v114_v17 = vmul.f32 %v2465_v48, %v40_v3  ;;  %v669_v52 = vld [vmem:[#allocation2 + $0xd40] sm:$0xff] }
  0xcf   :  { %1835 = vmatpush1.bf16.msra.mxu0 %v1834_v2  ;;  %v135_v2 = vmul.f32 %v2424_v7, %v61_v40  ;;  %v651_v7 = vld [vmem:[#allocation2 + $0xcb0] sm:$0xff]  ;;  %v685_v18 = vld [vmem:[#allocation2 + $0xdc0] sm:$0xff] }
  0xd0   :  { %2091 = vmatpush1.bf16.msra.mxu1 %v2090_v4  ;;  %1837 = vmatprep.subr.bf16.mxu0 %v1836_v6  ;;  %v1846_v4 = vpack.c.bf16 %v641_v45, %v637_v44  ;;  %v2102_v6 = vpack.c.bf16 %v643_v50, %v639_v46  ;;  %v667_v40 = vld [vmem:[#allocation2 + $0xd30] sm:$0xff]  ;;  %v672_v45 = vld [vmem:[#allocation2 + $0xd58] sm:$0xff] }
  0xd1   :  { %2093 = vmatprep.subr.bf16.mxu1 %v2092_v12  ;;  %v2475_v12 = vrot.slane %v2433_v63, %v97_v31  ;;  %v659_v31 = vld [vmem:[#allocation2 + $0xcf0] sm:$0xff]  ;;  %v676_v46 = vld [vmem:[#allocation2 + $0xd78] sm:$0xff]  ;;  %v2114_v50 = vpack.c.bf16 %v667_v40, %v663_v38  ;;  %v705_v40 = vld [vmem:[#allocation2 + $0xe60] sm:$0xff] }
  0xd2   :  { %v2110_v35 = vpack.c.bf16 %v659_v31, %v655_v30  ;;  %v2116_v57 = vpack.c.bf16 %v676_v46, %v672_v45  ;;  %v700_v30 = vld [vmem:[#allocation2 + $0xe38] sm:$0xff]  ;;  %v710_v45 = vld [vmem:[#allocation2 + $0xe88] sm:$0xff] }
  0xd3   :  { %1839 = vmatpush1.bf16.msra.mxu0 %v1838_v20  ;;  %v209_v20 = vadd.f32 %v2436_v0, %v135_v2  ;;  %v188_v32 = vadd.f32 %v2475_v12, %v114_v17  ;;  %v664_v0 = vld [vmem:[#allocation2 + $0xd18] sm:$0xff]  ;;  %v714_v46 = vld [vmem:[#allocation2 + $0xea8] sm:$0xff] }
  0xd4   :  { %2095 = vmatpush1.bf16.msra.mxu1 %v2094_v27  ;;  %1841 = vmatprep.subr.bf16.mxu0 %v1840_v28  ;;  %v2106_v27 = vpack.c.bf16 %v651_v7, %v647_v11  ;;  %v1852_v28 = vpack.c.bf16 %v658_v16, %v654_v15  ;;  %v684_v2 = vld [vmem:[#allocation2 + $0xdb8] sm:$0xff]  ;;  %v686_v7 = vld [vmem:[#allocation2 + $0xdc8] sm:$0xff] }
  0xd5   :  { %2097 = vmatprep.subr.bf16.mxu1 %v2096_v14  ;;  %v662_v14 = vld [vmem:[#allocation2 + $0xd08] sm:$0xff]  ;;  %v241_v33 = vmax.f32 %v209_v20, 0.0  ;;  %v220_v44 = vmax.f32 %v188_v32, 0.0  ;;  %v2120_v11 = vpack.c.bf16 %v684_v2, %v680_v1  ;;  %v688_v16 = vld [vmem:[#allocation2 + $0xdd8] sm:$0xff]  ;;  %v687_v20 = vld [vmem:[#allocation2 + $0xdd0] sm:$0xff] }
  0xd6   :  { %1000 = vmatmul.mubr.f32.vlgmr.msra.gmra.mrb[0].mxu0 %v217_v34  ;;  %v1856_v36 = vpack.c.bf16 %v666_v26, %v662_v14  ;;  %v690_v15 = vld [vmem:[#allocation2 + $0xde8] sm:$0xff]  ;;  %v693_v26 = vld [vmem:[#allocation2 + $0xe00] sm:$0xff]  ;;  %v695_v32 = vld [vmem:[#allocation2 + $0xe10] sm:$0xff] }
  0xd7   :  { %1843 = vmatpush1.bf16.msra.mxu0 %v1842_v39  ;;  %1356 = vmatmul.mubr.f32.vlgmr.msra.gmra.mrb[0].mxu1 %v217_v34  ;;  %v1854_v34 = vpack.c.bf16 %v657_v29, %v653_v53  ;;  %v2112_v39 = vpack.c.bf16 %v668_v23, %v664_v0  ;;  %v1868_v25 = vpack.c.bf16 %v690_v15, %v686_v7  ;;  %v698_v53 = vld [vmem:[#allocation2 + $0xe28] sm:$0xff]  ;;  %v696_v29 = vld [vmem:[#allocation2 + $0xe18] sm:$0xff]  ;;  %v699_v23 = vld [vmem:[#allocation2 + $0xe30] sm:$0xff] }
  0xd8   :  { %2099 = vmatpush1.bf16.msra.mxu1 %v2098_v41  ;;  %1845 = vmatprep.subr.bf16.mxu0 %v1844_v42  ;;  %v670_v41 = vld [vmem:[#allocation2 + $0xd48] sm:$0xff]  ;;  %v2128_v0 = vpack.c.bf16 %v700_v30, %v696_v29  ;;  %v723_v15 = vld [vmem:[#allocation2 + $0xef0] sm:$0xff] }
  0xd9   :  { %2101 = vmatprep.subr.bf16.mxu1 %v2100_v49  ;;  %1005 = vmatprep.mubr.f32.mxu0 %v226_v54  ;;  %v674_v42 = vld [vmem:[#allocation2 + $0xd68] sm:$0xff]  ;;  %v1858_v49 = vpack.c.bf16 %v665_v8, %v661_v37  ;;  %v2130_v8 = vpack.c.bf16 %v699_v23, %v695_v32  ;;  %v737_v23 = vld [vmem:[#allocation2 + $0xf60] sm:$0xff] }
  0xda   :  { %1361 = vmatprep.mubr.f32.mxu1 %v226_v54  ;;  %1006 = vmatmul.mubr.f32.gmra.mrb[2].mxu0 %v225_v62  ;;  %v1860_v51 = vpack.c.bf16 %v674_v42, %v670_v41  ;;  %v673_v54 = vld [vmem:[#allocation2 + $0xd60] sm:$0xff]  ;;  %v703_v41 = vld [vmem:[#allocation2 + $0xe50] sm:$0xff]  ;;  %v718_v1 = vld [vmem:[#allocation2 + $0xec8] sm:$0xff] }
  0xdb   :  { %1847 = vmatpush1.bf16.msra.mxu0 %v1846_v4  ;;  %1362 = vmatmul.mubr.f32.gmra.mrb[2].mxu1 %v225_v62  ;;  %v682_v62 = vld [vmem:[#allocation2 + $0xda8] sm:$0xff]  ;;  %v1862_v3 = vpack.c.bf16 %v673_v54, %v669_v52  ;;  %v2118_v4 = vpack.c.bf16 %v675_v59, %v671_v56  ;;  %v1880_v54 = vpack.c.bf16 %v714_v46, %v710_v45  ;;  %v709_v56 = vld [vmem:[#allocation2 + $0xe80] sm:$0xff]  ;;  %v711_v59 = vld [vmem:[#allocation2 + $0xe90] sm:$0xff] }
  0xdc   :  { %2103 = vmatpush1.bf16.msra.mxu1 %v2102_v6  ;;  %1849 = vmatprep.subr.bf16.mxu0 %v1848_v9  ;;  %v1864_v6 = vpack.c.bf16 %v682_v62, %v678_v61  ;;  %v677_v9 = vld [vmem:[#allocation2 + $0xd80] sm:$0xff]  ;;  %v715_v62 = vld [vmem:[#allocation2 + $0xeb0] sm:$0xff]  ;;  %v722_v2 = vld [vmem:[#allocation2 + $0xee8] sm:$0xff] }
  0xdd   :  { %2105 = vmatprep.subr.bf16.mxu1 %v2104_v13  ;;  %1011 = vmatprep.mubr.f32.mxu0 %v234_v58  ;;  %v683_v13 = vld [vmem:[#allocation2 + $0xdb0] sm:$0xff]  ;;  %v1866_v22 = vpack.c.bf16 %v681_v5, %v677_v9  ;;  %v2138_v9 = vpack.c.bf16 %v715_v62, %v711_v59  ;;  %v1884_v5 = vpack.c.bf16 %v722_v2, %v718_v1  ;;  %v734_v29 = vld [vmem:[#allocation2 + $0xf48] sm:$0xff]  ;;  %v745_v46 = vld [vmem:[#allocation2 + $0xfa0] sm:$0xff] }
  0xde   :  { %1367 = vmatprep.mubr.f32.mxu1 %v234_v58  ;;  %1012 = vmatmul.mubr.f32.gmra.mrb[4].mxu0 %v233_v19  ;;  %v692_v58 = vld [vmem:[#allocation2 + $0xdf8] sm:$0xff]  ;;  %v2122_v17 = vpack.c.bf16 %v683_v13, %v679_v10  ;;  %v717_v10 = vld [vmem:[#allocation2 + $0xec0] sm:$0xff]  ;;  %v719_v13 = vld [vmem:[#allocation2 + $0xed0] sm:$0xff] }
  0xdf   :  { %1851 = vmatpush1.bf16.msra.mxu0 %v1850_v21  ;;  %1368 = vmatmul.mubr.f32.gmra.mrb[4].mxu1 %v233_v19  ;;  %v689_v19 = vld [vmem:[#allocation2 + $0xde0] sm:$0xff]  ;;  %v2124_v21 = vpack.c.bf16 %v692_v58, %v688_v16  ;;  %v726_v16 = vld [vmem:[#allocation2 + $0xf08] sm:$0xff]  ;;  %v47_v2 = vld [vmem:[%s2575_s0 + $0x70] sm:$0xff] }
  0xe0   :  { %2107 = vmatpush1.bf16.msra.mxu1 %v2106_v27  ;;  %1853 = vmatprep.subr.bf16.mxu0 %v1852_v28  ;;  %v691_v27 = vld [vmem:[#allocation2 + $0xdf0] sm:$0xff]  ;;  %v694_v28 = vld [vmem:[#allocation2 + $0xe08] sm:$0xff] }
  0xe1   :  { %2109 = vmatprep.subr.bf16.mxu1 %v2108_v24  ;;  %1017 = vmatprep.mubr.f32.mxu0 %v242_v55  ;;  %v1870_v24 = vpack.c.bf16 %v689_v19, %v685_v18  ;;  %v2126_v31 = vpack.c.bf16 %v691_v27, %v687_v20  ;;  %v1872_v14 = vpack.c.bf16 %v698_v53, %v694_v28  ;;  %v730_v58 = vld [vmem:[#allocation2 + $0xf28] sm:$0xff]  ;;  %v725_v20 = vld [vmem:[#allocation2 + $0xf00] sm:$0xff]  ;;  %v727_v27 = vld [vmem:[#allocation2 + $0xf10] sm:$0xff] }
  0xe2   :  { %1373 = vmatprep.mubr.f32.mxu1 %v242_v55  ;;  %1018 = vmatmul.mubr.f32.gmra.mrb[6].mxu0 %v241_v33  ;;  %v697_v55 = vld [vmem:[#allocation2 + $0xe20] sm:$0xff]  ;;  %v2142_v18 = vpack.c.bf16 %v723_v15, %v719_v13  ;;  %v1888_v19 = vpack.c.bf16 %v730_v58, %v726_v16  ;;  %v731_v53 = vld [vmem:[#allocation2 + $0xf30] sm:$0xff]  ;;  %v738_v30 = vld [vmem:[#allocation2 + $0xf68] sm:$0xff] }
  0xe3   :  { %1855 = vmatpush1.bf16.msra.mxu0 %v1854_v34  ;;  %1374 = vmatmul.mubr.f32.gmra.mrb[6].mxu1 %v241_v33  ;;  %v702_v33 = vld [vmem:[#allocation2 + $0xe48] sm:$0xff]  ;;  %v1874_v37 = vpack.c.bf16 %v697_v55, %v693_v26  ;;  %v2146_v55 = vpack.c.bf16 %v731_v53, %v727_v27  ;;  %v1892_v32 = vpack.c.bf16 %v738_v30, %v734_v29  ;;  %v63_v53 = vld [vmem:[%s2575_s0 + $0xf0] sm:$0xff] }
  0xe4   :  { %2111 = vmatpush1.bf16.msra.mxu1 %v2110_v35  ;;  %1857 = vmatprep.subr.bf16.mxu0 %v1856_v36  ;;  %v706_v34 = vld [vmem:[#allocation2 + $0xe68] sm:$0xff]  ;;  %v704_v35 = vld [vmem:[#allocation2 + $0xe58] sm:$0xff] }
  0xe5   :  { %2113 = vmatprep.subr.bf16.mxu1 %v2112_v39  ;;  %1088 = vmatprep.mubr.f32.mxu0 %v220_v44  ;;  %v708_v36 = vld [vmem:[#allocation2 + $0xe78] sm:$0xff]  ;;  %v1876_v38 = vpack.c.bf16 %v706_v34, %v702_v33  ;;  %v701_v39 = vld [vmem:[#allocation2 + $0xe40] sm:$0xff]  ;;  %v735_v33 = vld [vmem:[#allocation2 + $0xf50] sm:$0xff] }
  0xe6   :  { %1444 = vmatprep.mubr.f32.mxu1 %v220_v44  ;;  %v2132_v42 = vpack.c.bf16 %v708_v36, %v704_v35  ;;  %v707_v44 = vld [vmem:[#allocation2 + $0xe70] sm:$0xff]  ;;  %v742_v36 = vld [vmem:[#allocation2 + $0xf88] sm:$0xff] }
  0xe7   :  { %1859 = vmatpush1.bf16.msra.mxu0 %v1858_v49  ;;  %v712_v49 = vld [vmem:[#allocation2 + $0xe98] sm:$0xff]  ;;  %v2134_v52 = vpack.c.bf16 %v707_v44, %v703_v41  ;;  %v739_v35 = vld [vmem:[#allocation2 + $0xf70] sm:$0xff]  ;;  %v741_v41 = vld [vmem:[#allocation2 + $0xf80] sm:$0xff] }
  0xe8   :  { %2115 = vmatpush1.bf16.msra.mxu1 %v2114_v50  ;;  %1861 = vmatprep.subr.bf16.mxu0 %v1860_v51  ;;  %v716_v50 = vld [vmem:[#allocation2 + $0xeb8] sm:$0xff]  ;;  %v1878_v51 = vpack.c.bf16 %v705_v40, %v701_v39  ;;  %v2150_v44 = vpack.c.bf16 %v739_v35, %v735_v33  ;;  %v1898_v62 = vpack.c.bf16 %v745_v46, %v741_v41 }
  0xe9   :  { %2117 = vmatprep.subr.bf16.mxu1 %v2116_v57  ;;  %v713_v57 = vld [vmem:[#allocation2 + $0xea0] sm:$0xff]  ;;  %v2136_v61 = vpack.c.bf16 %v716_v50, %v712_v49  ;;  %v743_v49 = vld [vmem:[#allocation2 + $0xf90] sm:$0xff]  ;;  %v48_v50 = vld [vmem:[%s2575_s0 + $0x78] sm:$0xff] }
  0xea   :  { %v122_v1 = vmul.f32 %v2465_v48, %v48_v50 }
  0xeb   :  { %1863 = vmatpush1.bf16.msra.mxu0 %v1862_v3  ;;  %v720_v3 = vld [vmem:[#allocation2 + $0xed8] sm:$0xff] }
  0xec   :  { %2119 = vmatpush1.bf16.msra.mxu1 %v2118_v4  ;;  %1865 = vmatprep.subr.bf16.mxu0 %v1864_v6  ;;  %v724_v4 = vld [vmem:[#allocation2 + $0xef8] sm:$0xff]  ;;  %v1882_v6 = vpack.c.bf16 %v713_v57, %v709_v56  ;;  %v196_v16 = vadd.f32 %v2475_v12, %v122_v1 }
  0xed   :  { %2121 = vmatprep.subr.bf16.mxu1 %v2120_v11  ;;  %v721_v11 = vld [vmem:[#allocation2 + $0xee0] sm:$0xff]  ;;  %v2140_v7 = vpack.c.bf16 %v724_v4, %v720_v3  ;;  %v752_v56 = vld [vmem:[#allocation2 + $0xfd8] sm:$0xff] }
  0xee   :  { %v756_v57 = vld [vmem:[#allocation2 + $0xff8] sm:$0xff] }
  0xef   :  { %1867 = vmatpush1.bf16.msra.mxu0 %v1866_v22  ;;  %v728_v22 = vld [vmem:[#allocation2 + $0xf18] sm:$0xff] }
  0xf0   :  { %2123 = vmatpush1.bf16.msra.mxu1 %v2122_v17  ;;  %1869 = vmatprep.subr.bf16.mxu0 %v1868_v25  ;;  %v732_v17 = vld [vmem:[#allocation2 + $0xf38] sm:$0xff]  ;;  %v1886_v25 = vpack.c.bf16 %v721_v11, %v717_v10  ;;  %v751_v10 = vld [vmem:[#allocation2 + $0xfd0] sm:$0xff] }
  0xf1   :  { %2125 = vmatprep.subr.bf16.mxu1 %v2124_v21  ;;  %v729_v21 = vld [vmem:[#allocation2 + $0xf20] sm:$0xff]  ;;  %v2144_v28 = vpack.c.bf16 %v732_v17, %v728_v22  ;;  %v755_v11 = vld [vmem:[#allocation2 + $0xff0] sm:$0xff] }
  0xf2   :  { %v1890_v26 = vpack.c.bf16 %v729_v21, %v725_v20  ;;  %v55_v22 = vld [vmem:[%s2575_s0 + $0xb0] sm:$0xff]  ;;  %v2158_v17 = vpack.c.bf16 %v755_v11, %v751_v10  ;;  %v228_v21 = vmax.f32 %v196_v16, 0.0 }
  0xf3   :  { %1871 = vmatpush1.bf16.msra.mxu0 %v1870_v24  ;;  %v736_v24 = vld [vmem:[#allocation2 + $0xf58] sm:$0xff] }
  0xf4   :  { %2127 = vmatpush1.bf16.msra.mxu1 %v2126_v31  ;;  %1873 = vmatprep.subr.bf16.mxu0 %v1872_v14  ;;  %v740_v31 = vld [vmem:[#allocation2 + $0xf78] sm:$0xff]  ;;  %v93_v14 = vsub.s32 6, %v2285_v60 }
  0xf5   :  { %2129 = vmatprep.subr.bf16.mxu1 %v2128_v0  ;;  %v733_v0 = vld [vmem:[#allocation2 + $0xf40] sm:$0xff]  ;;  %v2148_v34 = vpack.c.bf16 %v740_v31, %v736_v24 }
  0xf6   :  { %v94_v39 = vrot.slane %v2421_v43, %v93_v14  ;;  %v1894_v40 = vpack.c.bf16 %v737_v23, %v733_v0  ;;  %v747_v43 = vld [vmem:[#allocation2 + $0xfb0] sm:$0xff] }
  0xf7   :  { %1875 = vmatpush1.bf16.msra.mxu0 %v1874_v37  ;;  %v746_v37 = vld [vmem:[#allocation2 + $0xfa8] sm:$0xff]  ;;  %v2154_v3 = vpack.c.bf16 %v747_v43, %v743_v49 }
  0xf8   :  { %2131 = vmatpush1.bf16.msra.mxu1 %v2130_v8  ;;  %1877 = vmatprep.subr.bf16.mxu0 %v1876_v38  ;;  %v744_v8 = vld [vmem:[#allocation2 + $0xf98] sm:$0xff]  ;;  %v1896_v45 = vpack.c.bf16 %v746_v37, %v742_v36  ;;  %v129_v20 = vmul.f32 %v94_v39, %v55_v22  ;;  %v137_v24 = vmul.f32 %v94_v39, %v63_v53  ;;  %v2241_v36 = vmov 1966171168  }
  0xf9   :  { %2133 = vmatprep.subr.bf16.mxu1 %v2132_v42  ;;  %v748_v38 = vld [vmem:[#allocation2 + $0xfb8] sm:$0xff]  ;;  %v39_v42 = vld [vmem:[%s2575_s0 + $0x30] sm:$0xff]  ;;  %v1528_v37 = vunpack.c.l.s4 %v2241_v36 }
  0xfa   :  { %v113_v59 = vmul.f32 %v94_v39, %v39_v42 }
  0xfb   :  { %1879 = vmatpush1.bf16.msra.mxu0 %v1878_v51  ;;  %v2152_v51 = vpack.c.bf16 %v748_v38, %v744_v8 }
  0xfc   :  { %2135 = vmatpush1.bf16.msra.mxu1 %v2134_v52  ;;  %1881 = vmatprep.subr.bf16.mxu0 %v1880_v54  ;;  %v750_v52 = vld [vmem:[#allocation2 + $0xfc8] sm:$0xff] }
  0xfd   :  { %2137 = vmatprep.subr.bf16.mxu1 %v2136_v61  ;;  %v754_v54 = vld [vmem:[#allocation2 + $0xfe8] sm:$0xff]  ;;  %v168_v61 = vrot.slane %v2433_v63, %v93_v14  ;;  %v2156_v63 = vpack.c.bf16 %v756_v57, %v752_v56 }
  0xfe   :  { %v1900_v4 = vpack.c.bf16 %v754_v54, %v750_v52 }
  0xff   :  { %1883 = vmatpush1.bf16.msra.mxu0 %v1882_v6  ;;  %v749_v6 = vld [vmem:[#allocation2 + $0xfc0] sm:$0xff]  ;;  %v187_v13 = vadd.f32 %v168_v61, %v113_v59  ;;  %v203_v30 = vadd.f32 %v168_v61, %v129_v20 }
 0x100   :  { %2139 = vmatpush1.bf16.msra.mxu1 %v2138_v9  ;;  %1885 = vmatprep.subr.bf16.mxu0 %v1884_v5  ;;  %v753_v9 = vld [vmem:[#allocation2 + $0xfe0] sm:$0xff]  ;;  %v56_v5 = vld [vmem:[%s2575_s0 + $0xb8] sm:$0xff] }
 0x101   :  { %2141 = vmatprep.subr.bf16.mxu1 %v2140_v7  ;;  %v121_v7 = vmul.f32 %v94_v39, %v47_v2  ;;  %v1902_v15 = vpack.c.bf16 %v753_v9, %v749_v6  ;;  %v130_v58 = vmul.f32 %v2465_v48, %v56_v5 }
 0x103   :  { %1887 = vmatpush1.bf16.msra.mxu0 %v1886_v25  ;;  %v64_v25 = vld [vmem:[%s2575_s0 + $0xf8] sm:$0xff]  ;;  %v204_v27 = vadd.f32 %v2475_v12, %v130_v58 }
 0x104   :  { %2143 = vmatpush1.bf16.msra.mxu1 %v2142_v18  ;;  %1889 = vmatprep.subr.bf16.mxu0 %v1888_v19  ;;  %v219_v18 = vmax.f32 %v187_v13, 0.0  ;;  %v195_v19 = vadd.f32 %v168_v61, %v121_v7 }
 0x105   :  { %2145 = vmatprep.subr.bf16.mxu1 %v2144_v28  ;;  %v138_v28 = vmul.f32 %v2465_v48, %v64_v25  ;;  %v236_v31 = vmax.f32 %v204_v27, 0.0 }
 0x106   :  { %v227_v29 = vmax.f32 %v195_v19, 0.0 }
 0x107   :  { %1891 = vmatpush1.bf16.msra.mxu0 %v1890_v26  ;;  %v212_v14 = vadd.f32 %v2475_v12, %v138_v28  ;;  %v235_v26 = vmax.f32 %v203_v30, 0.0 }
 0x108   :  { %2147 = vmatpush1.bf16.msra.mxu1 %v2146_v55  ;;  %1893 = vmatprep.subr.bf16.mxu0 %v1892_v32  ;;  %v211_v55 = vadd.f32 %v168_v61, %v137_v24 }
 0x109   :  { %2149 = vmatprep.subr.bf16.mxu1 %v2148_v34  ;;  %v244_v48 = vmax.f32 %v212_v14, 0.0 }
 0x10a   :  { %v243_v32 = vmax.f32 %v211_v55, 0.0 }
 0x10b   :  { %1895 = vmatpush1.bf16.msra.mxu0 %v1894_v40 }
 0x10c   :  { %2151 = vmatpush1.bf16.msra.mxu1 %v2150_v44  ;;  %1897 = vmatprep.subr.bf16.mxu0 %v1896_v45 }
 0x10d   :  { %2153 = vmatprep.subr.bf16.mxu1 %v2152_v51 }
 0x10f   :  { %1899 = vmatpush1.bf16.msra.mxu0 %v1898_v62 }
 0x110   :  { %2155 = vmatpush1.bf16.msra.mxu1 %v2154_v3  ;;  %1901 = vmatprep.subr.bf16.mxu0 %v1900_v4  ;;  %v1529_v4 = vunpack.c.0.s8 %v1528_v37 }
 0x111   :  { %2157 = vmatprep.subr.bf16.mxu1 %v2156_v63 }
 0x112   :  { %v2551_v20 = vsub.s32 %v1529_v4, %v2285_v60 }
 0x113   :  { %1903 = vmatpush1.bf16.msra.mxu0 %v1902_v15 }
 0x114   :  { %2159 = vmatpush1.bf16.msra.mxu1 %v2158_v17 }
 0x116   :  { %1089 = vmatmul.mubr.f32.vlgmr.msra.gmra.mrb[0].mxu0 %v219_v18 }
 0x117   :  { %1445 = vmatmul.mubr.f32.vlgmr.msra.gmra.mrb[0].mxu1 %v219_v18  ;;  %1094 = vmatprep.mubr.f32.mxu0 %v228_v21 }
 0x118   :  { %1450 = vmatprep.mubr.f32.mxu1 %v228_v21 }
 0x11a   :  { %1095 = vmatmul.mubr.f32.gmra.mrb[2].mxu0 %v227_v29 }
 0x11b   :  { %1451 = vmatmul.mubr.f32.gmra.mrb[2].mxu1 %v227_v29  ;;  %1100 = vmatprep.mubr.f32.mxu0 %v236_v31 }
 0x11c   :  { %1456 = vmatprep.mubr.f32.mxu1 %v236_v31 }
 0x11e   :  { %1101 = vmatmul.mubr.f32.gmra.mrb[4].mxu0 %v235_v26 }
 0x11f   :  { %1457 = vmatmul.mubr.f32.gmra.mrb[4].mxu1 %v235_v26  ;;  %1106 = vmatprep.mubr.f32.mxu0 %v244_v48 }
 0x120   :  { %1462 = vmatprep.mubr.f32.mxu1 %v244_v48 }
 0x122   :  { %1107 = vmatmul.mubr.f32.gmra.mrb[6].mxu0 %v243_v32 }
 0x123   :  { %1463 = vmatmul.mubr.f32.gmra.mrb[6].mxu1 %v243_v32 }
 0x1e9   :  { %v1090_v0 = vpop.f32.mrb[0].mxu0 }
 0x1ea   :  { %1469 = vst [vmem:[%s2579_s4] sm:$0xff] %v1090_v0  ;;  %v1446_v12 = vpop.f32.mrb[0].mxu1  ;;  %v1092_v23 = vpop.f32.mrb[1].mxu0  ;;  %v1555_v34 = vmul.f32 %v1090_v0, %v1090_v0 }
 0x1eb   :  { %1471 = vst [vmem:[%s2579_s4 + $0x10] sm:$0xff] %v1446_v12  ;;  %1470 = vst [vmem:[%s2579_s4 + $0x8] sm:$0xff] %v1092_v23  ;;  %v1448_v33 = vpop.f32.mrb[1].mxu1  ;;  %v1557_v8 = vmul.f32 %v1446_v12, %v1446_v12  ;;  %v1556_v38 = vmul.f32 %v1092_v23, %v1092_v23 }
 0x1ec   :  { %1472 = vst [vmem:[%s2579_s4 + $0x18] sm:$0xff] %v1448_v33  ;;  %v1558_v51 = vmul.f32 %v1448_v33, %v1448_v33 }
 0x1ed   :  { %v1096_v35 = vpop.f32.mrb[2].mxu0 }
 0x1ee   :  { %1473 = vst [vmem:[%s2579_s4 + $0x20] sm:$0xff] %v1096_v35  ;;  %v1485_v39 = vadd.f32 %v1096_v35, %v1090_v0  ;;  %v1559_v40 = vmul.f32 %v1096_v35, %v1096_v35  ;;  %v1452_v41 = vpop.f32.mrb[2].mxu1  ;;  %v1098_v42 = vpop.f32.mrb[3].mxu0 }
 0x1ef   :  { %1475 = vst [vmem:[%s2579_s4 + $0x30] sm:$0xff] %v1452_v41  ;;  %v1503_v44 = vadd.f32 %v1452_v41, %v1446_v12  ;;  %v1561_v45 = vmul.f32 %v1452_v41, %v1452_v41  ;;  %1474 = vst [vmem:[%s2579_s4 + $0x28] sm:$0xff] %v1098_v42  ;;  %v1494_v46 = vadd.f32 %v1098_v42, %v1092_v23  ;;  %v1454_v50 = vpop.f32.mrb[3].mxu1 }
 0x1f0   :  { %v1560_v49 = vmul.f32 %v1098_v42, %v1098_v42  ;;  %v1571_v43 = vadd.f32 %v1559_v40, %v1555_v34  ;;  %1476 = vst [vmem:[%s2579_s4 + $0x38] sm:$0xff] %v1454_v50  ;;  %v1512_v52 = vadd.f32 %v1454_v50, %v1448_v33  ;;  %v1562_v54 = vmul.f32 %v1454_v50, %v1454_v50 }
 0x1f1   :  { %v1589_v56 = vadd.f32 %v1561_v45, %v1557_v8  ;;  %v1102_v59 = vpop.f32.mrb[4].mxu0 }
 0x1f2   :  { %v1580_v57 = vadd.f32 %v1560_v49, %v1556_v38  ;;  %v1598_v61 = vadd.f32 %v1562_v54, %v1558_v51  ;;  %1477 = vst [vmem:[%s2579_s4 + $0x40] sm:$0xff] %v1102_v59  ;;  %v1486_v62 = vadd.f32 %v1485_v39, %v1102_v59  ;;  %v1563_v1 = vmul.f32 %v1102_v59, %v1102_v59  ;;  %v1458_v2 = vpop.f32.mrb[4].mxu1  ;;  %v1104_v3 = vpop.f32.mrb[5].mxu0 }
 0x1f3   :  { %1479 = vst [vmem:[%s2579_s4 + $0x50] sm:$0xff] %v1458_v2  ;;  %v1504_v6 = vadd.f32 %v1503_v44, %v1458_v2  ;;  %v1565_v9 = vmul.f32 %v1458_v2, %v1458_v2  ;;  %1478 = vst [vmem:[%s2579_s4 + $0x48] sm:$0xff] %v1104_v3  ;;  %v1495_v5 = vadd.f32 %v1494_v46, %v1104_v3  ;;  %v1460_v10 = vpop.f32.mrb[5].mxu1 }
 0x1f4   :  { %v1564_v63 = vmul.f32 %v1104_v3, %v1104_v3  ;;  %v1572_v11 = vadd.f32 %v1571_v43, %v1563_v1  ;;  %1480 = vst [vmem:[%s2579_s4 + $0x58] sm:$0xff] %v1460_v10  ;;  %v1513_v13 = vadd.f32 %v1512_v52, %v1460_v10  ;;  %v1566_v7 = vmul.f32 %v1460_v10, %v1460_v10 }
 0x1f5   :  { %v1590_v15 = vadd.f32 %v1589_v56, %v1565_v9  ;;  %v1108_v58 = vpop.f32.mrb[6].mxu0 }
 0x1f6   :  { %v1581_v16 = vadd.f32 %v1580_v57, %v1564_v63  ;;  %v1599_v22 = vadd.f32 %v1598_v61, %v1566_v7  ;;  %1481 = vst [vmem:[%s2579_s4 + $0x60] sm:$0xff] %v1108_v58  ;;  %v1487_v17 = vadd.f32 %v1486_v62, %v1108_v58  ;;  %v1567_v25 = vmul.f32 %v1108_v58, %v1108_v58  ;;  %v1464_v18 = vpop.f32.mrb[6].mxu1  ;;  %v1110_v19 = vpop.f32.mrb[7].mxu0 }
 0x1f7   :  { %1483 = vst [vmem:[%s2579_s4 + $0x70] sm:$0xff] %v1464_v18  ;;  %v1505_v21 = vadd.f32 %v1504_v6, %v1464_v18  ;;  %v1569_v27 = vmul.f32 %v1464_v18, %v1464_v18  ;;  %1482 = vst [vmem:[%s2579_s4 + $0x68] sm:$0xff] %v1110_v19  ;;  %v1496_v28 = vadd.f32 %v1495_v5, %v1110_v19  ;;  %v1466_v29 = vpop.f32.mrb[7].mxu1 }
 0x1f8   :  { %v1568_v53 = vmul.f32 %v1110_v19, %v1110_v19  ;;  %v1488_v30 = vrot.slane %v1487_v17, 4  ;;  %v1573_v24 = vadd.f32 %v1572_v11, %v1567_v25  ;;  %1484 = vst [vmem:[%s2579_s4 + $0x78] sm:$0xff] %v1466_v29  ;;  %v1514_v60 = vadd.f32 %v1513_v13, %v1466_v29 }
 0x1f9   :  { %v1570_v31 = vmul.f32 %v1466_v29, %v1466_v29  ;;  %v1506_v14 = vrot.slane %v1505_v21, 4  ;;  %v1591_v26 = vadd.f32 %v1590_v15, %v1569_v27  ;;  %v1497_v55 = vrot.slane %v1496_v28, 4 }
 0x1fa   :  { %v1582_v48 = vadd.f32 %v1581_v16, %v1568_v53  ;;  %v1489_v32 = vadd.f32 %v1488_v30, %v1487_v17  ;;  %v1574_v0 = vrot.slane %v1573_v24, 4  ;;  %v1515_v12 = vrot.slane %v1514_v60, 4 }
 0x1fb   :  { %v1600_v23 = vadd.f32 %v1599_v22, %v1570_v31  ;;  %v1507_v33 = vadd.f32 %v1506_v14, %v1505_v21  ;;  %v1592_v34 = vrot.slane %v1591_v26, 4  ;;  %v1498_v35 = vadd.f32 %v1497_v55, %v1496_v28 }
 0x1fc   :  { %v1583_v36 = vrot.slane %v1582_v48, 4  ;;  %v1490_v37 = vrot.slane %v1489_v32, 2  ;;  %v1575_v8 = vadd.f32 %v1574_v0, %v1573_v24  ;;  %v1516_v38 = vadd.f32 %v1515_v12, %v1514_v60 }
 0x1fd   :  { %v1601_v39 = vrot.slane %v1600_v23, 4  ;;  %v1508_v40 = vrot.slane %v1507_v33, 2  ;;  %v1593_v41 = vadd.f32 %v1592_v34, %v1591_v26  ;;  %v1499_v42 = vrot.slane %v1498_v35, 2 }
 0x1fe   :  { %v1584_v44 = vadd.f32 %v1583_v36, %v1582_v48  ;;  %v1491_v45 = vadd.f32 %v1490_v37, %v1489_v32  ;;  %v1576_v46 = vrot.slane %v1575_v8, 2  ;;  %v1517_v49 = vrot.slane %v1516_v38, 2 }
 0x1ff   :  { %v1602_v50 = vadd.f32 %v1601_v39, %v1600_v23  ;;  %v1509_v51 = vadd.f32 %v1508_v40, %v1507_v33  ;;  %v1594_v43 = vrot.slane %v1593_v41, 2  ;;  %v1500_v52 = vadd.f32 %v1499_v42, %v1498_v35 }
 0x200   :  { %v1585_v54 = vrot.slane %v1584_v44, 2  ;;  %v1492_v56 = vrot.slane %v1491_v45, 1  ;;  %v1577_v57 = vadd.f32 %v1576_v46, %v1575_v8  ;;  %v1518_v59 = vadd.f32 %v1517_v49, %v1516_v38 }
 0x201   :  { %v1603_v61 = vrot.slane %v1602_v50, 2  ;;  %v1510_v62 = vrot.slane %v1509_v51, 1  ;;  %v1595_v1 = vadd.f32 %v1594_v43, %v1593_v41  ;;  %v1501_v2 = vrot.slane %v1500_v52, 1 }
 0x202   :  { %v1586_v3 = vadd.f32 %v1585_v54, %v1584_v44  ;;  %v1493_v4 = vadd.f32 %v1492_v56, %v1491_v45  ;;  %v1578_v6 = vrot.slane %v1577_v57, 1  ;;  %v1519_v9 = vrot.slane %v1518_v59, 1 }
 0x203   :  { %v1604_v5 = vadd.f32 %v1603_v61, %v1602_v50  ;;  %v1511_v63 = vadd.f32 %v1510_v62, %v1509_v51  ;;  %v1596_v10 = vrot.slane %v1595_v1, 1  ;;  %v1502_v11 = vadd.f32 %v1501_v2, %v1500_v52 }
 0x204   :  { %v1587_v13 = vrot.slane %v1586_v3, 1  ;;  %v1579_v7 = vadd.f32 %v1578_v6, %v1577_v57  ;;  %v1520_v15 = vadd.f32 %v1519_v9, %v1518_v59 }
 0x205   :  { %v1605_v16 = vrot.slane %v1604_v5, 1  ;;  %v1597_v58 = vadd.f32 %v1596_v10, %v1595_v1  ;;  %v1525_v22 = vcombine.low %v1493_v4, %v1502_v11 }
 0x206   :  { %v1588_v17 = vadd.f32 %v1587_v13, %v1586_v3  ;;  %v1526_v25 = vcombine.low %v1511_v63, %v1520_v15 }
 0x207   :  { %v1606_v18 = vadd.f32 %v1605_v16, %v1604_v5  ;;  %v1533_v19 = vrot.slane %v1525_v22, %v2551_v20 }
 0x208   :  { %v1611_v21 = vcombine.low %v1579_v7, %v1588_v17  ;;  %v1540_v27 = vrot.slane %v1526_v25, %v2551_v20 }
 0x209   :  { %v1612_v28 = vcombine.low %v1597_v58, %v1606_v18 }
 0x20a   :  { %v1619_v53 = vrot.slane %v1611_v21, %v2551_v20  ;;  %v1541_v29 = vcombine.low %v1533_v19, %v1540_v27 }
 0x20b   :  { %v1626_v30 = vrot.slane %v1612_v28, %v2551_v20 }
 0x20c   :  { %v1548_v24 = vrot.slane %v1541_v29, %v2551_v20 }
 0x20d   :  { %v1627_v60 = vcombine.low %v1619_v53, %v1626_v30 }
 0x20e   :  { %1554 = vst.msk [vmem:[%s2580_s5] ss:$2 sm:$0xf] %vm1552_vm0, %v1548_v24 }
 0x20f   :  { %v1634_v31 = vrot.slane %v1627_v60, %v2551_v20 }
 0x211   :  { %1647 = vst.msk [vmem:[%s2580_s5 + $0x1] ss:$2 sm:$0xf] %vm1552_vm0, %v1634_v31 }
 0x212   :  { %1646 = vsyncpa [#allocation3], 1 }

</bundles_post_ra>
